<compile_context>
chip_gen: v7x
topology: tpu7x:2x2x1
jax: 0.10.0
libtpu: 0.0.40
codegen_flags: <defaults>
</compile_context>

<pallas_src>
import jax
import jax.numpy as jnp
from jax import lax
from jax.experimental import pallas as pl
from jax.experimental.pallas import tpu as pltpu


def res_stack_kernel(x_ref, w3_ref, b3_ref, w1_ref, b1_ref, o_ref,
                     resid_ref, pad_ref, slab_ref):
    # x_ref     : (1, H, W, Cp)        one image, NHWC, channels padded to 128k
    # w3_ref    : (1, 9*Cp, Crp)       this layer's 3x3 weights, im2col-flat
    # b3_ref    : (1, 1, Crp)
    # w1_ref    : (1, Crp, Cp)         this layer's 1x1 weights
    # b1_ref    : (1, 1, Cp)
    # o_ref     : (1, H, W, Cp)        output tile (written at last layer only)
    # resid_ref : (H*W, Cp)            resident residual stream (per image)
    # pad_ref   : (H+2, W+2, Cp)       zero-padded ReLU(x)
    # slab_ref  : (H*W, 9*Cp)          im2col patch slab
    _, H, W, Cp = x_ref.shape
    l = pl.program_id(1)
    n_layers = pl.num_programs(1)

    @pl.when(l == 0)
    def _():
        # Load this image's residual stream and zero the padded buffer once.
        resid_ref[...] = x_ref[0].reshape(H * W, Cp)
        pad_ref[...] = jnp.zeros(pad_ref.shape, pad_ref.dtype)

    # ReLU -> interior of the padded buffer (border stays zero forever).
    h = jnp.maximum(resid_ref[...], 0.0)
    pad_ref[1:H + 1, 1:W + 1, :] = h.reshape(H, W, Cp)

    # im2col: taps ordered (dy, dx) major, channel minor, matching the wrapper's
    # w3 reshape (3, 3, Cp, Crp) -> (9*Cp, Crp). Lane offsets are 128-multiples.
    for dy in range(3):
        for dx in range(3):
            t = dy * 3 + dx
            slab_ref[:, t * Cp:(t + 1) * Cp] = (
                pad_ref[dy:dy + H, dx:dx + W, :].reshape(H * W, Cp))

    # 3x3 conv as a single large-K MXU matmul, bias, ReLU.
    acc = jnp.dot(slab_ref[...], w3_ref[0],
                  preferred_element_type=jnp.float32)
    acc = jnp.maximum(acc + b3_ref[0], 0.0)

    # 1x1 conv + residual update (kept in VMEM scratch, never spilled as value).
    out = jnp.dot(acc, w1_ref[0], preferred_element_type=jnp.float32) + b1_ref[0]
    resid_ref[...] = resid_ref[...] + out

    # Final ReLU of the stack, written back once per image.
    @pl.when(l == n_layers - 1)
    def _():
        o_ref[...] = jnp.maximum(resid_ref[...], 0.0).reshape(1, H, W, Cp)


def _round_up(x, m):
    return (x + m - 1) // m * m


def res_stack_pallas(x_nchw, w3, b3, w1, b1):
    """x_nchw: (N, C, H, W) f32. w3: (L,3,3,C,Cr), b3: (L,1,Cr),
    w1: (L,Cr,C), b1: (L,1,C). Returns (N, C, H, W) f32."""
    N, C, H, W = x_nchw.shape
    L, _, _, _, Cr = w3.shape
    Cp = _round_up(C, 128)
    Crp = _round_up(Cr, 128)

    # NCHW -> NHWC and lane-dense channel padding (zeros are inert end-to-end).
    x_nhwc = jnp.transpose(x_nchw, (0, 2, 3, 1))
    x_p = jnp.pad(x_nhwc, ((0, 0), (0, 0), (0, 0), (0, Cp - C)))

    w3_p = jnp.pad(w3, ((0, 0), (0, 0), (0, 0), (0, Cp - C), (0, Crp - Cr)))
    w3_flat = w3_p.reshape(L, 9 * Cp, Crp)          # (dy, dx) major, channel minor
    b3_p = jnp.pad(b3, ((0, 0), (0, 0), (0, Crp - Cr)))
    w1_p = jnp.pad(w1, ((0, 0), (0, Crp - Cr), (0, Cp - C)))
    b1_p = jnp.pad(b1, ((0, 0), (0, 0), (0, Cp - C)))

    # VMEM budget: double-buffered in/out image tiles + double-buffered per-layer
    # weights + resident scratches, plus headroom for Mosaic internals.
    f32 = 4
    tile_io = H * W * Cp * f32
    tile_w = (9 * Cp * Crp + Crp + Crp * Cp + Cp) * f32
    scratch = (H * W * Cp + (H + 2) * (W + 2) * Cp + H * W * 9 * Cp) * f32
    vmem_bytes = 2 * tile_io * 2 + 2 * tile_w + scratch + (4 << 20)
    vmem_bytes = int(min(max(vmem_bytes, 16 << 20), 64 << 20))  # v7x-safe cap

    grid_spec = pltpu.PrefetchScalarGridSpec(
        num_scalar_prefetch=0,
        grid=(N, L),
        in_specs=[
            pl.BlockSpec((1, H, W, Cp), lambda n, l: (n, 0, 0, 0)),   # x
            pl.BlockSpec((1, 9 * Cp, Crp), lambda n, l: (l, 0, 0)),   # w3 (im2col)
            pl.BlockSpec((1, 1, Crp), lambda n, l: (l, 0, 0)),        # b3
            pl.BlockSpec((1, Crp, Cp), lambda n, l: (l, 0, 0)),       # w1
            pl.BlockSpec((1, 1, Cp), lambda n, l: (l, 0, 0)),         # b1
        ],
        out_specs=pl.BlockSpec((1, H, W, Cp), lambda n, l: (n, 0, 0, 0)),
        scratch_shapes=[
            pltpu.VMEM((H * W, Cp), jnp.float32),              # residual stream
            pltpu.VMEM((H + 2, W + 2, Cp), jnp.float32),       # padded ReLU(x)
            pltpu.VMEM((H * W, 9 * Cp), jnp.float32),          # im2col slab
        ],
    )

    out_p = pl.pallas_call(
        res_stack_kernel,
        out_shape=jax.ShapeDtypeStruct((N, H, W, Cp), jnp.float32),
        grid_spec=grid_spec,
        compiler_params=pltpu.CompilerParams(
            dimension_semantics=("parallel", "arbitrary"),
            vmem_limit_bytes=vmem_bytes),
    )(x_p, w3_flat, b3_p, w1_p, b1_p)

    out_nhwc = out_p[..., :C]
    return jnp.transpose(out_nhwc, (0, 3, 1, 2))


def res_stack_reference(x_nchw, w3, b3, w1, b1):
    """Pure-JAX reference matching the PyTorch module."""
    L = w3.shape[0]
    x = x_nchw
    for l in range(L):
        h = jax.nn.relu(x)
        y = lax.conv_general_dilated(
            h, w3[l], window_strides=(1, 1), padding="SAME",
            dimension_numbers=("NCHW", "HWIO", "NCHW"))
        y = y + b3[l].reshape(1, -1, 1, 1)
        y = jax.nn.relu(y)
        y = lax.conv_general_dilated(
            y, w1[l][None, None, :, :], window_strides=(1, 1), padding="SAME",
            dimension_numbers=("NCHW", "HWIO", "NCHW"))
        y = y + b1[l].reshape(1, -1, 1, 1)
        x = x + y
    return jax.nn.relu(x)


if __name__ == "__main__":
    # Small config consistent with ResStack(nResidLayers, nHiddens, nResidHiddens)
    nResidLayers = 2
    nHiddens = 8          # Cin  (residual-stream channels)
    nResidHiddens = 4     # Crh  (hidden channels inside each block)
    N, H, W = 2, 16, 16

    key = jax.random.PRNGKey(0)
    k_x, k_w3, k_b3, k_w1, k_b1 = jax.random.split(key, 5)

    x = jax.random.normal(k_x, (N, nHiddens, H, W), dtype=jnp.float32)  # NCHW
    w3 = jax.random.normal(k_w3, (nResidLayers, 3, 3, nHiddens, nResidHiddens),
                           dtype=jnp.float32) * 0.1
    b3 = jax.random.normal(k_b3, (nResidLayers, 1, nResidHiddens),
                           dtype=jnp.float32) * 0.1
    w1 = jax.random.normal(k_w1, (nResidLayers, nResidHiddens, nHiddens),
                           dtype=jnp.float32) * 0.1
    b1 = jax.random.normal(k_b1, (nResidLayers, 1, nHiddens),
                           dtype=jnp.float32) * 0.1

    out = jax.block_until_ready(res_stack_pallas(x, w3, b3, w1, b1))
    ref = jax.block_until_ready(res_stack_reference(x, w3, b3, w1, b1))

    assert out.shape == x.shape
    assert jnp.allclose(out, ref, atol=1e-4, rtol=1e-4), "mismatch vs reference"

    print("KERNEL_OK")
</pallas_src>

<mosaic_0001>
module attributes {stable_mosaic.version = 11 : i64} {
  func.func @res_stack_kernel(%arg0: i32, %arg1: i32, %arg2: memref<1x16x16x128xf32, #tpu.memory_space<vmem>>, %arg3: memref<1x1152x128xf32, #tpu.memory_space<vmem>>, %arg4: memref<1x1x128xf32, #tpu.memory_space<vmem>>, %arg5: memref<1x128x128xf32, #tpu.memory_space<vmem>>, %arg6: memref<1x1x128xf32, #tpu.memory_space<vmem>>, %arg7: memref<1x16x16x128xf32, #tpu.memory_space<vmem>>, %arg8: memref<256x128xf32, #tpu.memory_space<vmem>>, %arg9: memref<18x18x128xf32, #tpu.memory_space<vmem>>, %arg10: memref<256x1152xf32, #tpu.memory_space<vmem>>) attributes {dimension_semantics = [#tpu.dimension_semantics<parallel>, #tpu.dimension_semantics<arbitrary>], iteration_bounds = array<i64: 2, 2>, scalar_prefetch = 0 : i64, scratch_operands = 3 : i64, tpu.core_type = #tpu.core_type<tc>, window_params = [{transform_indices = @transform_0, window_bounds = array<i64: 1, 16, 16, 128>}, {transform_indices = @transform_1, window_bounds = array<i64: 1, 1152, 128>}, {transform_indices = @transform_2, window_bounds = array<i64: 1, 1, 128>}, {transform_indices = @transform_3, window_bounds = array<i64: 1, 128, 128>}, {transform_indices = @transform_4, window_bounds = array<i64: 1, 1, 128>}, {transform_indices = @transform_5, window_bounds = array<i64: 1, 16, 16, 128>}]} {
    %c0_i32 = arith.constant 0 : i32
    %0 = arith.cmpi eq, %arg1, %c0_i32 : i32
    %1 = arith.extui %0 : i1 to i32
    %c0_i32_0 = arith.constant 0 : i32
    %2 = arith.cmpi ne, %1, %c0_i32_0 : i32
    scf.if %2 {
      %c0_62 = arith.constant 0 : index
      %c0_63 = arith.constant 0 : index
      %c0_64 = arith.constant 0 : index
      %c0_65 = arith.constant 0 : index
      %58 = vector.load %arg2[%c0_62, %c0_63, %c0_64, %c0_65] : memref<1x16x16x128xf32, #tpu.memory_space<vmem>>, vector<1x16x16x128xf32>
      %59 = vector.shape_cast %58 : vector<1x16x16x128xf32> to vector<16x16x128xf32>
      %60 = vector.shape_cast %59 : vector<16x16x128xf32> to vector<256x128xf32>
      %c0_66 = arith.constant 0 : index
      %c0_67 = arith.constant 0 : index
      %61 = vector.load %arg8[%c0_66, %c0_67] : memref<256x128xf32, #tpu.memory_space<vmem>>, vector<256x128xf32>
      tpu.vector_store %arg8[%c0_66, %c0_67], %60 {strides = array<i32>} : memref<256x128xf32, #tpu.memory_space<vmem>>, vector<256x128xf32>,
      %cst_68 = arith.constant 0.000000e+00 : f32
      %62 = vector.broadcast %cst_68 : f32 to vector<18x18x128xf32>
      %c0_69 = arith.constant 0 : index
      %c0_70 = arith.constant 0 : index
      %c0_71 = arith.constant 0 : index
      %63 = vector.load %arg9[%c0_69, %c0_70, %c0_71] : memref<18x18x128xf32, #tpu.memory_space<vmem>>, vector<18x18x128xf32>
      tpu.vector_store %arg9[%c0_69, %c0_70, %c0_71], %62 {strides = array<i32>} : memref<18x18x128xf32, #tpu.memory_space<vmem>>, vector<18x18x128xf32>,
    } else {
    }
    %c0 = arith.constant 0 : index
    %c0_1 = arith.constant 0 : index
    %3 = vector.load %arg8[%c0, %c0_1] : memref<256x128xf32, #tpu.memory_space<vmem>>, vector<256x128xf32>
    %cst = arith.constant 0.000000e+00 : f32
    %4 = vector.broadcast %cst : f32 to vector<256x128xf32>
    %5 = arith.maximumf %3, %4 : vector<256x128xf32>
    %6 = vector.shape_cast %5 : vector<256x128xf32> to vector<16x16x128xf32>
    %c1 = arith.constant 1 : index
    %c1_2 = arith.constant 1 : index
    %c0_3 = arith.constant 0 : index
    %7 = vector.load %arg9[%c1, %c1_2, %c0_3] : memref<18x18x128xf32, #tpu.memory_space<vmem>>, vector<16x16x128xf32>
    tpu.vector_store %arg9[%c1, %c1_2, %c0_3], %6 {strides = array<i32>} : memref<18x18x128xf32, #tpu.memory_space<vmem>>, vector<16x16x128xf32>,
    %c0_4 = arith.constant 0 : index
    %c0_5 = arith.constant 0 : index
    %c0_6 = arith.constant 0 : index
    %8 = vector.load %arg9[%c0_4, %c0_5, %c0_6] : memref<18x18x128xf32, #tpu.memory_space<vmem>>, vector<16x16x128xf32>
    %9 = vector.shape_cast %8 : vector<16x16x128xf32> to vector<256x128xf32>
    %c0_7 = arith.constant 0 : index
    %c0_8 = arith.constant 0 : index
    %10 = vector.load %arg10[%c0_7, %c0_8] : memref<256x1152xf32, #tpu.memory_space<vmem>>, vector<256x128xf32>
    tpu.vector_store %arg10[%c0_7, %c0_8], %9 {strides = array<i32>} : memref<256x1152xf32, #tpu.memory_space<vmem>>, vector<256x128xf32>,
    %c0_9 = arith.constant 0 : index
    %c1_10 = arith.constant 1 : index
    %c0_11 = arith.constant 0 : index
    %11 = vector.load %arg9[%c0_9, %c1_10, %c0_11] : memref<18x18x128xf32, #tpu.memory_space<vmem>>, vector<16x16x128xf32>
    %12 = vector.shape_cast %11 : vector<16x16x128xf32> to vector<256x128xf32>
    %c0_12 = arith.constant 0 : index
    %c128 = arith.constant 128 : index
    %13 = vector.load %arg10[%c0_12, %c128] : memref<256x1152xf32, #tpu.memory_space<vmem>>, vector<256x128xf32>
    tpu.vector_store %arg10[%c0_12, %c128], %12 {strides = array<i32>} : memref<256x1152xf32, #tpu.memory_space<vmem>>, vector<256x128xf32>,
    %c0_13 = arith.constant 0 : index
    %c2 = arith.constant 2 : index
    %c0_14 = arith.constant 0 : index
    %14 = vector.load %arg9[%c0_13, %c2, %c0_14] : memref<18x18x128xf32, #tpu.memory_space<vmem>>, vector<16x16x128xf32>
    %15 = vector.shape_cast %14 : vector<16x16x128xf32> to vector<256x128xf32>
    %c0_15 = arith.constant 0 : index
    %c256 = arith.constant 256 : index
    %16 = vector.load %arg10[%c0_15, %c256] : memref<256x1152xf32, #tpu.memory_space<vmem>>, vector<256x128xf32>
    tpu.vector_store %arg10[%c0_15, %c256], %15 {strides = array<i32>} : memref<256x1152xf32, #tpu.memory_space<vmem>>, vector<256x128xf32>,
    %c1_16 = arith.constant 1 : index
    %c0_17 = arith.constant 0 : index
    %c0_18 = arith.constant 0 : index
    %17 = vector.load %arg9[%c1_16, %c0_17, %c0_18] : memref<18x18x128xf32, #tpu.memory_space<vmem>>, vector<16x16x128xf32>
    %18 = vector.shape_cast %17 : vector<16x16x128xf32> to vector<256x128xf32>
    %c0_19 = arith.constant 0 : index
    %c384 = arith.constant 384 : index
    %19 = vector.load %arg10[%c0_19, %c384] : memref<256x1152xf32, #tpu.memory_space<vmem>>, vector<256x128xf32>
    tpu.vector_store %arg10[%c0_19, %c384], %18 {strides = array<i32>} : memref<256x1152xf32, #tpu.memory_space<vmem>>, vector<256x128xf32>,
    %c1_20 = arith.constant 1 : index
    %c1_21 = arith.constant 1 : index
    %c0_22 = arith.constant 0 : index
    %20 = vector.load %arg9[%c1_20, %c1_21, %c0_22] : memref<18x18x128xf32, #tpu.memory_space<vmem>>, vector<16x16x128xf32>
    %21 = vector.shape_cast %20 : vector<16x16x128xf32> to vector<256x128xf32>
    %c0_23 = arith.constant 0 : index
    %c512 = arith.constant 512 : index
    %22 = vector.load %arg10[%c0_23, %c512] : memref<256x1152xf32, #tpu.memory_space<vmem>>, vector<256x128xf32>
    tpu.vector_store %arg10[%c0_23, %c512], %21 {strides = array<i32>} : memref<256x1152xf32, #tpu.memory_space<vmem>>, vector<256x128xf32>,
    %c1_24 = arith.constant 1 : index
    %c2_25 = arith.constant 2 : index
    %c0_26 = arith.constant 0 : index
    %23 = vector.load %arg9[%c1_24, %c2_25, %c0_26] : memref<18x18x128xf32, #tpu.memory_space<vmem>>, vector<16x16x128xf32>
    %24 = vector.shape_cast %23 : vector<16x16x128xf32> to vector<256x128xf32>
    %c0_27 = arith.constant 0 : index
    %c640 = arith.constant 640 : index
    %25 = vector.load %arg10[%c0_27, %c640] : memref<256x1152xf32, #tpu.memory_space<vmem>>, vector<256x128xf32>
    tpu.vector_store %arg10[%c0_27, %c640], %24 {strides = array<i32>} : memref<256x1152xf32, #tpu.memory_space<vmem>>, vector<256x128xf32>,
    %c2_28 = arith.constant 2 : index
    %c0_29 = arith.constant 0 : index
    %c0_30 = arith.constant 0 : index
    %26 = vector.load %arg9[%c2_28, %c0_29, %c0_30] : memref<18x18x128xf32, #tpu.memory_space<vmem>>, vector<16x16x128xf32>
    %27 = vector.shape_cast %26 : vector<16x16x128xf32> to vector<256x128xf32>
    %c0_31 = arith.constant 0 : index
    %c768 = arith.constant 768 : index
    %28 = vector.load %arg10[%c0_31, %c768] : memref<256x1152xf32, #tpu.memory_space<vmem>>, vector<256x128xf32>
    tpu.vector_store %arg10[%c0_31, %c768], %27 {strides = array<i32>} : memref<256x1152xf32, #tpu.memory_space<vmem>>, vector<256x128xf32>,
    %c2_32 = arith.constant 2 : index
    %c1_33 = arith.constant 1 : index
    %c0_34 = arith.constant 0 : index
    %29 = vector.load %arg9[%c2_32, %c1_33, %c0_34] : memref<18x18x128xf32, #tpu.memory_space<vmem>>, vector<16x16x128xf32>
    %30 = vector.shape_cast %29 : vector<16x16x128xf32> to vector<256x128xf32>
    %c0_35 = arith.constant 0 : index
    %c896 = arith.constant 896 : index
    %31 = vector.load %arg10[%c0_35, %c896] : memref<256x1152xf32, #tpu.memory_space<vmem>>, vector<256x128xf32>
    tpu.vector_store %arg10[%c0_35, %c896], %30 {strides = array<i32>} : memref<256x1152xf32, #tpu.memory_space<vmem>>, vector<256x128xf32>,
    %c2_36 = arith.constant 2 : index
    %c2_37 = arith.constant 2 : index
    %c0_38 = arith.constant 0 : index
    %32 = vector.load %arg9[%c2_36, %c2_37, %c0_38] : memref<18x18x128xf32, #tpu.memory_space<vmem>>, vector<16x16x128xf32>
    %33 = vector.shape_cast %32 : vector<16x16x128xf32> to vector<256x128xf32>
    %c0_39 = arith.constant 0 : index
    %c1024 = arith.constant 1024 : index
    %34 = vector.load %arg10[%c0_39, %c1024] : memref<256x1152xf32, #tpu.memory_space<vmem>>, vector<256x128xf32>
    tpu.vector_store %arg10[%c0_39, %c1024], %33 {strides = array<i32>} : memref<256x1152xf32, #tpu.memory_space<vmem>>, vector<256x128xf32>,
    %c0_40 = arith.constant 0 : index
    %c0_41 = arith.constant 0 : index
    %35 = vector.load %arg10[%c0_40, %c0_41] : memref<256x1152xf32, #tpu.memory_space<vmem>>, vector<256x1152xf32>
    %c0_42 = arith.constant 0 : index
    %c0_43 = arith.constant 0 : index
    %c0_44 = arith.constant 0 : index
    %36 = vector.load %arg3[%c0_42, %c0_43, %c0_44] : memref<1x1152x128xf32, #tpu.memory_space<vmem>>, vector<1x1152x128xf32>
    %37 = vector.shape_cast %36 : vector<1x1152x128xf32> to vector<1152x128xf32>
    %cst_45 = arith.constant dense<0.000000e+00> : vector<256x128xf32>
    %38 = tpu.matmul %35, %37, %cst_45 {dimension_numbers = #tpu.dot_dimension_numbers<[1], [0], [0], [1], [0, 0, 1, 1], [], []>} : vector<256x1152xf32>, vector<1152x128xf32>, vector<256x128xf32> -> vector<256x128xf32>
    %c0_46 = arith.constant 0 : index
    %c0_47 = arith.constant 0 : index
    %c0_48 = arith.constant 0 : index
    %39 = vector.load %arg4[%c0_46, %c0_47, %c0_48] : memref<1x1x128xf32, #tpu.memory_space<vmem>>, vector<1x1x128xf32>
    %40 = vector.shape_cast %39 : vector<1x1x128xf32> to vector<1x128xf32>
    %41 = vector.broadcast %40 : vector<1x128xf32> to vector<256x128xf32>
    %42 = arith.addf %38, %41 : vector<256x128xf32>
    %cst_49 = arith.constant 0.000000e+00 : f32
    %43 = vector.broadcast %cst_49 : f32 to vector<256x128xf32>
    %44 = arith.maximumf %42, %43 : vector<256x128xf32>
    %c0_50 = arith.constant 0 : index
    %c0_51 = arith.constant 0 : index
    %c0_52 = arith.constant 0 : index
    %45 = vector.load %arg5[%c0_50, %c0_51, %c0_52] : memref<1x128x128xf32, #tpu.memory_space<vmem>>, vector<1x128x128xf32>
    %46 = vector.shape_cast %45 : vector<1x128x128xf32> to vector<128x128xf32>
    %cst_53 = arith.constant dense<0.000000e+00> : vector<256x128xf32>
    %47 = tpu.matmul %44, %46, %cst_53 {dimension_numbers = #tpu.dot_dimension_numbers<[1], [0], [0], [1], [0, 0, 1, 1], [], []>} : vector<256x128xf32>, vector<128x128xf32>, vector<256x128xf32> -> vector<256x128xf32>
    %c0_54 = arith.constant 0 : index
    %c0_55 = arith.constant 0 : index
    %c0_56 = arith.constant 0 : index
    %48 = vector.load %arg6[%c0_54, %c0_55, %c0_56] : memref<1x1x128xf32, #tpu.memory_space<vmem>>, vector<1x1x128xf32>
    %49 = vector.shape_cast %48 : vector<1x1x128xf32> to vector<1x128xf32>
    %50 = vector.broadcast %49 : vector<1x128xf32> to vector<256x128xf32>
    %51 = arith.addf %47, %50 : vector<256x128xf32>
    %c0_57 = arith.constant 0 : index
    %c0_58 = arith.constant 0 : index
    %52 = vector.load %arg8[%c0_57, %c0_58] : memref<256x128xf32, #tpu.memory_space<vmem>>, vector<256x128xf32>
    %53 = arith.addf %52, %51 : vector<256x128xf32>
    %c0_59 = arith.constant 0 : index
    %c0_60 = arith.constant 0 : index
    %54 = vector.load %arg8[%c0_59, %c0_60] : memref<256x128xf32, #tpu.memory_space<vmem>>, vector<256x128xf32>
    tpu.vector_store %arg8[%c0_59, %c0_60], %53 {strides = array<i32>} : memref<256x128xf32, #tpu.memory_space<vmem>>, vector<256x128xf32>,
    %c1_i32 = arith.constant 1 : i32
    %55 = arith.cmpi eq, %arg1, %c1_i32 : i32
    %56 = arith.extui %55 : i1 to i32
    %c0_i32_61 = arith.constant 0 : i32
    %57 = arith.cmpi ne, %56, %c0_i32_61 : i32
    scf.if %57 {
      %c0_62 = arith.constant 0 : index
      %c0_63 = arith.constant 0 : index
      %58 = vector.load %arg8[%c0_62, %c0_63] : memref<256x128xf32, #tpu.memory_space<vmem>>, vector<256x128xf32>
      %cst_64 = arith.constant 0.000000e+00 : f32
      %59 = vector.broadcast %cst_64 : f32 to vector<256x128xf32>
      %60 = arith.maximumf %58, %59 : vector<256x128xf32>
      %61 = vector.shape_cast %60 : vector<256x128xf32> to vector<1x16x16x128xf32>
      %c0_65 = arith.constant 0 : index
      %c0_66 = arith.constant 0 : index
      %c0_67 = arith.constant 0 : index
      %c0_68 = arith.constant 0 : index
      %62 = vector.load %arg7[%c0_65, %c0_66, %c0_67, %c0_68] : memref<1x16x16x128xf32, #tpu.memory_space<vmem>>, vector<1x16x16x128xf32>
      tpu.vector_store %arg7[%c0_65, %c0_66, %c0_67, %c0_68], %61 {strides = array<i32>} : memref<1x16x16x128xf32, #tpu.memory_space<vmem>>, vector<1x16x16x128xf32>,
    } else {
    }
    return
  }
  func.func @transform_0(%arg0: i32, %arg1: i32) -> (i32, i32, i32, i32) {
    %c0_i32 = arith.constant 0 : i32
    %c0_i32_0 = arith.constant 0 : i32
    %c0_i32_1 = arith.constant 0 : i32
    %c0_i32_2 = arith.constant 0 : i32
    return %arg0, %c0_i32, %c0_i32_0, %c0_i32_1 : i32, i32, i32, i32
  }
  func.func @transform_1(%arg0: i32, %arg1: i32) -> (i32, i32, i32) {
    %c0_i32 = arith.constant 0 : i32
    %c0_i32_0 = arith.constant 0 : i32
    %c0_i32_1 = arith.constant 0 : i32
    return %arg1, %c0_i32, %c0_i32_0 : i32, i32, i32
  }
  func.func @transform_2(%arg0: i32, %arg1: i32) -> (i32, i32, i32) {
    %c0_i32 = arith.constant 0 : i32
    %c0_i32_0 = arith.constant 0 : i32
    %c0_i32_1 = arith.constant 0 : i32
    return %arg1, %c0_i32, %c0_i32_0 : i32, i32, i32
  }
  func.func @transform_3(%arg0: i32, %arg1: i32) -> (i32, i32, i32) {
    %c0_i32 = arith.constant 0 : i32
    %c0_i32_0 = arith.constant 0 : i32
    %c0_i32_1 = arith.constant 0 : i32
    return %arg1, %c0_i32, %c0_i32_0 : i32, i32, i32
  }
  func.func @transform_4(%arg0: i32, %arg1: i32) -> (i32, i32, i32) {
    %c0_i32 = arith.constant 0 : i32
    %c0_i32_0 = arith.constant 0 : i32
    %c0_i32_1 = arith.constant 0 : i32
    return %arg1, %c0_i32, %c0_i32_0 : i32, i32, i32
  }
  func.func @transform_5(%arg0: i32, %arg1: i32) -> (i32, i32, i32, i32) {
    %c0_i32 = arith.constant 0 : i32
    %c0_i32_0 = arith.constant 0 : i32
    %c0_i32_1 = arith.constant 0 : i32
    %c0_i32_2 = arith.constant 0 : i32
    return %arg0, %c0_i32, %c0_i32_0, %c0_i32_1 : i32, i32, i32, i32
  }
}

</mosaic_0001>

<bundles_post_ra>
// kernel: tpu_custom_call.1
= control target key start
LH: loop header
LB: loop body
LE: loop exit
PB: predicated region body
PF: predicated region fallthrough
CT: control target
= control target key end

     0   :  { %s6069_s0 = inlined_call_operand.hbm [shape: f32[2,16,16,128], index: 0, kind: input, shape index: {}]   ;;  %s6070_s1 = inlined_call_operand.hbm [shape: f32[2,1152,128], index: 1, kind: input, shape index: {}]   ;;  %s6071_s2 = inlined_call_operand.hbm [shape: f32[2,1,128], index: 2, kind: input, shape index: {}]   ;;  %s6072_s3 = inlined_call_operand.hbm [shape: f32[2,128,128], index: 3, kind: input, shape index: {}]   ;;  %s6073_s4 = inlined_call_operand.hbm [shape: f32[2,1,128], index: 4, kind: input, shape index: {}]   ;;  %s6074_s5 = inlined_call_operand.hbm [shape: f32[2,16,16,128], index: 5, kind: output, shape index: {}]  }
   0x1   :  { %6097 = sst [smem:[#allocation31_spill]] %s6069_s0 }
   0x2   :  { %6098 = sst [smem:[#allocation32_spill]] %s6070_s1 }
   0x3   :  { %6099 = sst [smem:[#allocation33_spill]] %s6072_s3 }
   0x4   :  { %6100 = sst [smem:[#allocation34_spill]] %s6074_s5 }
   0x5   :  { %10 = vsyncpa [#allocation6], 0 }
   0x6   :  { %12 = vsyncpa [#allocation6 + $0x1], 0 }
   0x7   :  { %13 = vsyncpa [#allocation9], 0 }
   0x8   :  { %15 = vsyncpa [#allocation9 + $0x1], 0 }
   0x9   :  { %16 = vsyncpa [#allocation12], 0 }
   0xa   :  { %18 = vsyncpa [#allocation12 + $0x1], 0 }
   0xb   :  { %19 = vsyncpa [#allocation7], 0 }
   0xc   :  { %21 = vsyncpa [#allocation7 + $0x1], 0  ;;  %s4646_s18 = smov 0   ;;  %s4648_s19 = smov 0  }
   0xd   :  { %s4650_s20 = smov 0   ;;  %s4652_s21 = smov 0  }
   0xe   :  { %s4654_s22 = smov 0   ;;  %s4656_s23 = smov 0  }
   0xf   :  { %s4658_s24 = smov 0   ;;  %s4660_s25 = smov 0  }
  0x10   :  { %s4662_s26 = smov 0   ;;  %s4664_s27 = smov 0  }
  0x11   :  { %s4666_s28 = smov 0  }
  0x12 LB: > { %6101 = sst [smem:[#allocation19_spill]] %s4566_s19  ;;  %p6076_p0 = scmp.eq.s32.totalorder %s4602_s28, 0  ;;  %s4602_s28 = sphi %s4666_s28, %s27_s28   ;;  %s4598_s27 = sphi %s4664_s27, %s6156_s27   ;;  %s4594_s26 = sphi %s4662_s26, %s6162_s26   ;;  %s4590_s25 = sphi %s4660_s25, %s6154_s25   ;;  %s4586_s24 = sphi %s4658_s24, %s6161_s24   ;;  %s4582_s23 = sphi %s4656_s23, %s6153_s23   ;;  %s4578_s22 = sphi %s4654_s22, %s6160_s22   ;;  %s4574_s21 = sphi %s4652_s21, %s6159_s21   ;;  %s4570_s20 = sphi %s4650_s20, %s6158_s20   ;;  %s4566_s19 = sphi %s4648_s19, %s6157_s19   ;;  %s4562_s18 = sphi %s4646_s18, %s6150_s18  }
  0x13   : > { %6102 = sst [smem:[#allocation20_spill]] %s4582_s23  ;;  %p79_p1 = scmp.ne.s32.totalorder %s4570_s20, %s4566_s19 }
  0x14   : > { %6103 = sst [smem:[#allocation21_spill]] %s4586_s24  ;;  %p6075_p4 = scmp.lt.s32.totalorder %s4602_s28, 4 }
  0x15   : > { %6104 = sst [smem:[#allocation22_spill]] %s4590_s25  ;;  %p81_p3 = por %p79_p1, %p6076_p0 }
  0x16   : > { %6105 = sst [smem:[#allocation23_spill]] %s4598_s27  ;;  %s6077_s6 = sand.u32 1, %s4602_s28  }
  0x17   : > { %s4713_s7 = sand.u32 1, %s4570_s20   ;;  %s4177_s9 = smul.u32 18432, %s4594_s26 }
  0x18   : > { %s4176_s8 = smul.u32 1152, %s4713_s7  ;;  %p4719_p5 = pnand %p6075_p4, %p81_p3 }
  0x19   : > { %s6107_s1 = sld [smem:[#allocation32_spill]]  ;;  %s4733_s16 = scalar_lea.sflag [#allocation9], %s6077_s6 }
  0x1a   : > { %s6106_s10 = scalar_select %p4719_p5, 1, 0 }
  0x1b   : > { %s238_s14 = scalar_lea.vmem [#allocation8], %s4176_s8  ;;  %p4739_p8 = pneg %p4719_p5 }
  0x1c   : > { %s245_s15 = sshll.u32 %s238_s14, 4  ;;  %s4729_s15 = int_to_ptr.vmem [resolvable:$true] %s245_s15 }
  0x1f   : > { %s4727_s13 = scalar_lea.hbm %s6107_s1, %s4177_s9  ;;  %s4327_s8 = scalar_lea.hbm %s6107_s1, 36864 }
  0x20   : > { %s4322_s17 = scalar_lea.hbm %s4727_s13, 18432  ;;  %p4328_p11 = scmp.lt.u32.totalorder %s4727_s13, %s6107_s1 }
  0x21   : > { %p4323_p7 = scmp.ne.s32.totalorder %s4727_s13, %s4322_s17  ;;  %p4329_p12 = scmp.lt.u32.totalorder %s4327_s8, %s4322_s17 }
  0x22   : > { %p4331_p1 = scmp.lt.u32.totalorder %s4322_s17, %s4727_s13 }
  0x23   : > { %p4325_p9 = pnand %p4739_p8, %p4323_p7  ;;  %p4330_p13 = por %p4329_p12, %p4328_p11 }
  0x25   : > { %p4326_p10 = pneg %p4325_p9  ;;  %p4332_p3 = por %p4331_p1, %p4330_p13 }
  0x27   : > { %p4333_p4 = pnand %p4332_p3, %p4326_p10 }
  0x29   : > { %4336 = shalt.err (!%p4333_p4)
}
  0x2a   : > { %s4337_s29 = scalar_lea.vmem %s4729_s15, 18432  ;;  %s4604_s9 = smov [#allocation8]  }
  0x2b   : > { %p4338_p7 = scmp.ne.s32.totalorder %s4729_s15, %s4337_s29  ;;  %s4342_s11 = sshll.u32 %s4604_s9, 4  ;;  %s4343_s11 = int_to_ptr.vmem [resolvable:$false] %s4342_s11 }
  0x2c   : > { %s4344_s12 = scalar_lea.vmem %s4343_s11, 36864  ;;  %p4345_p0 = scmp.lt.s32.totalorder %s4729_s15, %s4343_s11 }
  0x2d   : > { %p4340_p9 = pnand %p4338_p7, %p4739_p8  ;;  %p4346_p6 = scmp.lt.s32.totalorder %s4344_s12, %s4337_s29 }
  0x2f   : > { %p4341_p2 = pneg %p4340_p9  ;;  %p4347_p11 = por %p4346_p6, %p4345_p0 }
  0x31   : > { %p4348_p12 = pnand %p4347_p11, %p4341_p2 }
  0x33   : > { %4351 = shalt.err (!%p4348_p12)
}
  0x34   : > { %s6079_s17 = smov 128   ;;  %s6081_s8 = smov 8  }
  0x35   : > { %4197 = dma.hbm_to_vmem [thread:$0]  (!%p4719_p5), %s4727_s13, 18432, %s4729_s15, %s4733_s16, %s6079_s17, %s6079_s17, %s6081_s8  }
  0x36   : > { %p308_p0 = scmp.lt.s32.totalorder %s4602_s28, 5  ;;  %s3420_s29 = sshll.u32 %s4713_s7, 7 }
  0x37   : > { %s3438_s14 = sshll.u32 %s4594_s26, 11  ;;  %p6109_p2 = scmp.ge.s32.totalorder %s4602_s28, 1 }
  0x38   : > { %s6112_s3 = sld [smem:[#allocation33_spill]]  ;;  %s276_s1 = scalar_lea.vmem [#allocation11], %s3420_s29 }
  0x39   : > { %p4771_p4 = pnand %p6109_p2, %p308_p0  ;;  %s283_s5 = sshll.u32 %s276_s1, 4  ;;  %s4780_s5 = int_to_ptr.vmem [resolvable:$true] %s283_s5 }
  0x3a   : > { %s6113_s13 = sand.u32 1, %s4602_s28  }
  0x3b   : > { %s6110_s9 = scalar_select %p4771_p4, 1, 0 }
  0x3c   : > { %s4784_s15 = scalar_lea.sflag [#allocation12], %s6113_s13 }
  0x3d   : > { %6111 = sst [smem:[#allocation24_spill]] %s6110_s9 }
  0x3e   : > { %s4778_s6 = scalar_lea.hbm %s6112_s3, %s3438_s14  ;;  %6114 = sst [smem:[#allocation25_spill]] %s4784_s15 }
  0x3f   : > { %s4352_s17 = scalar_lea.hbm %s4778_s6, 2048  ;;  %s4357_s14 = scalar_lea.hbm %s6112_s3, 4096 }
  0x40   : > { %p4353_p6 = scmp.ne.s32.totalorder %s4778_s6, %s4352_s17  ;;  %p4358_p1 = scmp.lt.u32.totalorder %s4778_s6, %s6112_s3 }
  0x41   : > { %p4359_p3 = scmp.lt.u32.totalorder %s4357_s14, %s4352_s17  ;;  %p4361_p9 = scmp.lt.u32.totalorder %s4352_s17, %s4778_s6 }
  0x42   : > { %p4355_p10 = pnand %p4353_p6, %p4739_p8 }
  0x43   : > { %p4360_p7 = por %p4359_p3, %p4358_p1 }
  0x44   : > { %p4356_p13 = pneg %p4355_p10 }
  0x45   : > { %p4362_p11 = por %p4361_p9, %p4360_p7 }
  0x47   : > { %p4363_p12 = pnand %p4362_p11, %p4356_p13 }
  0x49   : > { %4366 = shalt.err (!%p4363_p12)
}
  0x4a   : > { %s4367_s1 = scalar_lea.vmem %s4780_s5, 2048  ;;  %s4607_s8 = smov [#allocation11]  }
  0x4b   : > { %p4368_p0 = scmp.ne.s32.totalorder %s4780_s5, %s4367_s1  ;;  %s4372_s29 = sshll.u32 %s4607_s8, 4  ;;  %s4373_s29 = int_to_ptr.vmem [resolvable:$false] %s4372_s29 }
  0x4c   : > { %s4374_s25 = scalar_lea.vmem %s4373_s29, 4096  ;;  %p4375_p10 = scmp.lt.s32.totalorder %s4780_s5, %s4373_s29 }
  0x4d   : > { %p4370_p2 = pnand %p4368_p0, %p4739_p8  ;;  %p4376_p4 = scmp.lt.s32.totalorder %s4374_s25, %s4367_s1 }
  0x4f   : > { %p4371_p6 = pneg %p4370_p2  ;;  %p4377_p1 = por %p4376_p4, %p4375_p10 }
  0x51   : > { %p4378_p3 = pnand %p4377_p1, %p4371_p6 }
  0x53   : > { %4381 = shalt.err (!%p4378_p3)
}
  0x54   : > { %s6115_s17 = smov 8   ;;  %s6116_s13 = smov 128  }
  0x55   : > { %4203 = dma.hbm_to_vmem [thread:$0]  (!%p4719_p5), %s4778_s6, 2048, %s4780_s5, %s4784_s15, %s6116_s13, %s6116_s13, %s6115_s17  }
  0x56   : > { %s4812_s11 = sadd.s32 4294967295, %s4602_s28   ;;  %s3412_s14 = sadd.s32 4294967294, %s4602_s28  }
  0x57   : > { %s6117_s12 = sadd.s32 1, %s4594_s26  ;;  %s39_s1 = sadd.s32 1, %s4598_s27 }
  0x58   : > { %p37_p4 = scmp.ge.s32.totalorder %s6117_s12, 2  ;;  %s46_s8 = sadd.s32 1, %s4582_s23 }
  0x59   : > { %s6118_s29 = smov %s6117_s12  ;;  %p53_p13 = scmp.ne.s32.totalorder %s4582_s23, %s4578_s22 }
  0x5a   : > { %s6164_s29 = smov (%p37_p4, %s6118_s29), 0  ;;  %s6166_s1 = smov (!%p37_p4, %s39_s1), %s4598_s27 }
  0x5b   : > { %6119 = sst [smem:[#allocation26_spill]] %s6164_s29  ;;  %p59_p7 = scmp.ne.s32.totalorder %s4578_s22, %s4574_s21 }
  0x5c   : > { %p41_p9 = scmp.ge.s32.totalorder %s6166_s1, 2  ;;  %p60_p11 = scmp.eq.s32.totalorder %s4812_s11, 0 }
  0x5d   : > { %p6120_p12 = scmp.eq.s32.totalorder %s4602_s28, 0  ;;  %s69_s6 = ssub.s32 %s4594_s26, %s6164_s29 }
  0x5e   : > { %s6168_s1 = smov (%p41_p9, %s6166_s1), 0  ;;  %p4845_p2 = por %p60_p11, %p59_p7 }
  0x5f   : > { %p4834_p0 = por %p6120_p12, %p53_p13  ;;  %6122 = sst [smem:[#allocation27_spill]] %s6168_s1 }
  0x60   : > { %s6123_s25 = scalar_select %p4845_p2, 1, 0 }
  0x61   : > { %p70_p6 = scmp.eq.s32.totalorder %s69_s6, 0  ;;  %s43_s12 = ssub.s32 %s4598_s27, %s6168_s1 }
  0x62   : > { %p6124_p10 = scmp.ne.s32.totalorder %s4566_s19, %s4562_s18  ;;  %p44_p3 = scmp.eq.s32.totalorder %s43_s12, 0 }
  0x63   : > { %p187_p4 = scmp.eq.s32.totalorder %s4812_s11, 3  ;;  %s6127_s29 = sadd.s32 1, %s4570_s20 }
  0x64   : > { %p4854_p1 = por %p6124_p10, %p60_p11  ;;  %p193_p12 = scmp.eq.s32.totalorder %s3412_s14, 3 }
  0x65   : > { %s4862_s24 = scalar_select %p70_p6, %s4570_s20, %s6127_s29  }
  0x66   : > { %s6125_s3 = scalar_select %p4854_p1, 1, 0 }
  0x67   : > { %6128 = sst [smem:[#allocation29_spill]] %s4862_s24  ;;  %p4870_p9 = por %p187_p4, %p53_p13 }
  0x68   : > { %6126 = sst [smem:[#allocation28_spill]] %s6125_s3  ;;  %s213_s6 = sand.u32 1, %s4582_s23  }
  0x69   : > { %s4865_s9 = scalar_select %p44_p3, %s4582_s23, %s46_s8  }
  0x6a   : > { %s6130_s15 = scalar_select %p4870_p9, 1, 0 }
  0x6b   : > { %6129 = sst [smem:[#allocation30_spill]] %s4865_s9  ;;  %s3437_s1 = sshll.u32 %s4598_s27, 12 }
  0x6c   : > { %p4879_p11 = por %p193_p12, %p59_p7  ;;  %s3415_s12 = sshll.u32 %s213_s6, 8 }
  0x6d   : > { %s6132_s0 = sld [smem:[#allocation31_spill]]  ;;  %p6133_p6 = scmp.lt.s32.totalorder %s4602_s28, 4 }
  0x6e   : > { %s6131_s18 = scalar_select %p4879_p11, 1, 0 }
  0x6f   : > { %p4892_p13 = pnand %p6133_p6, %p4834_p0  ;;  %s217_s8 = scalar_lea.vmem [#allocation5], %s3415_s12 }
  0x70   : > { %s224_s27 = sshll.u32 %s217_s8, 4  ;;  %s4898_s9 = scalar_lea.sflag [#allocation6], %s213_s6  ;;  %s4896_s27 = int_to_ptr.vmem [resolvable:$true] %s224_s27 }
  0x71   : > { %p4384_p10 = pneg %p4892_p13 }
  0x73   : > { %s4886_s29 = scalar_lea.hbm %s6132_s0, %s3437_s1  ;;  %s4387_s5 = scalar_lea.hbm %s6132_s0, 8192 }
  0x74   : > { %s4382_s3 = scalar_lea.hbm %s4886_s29, 4096  ;;  %p4388_p0 = scmp.lt.u32.totalorder %s4886_s29, %s6132_s0 }
  0x75   : > { %p4383_p7 = scmp.ne.s32.totalorder %s4886_s29, %s4382_s3  ;;  %p4389_p12 = scmp.lt.u32.totalorder %s4387_s5, %s4382_s3 }
  0x76   : > { %p4391_p11 = scmp.lt.u32.totalorder %s4382_s3, %s4886_s29 }
  0x77   : > { %p4385_p3 = pnand %p4384_p10, %p4383_p7  ;;  %p4390_p6 = por %p4389_p12, %p4388_p0 }
  0x79   : > { %p4386_p4 = pneg %p4385_p3  ;;  %p4392_p9 = por %p4391_p11, %p4390_p6 }
  0x7b   : > { %p4393_p1 = pnand %p4392_p9, %p4386_p4 }
  0x7d   : > { %4396 = shalt.err (!%p4393_p1)
}
  0x7e   : > { %s4397_s6 = scalar_lea.vmem %s4896_s27, 4096  ;;  %s4608_s12 = smov [#allocation5]  }
  0x7f   : > { %p4398_p7 = scmp.ne.s32.totalorder %s4896_s27, %s4397_s6  ;;  %s4402_s8 = sshll.u32 %s4608_s12, 4  ;;  %s4403_s8 = int_to_ptr.vmem [resolvable:$false] %s4402_s8 }
  0x80   : > { %s4404_s23 = scalar_lea.vmem %s4403_s8, 8192  ;;  %p4405_p5 = scmp.lt.s32.totalorder %s4896_s27, %s4403_s8 }
  0x81   : > { %p4400_p3 = pnand %p4398_p7, %p4384_p10  ;;  %p4406_p0 = scmp.lt.s32.totalorder %s4404_s23, %s4397_s6 }
  0x83   : > { %p4401_p2 = pneg %p4400_p3  ;;  %p4407_p12 = por %p4406_p0, %p4405_p5 }
  0x85   : > { %p4408_p11 = pnand %p4407_p12, %p4401_p2 }
  0x87   : > { %4411 = shalt.err (!%p4408_p11)
}
  0x88   : > { %4194 = dma.hbm_to_vmem [thread:$0]  (!%p4892_p13), %s4886_s29, 4096, %s4896_s27, %s4898_s9, %s6116_s13, %s6116_s13, %s6115_s17  }
  0x89   : > { %s3419_s24 = sshll.u32 %s4594_s26, 4  ;;  %s258_s3 = scalar_lea.vmem [#allocation10], %s4713_s7 }
  0x8a   : > { %s265_s19 = sshll.u32 %s258_s3, 4  ;;  %s263_s6 = scalar_lea.hbm %s6071_s2, %s3419_s24  ;;  %s266_s19 = int_to_ptr.vmem [resolvable:$true] %s265_s19 }
  0x8b   : > { %s4412_s14 = scalar_lea.hbm %s263_s6, 16  ;;  %s4417_s23 = scalar_lea.hbm %s6071_s2, 32 }
  0x8c   : > { %p4413_p5 = scmp.ne.s32.totalorder %s263_s6, %s4412_s14  ;;  %p4418_p9 = scmp.lt.u32.totalorder %s263_s6, %s6071_s2 }
  0x8d   : > { %p4419_p13 = scmp.lt.u32.totalorder %s4417_s23, %s4412_s14  ;;  %p4421_p4 = scmp.lt.u32.totalorder %s4412_s14, %s263_s6 }
  0x8e   : > { %p4415_p2 = pnand %p4413_p5, %p4739_p8 }
  0x8f   : > { %p4420_p10 = por %p4419_p13, %p4418_p9 }
  0x90   : > { %p4416_p1 = pneg %p4415_p2 }
  0x91   : > { %p4422_p6 = por %p4421_p4, %p4420_p10 }
  0x93   : > { %p4423_p7 = pnand %p4422_p6, %p4416_p1 }
  0x95   : > { %4426 = shalt.err (!%p4423_p7)
}
  0x96   : > { %s4427_s9 = scalar_lea.vmem %s266_s19, 16  ;;  %s4609_s17 = smov [#allocation10]  }
  0x97   : > { %p4428_p3 = scmp.ne.s32.totalorder %s266_s19, %s4427_s9  ;;  %s4432_s13 = sshll.u32 %s4609_s17, 4  ;;  %s4433_s13 = int_to_ptr.vmem [resolvable:$false] %s4432_s13 }
  0x98   : > { %s4434_s29 = scalar_lea.vmem %s4433_s13, 32  ;;  %p4435_p11 = scmp.lt.s32.totalorder %s266_s19, %s4433_s13 }
  0x99   : > { %p4430_p0 = pnand %p4428_p3, %p4739_p8  ;;  %p4436_p5 = scmp.lt.s32.totalorder %s4434_s29, %s4427_s9 }
  0x9b   : > { %p4431_p12 = pneg %p4430_p0  ;;  %p4437_p2 = por %p4436_p5, %p4435_p11 }
  0x9d   : > { %p4438_p9 = pnand %p4437_p2, %p4431_p12 }
  0x9f   : > { %4441 = shalt.err (!%p4438_p9)
}
  0xa0   : > { %p6135_p13 = scmp.ne.s32.totalorder %s6106_s10, 0  ;;  %s4954_s1 = scalar_lea.hbm %s6073_s4, %s3419_s24 }
  0xa1   : > { %s296_s5 = scalar_lea.vmem [#allocation13], %s4713_s7  ;;  %s4442_s12 = scalar_lea.hbm %s4954_s1, 16 }
  0xa2   : > { %4200 = dma.hbm_to_vmem [thread:$0]  (!%p6135_p13), %s263_s6, 16, %s266_s19, %s4733_s16  }
  0xa3   : > { %s303_s14 = sshll.u32 %s296_s5, 4  ;;  %p4443_p1 = scmp.ne.s32.totalorder %s4954_s1, %s4442_s12  ;;  %s304_s14 = int_to_ptr.vmem [resolvable:$true] %s303_s14 }
  0xa4   : > { %s4447_s19 = scalar_lea.hbm %s6073_s4, 32  ;;  %p4448_p6 = scmp.lt.u32.totalorder %s4954_s1, %s6073_s4 }
  0xa5   : > { %p4445_p10 = pnand %p4443_p1, %p4739_p8  ;;  %p4449_p7 = scmp.lt.u32.totalorder %s4447_s19, %s4442_s12 }
  0xa6   : > { %p4451_p0 = scmp.lt.u32.totalorder %s4442_s12, %s4954_s1 }
  0xa7   : > { %p4446_p4 = pneg %p4445_p10  ;;  %p4450_p3 = por %p4449_p7, %p4448_p6 }
  0xa9   : > { %p4452_p12 = por %p4451_p0, %p4450_p3 }
  0xab   : > { %p4453_p11 = pnand %p4452_p12, %p4446_p4 }
  0xad   : > { %4456 = shalt.err (!%p4453_p11)
}
  0xae   : > { %s4457_s7 = scalar_lea.vmem %s304_s14, 16  ;;  %s4610_s24 = smov [#allocation13]  }
  0xaf   : > { %p4458_p5 = scmp.ne.s32.totalorder %s304_s14, %s4457_s7  ;;  %s4462_s27 = sshll.u32 %s4610_s24, 4  ;;  %s4463_s27 = int_to_ptr.vmem [resolvable:$false] %s4462_s27 }
  0xb0   : > { %s4464_s9 = scalar_lea.vmem %s4463_s27, 32  ;;  %p4465_p1 = scmp.lt.s32.totalorder %s304_s14, %s4463_s27 }
  0xb1   : > { %p4460_p2 = pnand %p4458_p5, %p4739_p8  ;;  %p4466_p10 = scmp.lt.s32.totalorder %s4464_s9, %s4457_s7 }
  0xb3   : > { %p4461_p9 = pneg %p4460_p2  ;;  %p4467_p13 = por %p4466_p10, %p4465_p1 }
  0xb5   : > { %p4468_p6 = pnand %p4467_p13, %p4461_p9 }
  0xb7   : > { %4471 = shalt.err (!%p4468_p6)
}
  0xb8   : > { %p6136_p7 = scmp.ne.s32.totalorder %s6106_s10, 0  ;;  %s6137_s17 = sld [smem:[#allocation25_spill]] }
  0xb9   : > { %s6138_s13 = sld [smem:[#allocation24_spill]] }
  0xbe   : > { %4206 = dma.hbm_to_vmem [thread:$0]  (!%p6136_p7), %s4954_s1, 16, %s304_s14, %s6137_s17  }
  0xbf   : > { %p6139_p4 = scmp.ne.s32.totalorder %s6138_s13, 0 }
  0xc0   : > { %s4978_s30 = sand.u32 (!%p6139_p4), 1, %s4578_s22   ;;  %p6140_p8 = scmp.ne.s32.totalorder (!%p6139_p4), %s6123_s25, 0 }
  0xc1   : > { %312 = sbr.rel (%p6139_p4) target bundleno = 1124 (0x464), region = 40  ;;  %s3425_s29 = sshll.u32 (!%p6139_p4), %s4978_s30, 8 }
  0xc2   : > { %s315_s0 = scalar_lea.sflag (!%p6139_p4), [#allocation6], %s4978_s30  ;;  %s4982_s3 = scalar_lea.vmem (!%p6139_p4), [#allocation5], %s3425_s29 }
  0xc8   : > { %4545 = dma.done.wait (%p6140_p8), %s315_s0, 4096  }
  0xc9   : > { %4547 = vsyncadd (%p6140_p8), %s315_s0, 4294963200  ;;  %s6141_s10 = sld [smem:[#allocation19_spill]]  ;;  %s6142_s1 = sld [smem:[#allocation28_spill]] }
  0xca   : > { %s323_s5 = sand.u32 1, %s4812_s11  }
  0xcb   : > { %s324_s8 = scalar_lea.sflag [#allocation9], %s323_s5 }
  0xcf   : > { %s4990_s14 = sand.u32 1, %s6141_s10   ;;  %p6143_p13 = scmp.ne.s32.totalorder %s6142_s1, 0 }
  0xd0   : > { %s4178_s12 = smul.u32 1152, %s4990_s14 }
  0xd2   : > { %s4993_s16 = scalar_lea.vmem [#allocation8], %s4178_s12 }
  0xd3   : > { %4549 = dma.done.wait (%p6143_p13), %s324_s8, 18448  }
  0xd4   : > { %4551 = vsyncadd (%p6143_p13), %s324_s8, 4294948848  ;;  %s3426_s25 = sshll.u32 %s4990_s14, 7  ;;  %s335_s19 = scalar_lea.vmem [#allocation10], %s4990_s14 }
  0xd5   : > { %s341_s6 = scalar_lea.sflag [#allocation12], %s323_s5  ;;  %s5001_s23 = scalar_lea.vmem [#allocation11], %s3426_s25 }
  0xd6   : > { %4553 = dma.done.wait (%p6143_p13), %s341_s6, 2064  }
  0xd7   : > { %4555 = vsyncadd (%p6143_p13), %s341_s6, 4294965232  ;;  %s352_s11 = scalar_lea.vmem [#allocation13], %s4990_s14  ;;  %s5008_s7 = scalar_lea.vmem [#allocation14], %s3425_s29 }
  0xd8   : > { %s6144_s24 = sld [smem:[#allocation21_spill]] }
  0xde   : > { %p3428_p3 = scmp.ne.s32.totalorder %s6144_s24, 0 }
  0xdf   : > { %v401_v0 = vld [vmem:[%s4982_s3] sm:$0xff] (!%p3428_p3)  ;;  %v402_v1 = vld [vmem:[%s4982_s3 + $0x8] sm:$0xff] (!%p3428_p3)  ;;  %v403_v2 = vld [vmem:[%s4982_s3 + $0x10] sm:$0xff] (!%p3428_p3)  ;;  %v4611_v6 = vmov (!%p3428_p3), 0.0  }
  0xe0   : > { %400 = sbr.rel (%p3428_p3) target bundleno = 267 (0x10b), region = 64  ;;  %433 = vst [vmem:[#allocation2] sm:$0xff] (!%p3428_p3), %v401_v0  ;;  %434 = vst [vmem:[#allocation2 + $0x8] sm:$0xff] (!%p3428_p3), %v402_v1  ;;  %v404_v3 = vld [vmem:[%s4982_s3 + $0x18] sm:$0xff] (!%p3428_p3)  ;;  %v405_v4 = vld [vmem:[%s4982_s3 + $0x20] sm:$0xff] (!%p3428_p3) }
  0xe1   : > { %435 = vst [vmem:[#allocation2 + $0x10] sm:$0xff] (!%p3428_p3), %v403_v2  ;;  %v406_v5 = vld [vmem:[%s4982_s3 + $0x28] sm:$0xff] (!%p3428_p3)  ;;  %465 = vst [vmem:[#allocation3] sm:$0xff] (!%p3428_p3), %v4611_v6  ;;  %v407_v7 = vld [vmem:[%s4982_s3 + $0x30] sm:$0xff] (!%p3428_p3) }
  0xe2   : > { %466 = vst [vmem:[#allocation3 + $0x8] sm:$0xff] (!%p3428_p3), %v4611_v6  ;;  %467 = vst [vmem:[#allocation3 + $0x10] sm:$0x3] (!%p3428_p3), %v4611_v6  ;;  %v408_v8 = vld [vmem:[%s4982_s3 + $0x38] sm:$0xff] (!%p3428_p3)  ;;  %v409_v9 = vld [vmem:[%s4982_s3 + $0x40] sm:$0xff] (!%p3428_p3) }
  0xe3   : > { %468 = vst [vmem:[#allocation3 + $0x18] sm:$0xff] (!%p3428_p3), %v4611_v6  ;;  %469 = vst [vmem:[#allocation3 + $0x20] sm:$0xff] (!%p3428_p3), %v4611_v6  ;;  %v410_v10 = vld [vmem:[%s4982_s3 + $0x48] sm:$0xff] (!%p3428_p3)  ;;  %v411_v11 = vld [vmem:[%s4982_s3 + $0x50] sm:$0xff] (!%p3428_p3) }
  0xe4   : > { %470 = vst [vmem:[#allocation3 + $0x28] sm:$0x3] (!%p3428_p3), %v4611_v6  ;;  %471 = vst [vmem:[#allocation3 + $0x30] sm:$0xff] (!%p3428_p3), %v4611_v6  ;;  %v412_v12 = vld [vmem:[%s4982_s3 + $0x58] sm:$0xff] (!%p3428_p3)  ;;  %v413_v13 = vld [vmem:[%s4982_s3 + $0x60] sm:$0xff] (!%p3428_p3) }
  0xe5   : > { %472 = vst [vmem:[#allocation3 + $0x38] sm:$0xff] (!%p3428_p3), %v4611_v6  ;;  %473 = vst [vmem:[#allocation3 + $0x40] sm:$0x3] (!%p3428_p3), %v4611_v6  ;;  %v414_v14 = vld [vmem:[%s4982_s3 + $0x68] sm:$0xff] (!%p3428_p3)  ;;  %v415_v15 = vld [vmem:[%s4982_s3 + $0x70] sm:$0xff] (!%p3428_p3) }
  0xe6   : > { %474 = vst [vmem:[#allocation3 + $0x48] sm:$0xff] (!%p3428_p3), %v4611_v6  ;;  %475 = vst [vmem:[#allocation3 + $0x50] sm:$0xff] (!%p3428_p3), %v4611_v6  ;;  %v416_v16 = vld [vmem:[%s4982_s3 + $0x78] sm:$0xff] (!%p3428_p3)  ;;  %v417_v17 = vld [vmem:[%s4982_s3 + $0x80] sm:$0xff] (!%p3428_p3) }
  0xe7   : > { %476 = vst [vmem:[#allocation3 + $0x58] sm:$0x3] %v4611_v6  ;;  %477 = vst [vmem:[#allocation3 + $0x60] sm:$0xff] %v4611_v6  ;;  %v418_v18 = vld [vmem:[%s4982_s3 + $0x88] sm:$0xff]  ;;  %v419_v19 = vld [vmem:[%s4982_s3 + $0x90] sm:$0xff] }
  0xe8   : > { %478 = vst [vmem:[#allocation3 + $0x68] sm:$0xff] %v4611_v6  ;;  %479 = vst [vmem:[#allocation3 + $0x70] sm:$0x3] %v4611_v6  ;;  %v420_v20 = vld [vmem:[%s4982_s3 + $0x98] sm:$0xff]  ;;  %v421_v21 = vld [vmem:[%s4982_s3 + $0xa0] sm:$0xff] }
  0xe9   : > { %480 = vst [vmem:[#allocation3 + $0x78] sm:$0xff] %v4611_v6  ;;  %481 = vst [vmem:[#allocation3 + $0x80] sm:$0xff] %v4611_v6  ;;  %v422_v22 = vld [vmem:[%s4982_s3 + $0xa8] sm:$0xff]  ;;  %v423_v23 = vld [vmem:[%s4982_s3 + $0xb0] sm:$0xff] }
  0xea   : > { %482 = vst [vmem:[#allocation3 + $0x88] sm:$0x3] %v4611_v6  ;;  %483 = vst [vmem:[#allocation3 + $0x90] sm:$0xff] %v4611_v6  ;;  %v424_v24 = vld [vmem:[%s4982_s3 + $0xb8] sm:$0xff]  ;;  %v425_v25 = vld [vmem:[%s4982_s3 + $0xc0] sm:$0xff] }
  0xeb   : > { %484 = vst [vmem:[#allocation3 + $0x98] sm:$0xff] %v4611_v6  ;;  %485 = vst [vmem:[#allocation3 + $0xa0] sm:$0x3] %v4611_v6  ;;  %v426_v26 = vld [vmem:[%s4982_s3 + $0xc8] sm:$0xff]  ;;  %v427_v27 = vld [vmem:[%s4982_s3 + $0xd0] sm:$0xff] }
  0xec   : > { %486 = vst [vmem:[#allocation3 + $0xa8] sm:$0xff] %v4611_v6  ;;  %487 = vst [vmem:[#allocation3 + $0xb0] sm:$0xff] %v4611_v6  ;;  %v428_v28 = vld [vmem:[%s4982_s3 + $0xd8] sm:$0xff]  ;;  %v429_v29 = vld [vmem:[%s4982_s3 + $0xe0] sm:$0xff] }
  0xed   : > { %488 = vst [vmem:[#allocation3 + $0xb8] sm:$0x3] %v4611_v6  ;;  %489 = vst [vmem:[#allocation3 + $0xc0] sm:$0xff] %v4611_v6  ;;  %v430_v30 = vld [vmem:[%s4982_s3 + $0xe8] sm:$0xff]  ;;  %v431_v31 = vld [vmem:[%s4982_s3 + $0xf0] sm:$0xff] }
  0xee   : > { %490 = vst [vmem:[#allocation3 + $0xc8] sm:$0xff] %v4611_v6  ;;  %491 = vst [vmem:[#allocation3 + $0xd0] sm:$0x3] %v4611_v6  ;;  %v432_v32 = vld [vmem:[%s4982_s3 + $0xf8] sm:$0xff] }
  0xef   : > { %492 = vst [vmem:[#allocation3 + $0xd8] sm:$0xff] %v4611_v6  ;;  %493 = vst [vmem:[#allocation3 + $0xe0] sm:$0xff] %v4611_v6 }
  0xf0   : > { %494 = vst [vmem:[#allocation3 + $0xe8] sm:$0x3] %v4611_v6  ;;  %495 = vst [vmem:[#allocation3 + $0xf0] sm:$0xff] %v4611_v6 }
  0xf1   : > { %496 = vst [vmem:[#allocation3 + $0xf8] sm:$0xff] %v4611_v6  ;;  %497 = vst [vmem:[#allocation3 + $0x100] sm:$0x3] %v4611_v6 }
  0xf2   : > { %498 = vst [vmem:[#allocation3 + $0x108] sm:$0xff] %v4611_v6  ;;  %499 = vst [vmem:[#allocation3 + $0x110] sm:$0xff] %v4611_v6 }
  0xf3   : > { %500 = vst [vmem:[#allocation3 + $0x118] sm:$0x3] %v4611_v6  ;;  %501 = vst [vmem:[#allocation3 + $0x120] sm:$0xff] %v4611_v6 }
  0xf4   : > { %502 = vst [vmem:[#allocation3 + $0x128] sm:$0xff] %v4611_v6  ;;  %503 = vst [vmem:[#allocation3 + $0x130] sm:$0x3] %v4611_v6 }
  0xf5   : > { %504 = vst [vmem:[#allocation3 + $0x138] sm:$0xff] %v4611_v6  ;;  %505 = vst [vmem:[#allocation3 + $0x140] sm:$0xff] %v4611_v6 }
  0xf6   : > { %506 = vst [vmem:[#allocation3 + $0x148] sm:$0x3] %v4611_v6  ;;  %507 = vst [vmem:[#allocation3 + $0x150] sm:$0xff] %v4611_v6 }
  0xf7   : > { %508 = vst [vmem:[#allocation3 + $0x158] sm:$0xff] %v4611_v6  ;;  %509 = vst [vmem:[#allocation3 + $0x160] sm:$0x3] %v4611_v6 }
  0xf8   : > { %510 = vst [vmem:[#allocation3 + $0x168] sm:$0xff] %v4611_v6  ;;  %511 = vst [vmem:[#allocation3 + $0x170] sm:$0xff] %v4611_v6 }
  0xf9   : > { %512 = vst [vmem:[#allocation3 + $0x178] sm:$0x3] %v4611_v6  ;;  %513 = vst [vmem:[#allocation3 + $0x180] sm:$0xff] %v4611_v6 }
  0xfa   : > { %514 = vst [vmem:[#allocation3 + $0x188] sm:$0xff] %v4611_v6  ;;  %515 = vst [vmem:[#allocation3 + $0x190] sm:$0x3] %v4611_v6 }
  0xfb   : > { %516 = vst [vmem:[#allocation3 + $0x198] sm:$0xff] %v4611_v6  ;;  %517 = vst [vmem:[#allocation3 + $0x1a0] sm:$0xff] %v4611_v6 }
  0xfc   : > { %518 = vst [vmem:[#allocation3 + $0x1a8] sm:$0x3] %v4611_v6  ;;  %436 = vst [vmem:[#allocation2 + $0x18] sm:$0xff] %v404_v3 }
  0xfd   : > { %437 = vst [vmem:[#allocation2 + $0x20] sm:$0xff] %v405_v4  ;;  %438 = vst [vmem:[#allocation2 + $0x28] sm:$0xff] %v406_v5 }
  0xfe   : > { %439 = vst [vmem:[#allocation2 + $0x30] sm:$0xff] %v407_v7  ;;  %440 = vst [vmem:[#allocation2 + $0x38] sm:$0xff] %v408_v8 }
  0xff   : > { %441 = vst [vmem:[#allocation2 + $0x40] sm:$0xff] %v409_v9  ;;  %442 = vst [vmem:[#allocation2 + $0x48] sm:$0xff] %v410_v10 }
 0x100   : > { %443 = vst [vmem:[#allocation2 + $0x50] sm:$0xff] %v411_v11  ;;  %444 = vst [vmem:[#allocation2 + $0x58] sm:$0xff] %v412_v12 }
 0x101   : > { %445 = vst [vmem:[#allocation2 + $0x60] sm:$0xff] %v413_v13  ;;  %446 = vst [vmem:[#allocation2 + $0x68] sm:$0xff] %v414_v14 }
 0x102   : > { %447 = vst [vmem:[#allocation2 + $0x70] sm:$0xff] %v415_v15  ;;  %448 = vst [vmem:[#allocation2 + $0x78] sm:$0xff] %v416_v16 }
 0x103   : > { %449 = vst [vmem:[#allocation2 + $0x80] sm:$0xff] %v417_v17  ;;  %450 = vst [vmem:[#allocation2 + $0x88] sm:$0xff] %v418_v18 }
 0x104   : > { %451 = vst [vmem:[#allocation2 + $0x90] sm:$0xff] %v419_v19  ;;  %452 = vst [vmem:[#allocation2 + $0x98] sm:$0xff] %v420_v20 }
 0x105   : > { %453 = vst [vmem:[#allocation2 + $0xa0] sm:$0xff] %v421_v21  ;;  %454 = vst [vmem:[#allocation2 + $0xa8] sm:$0xff] %v422_v22 }
 0x106   : > { %455 = vst [vmem:[#allocation2 + $0xb0] sm:$0xff] %v423_v23  ;;  %456 = vst [vmem:[#allocation2 + $0xb8] sm:$0xff] %v424_v24 }
 0x107   : > { %457 = vst [vmem:[#allocation2 + $0xc0] sm:$0xff] %v425_v25  ;;  %458 = vst [vmem:[#allocation2 + $0xc8] sm:$0xff] %v426_v26 }
 0x108   : > { %459 = vst [vmem:[#allocation2 + $0xd0] sm:$0xff] %v427_v27  ;;  %460 = vst [vmem:[#allocation2 + $0xd8] sm:$0xff] %v428_v28 }
 0x109   : > { %461 = vst [vmem:[#allocation2 + $0xe0] sm:$0xff] %v429_v29  ;;  %462 = vst [vmem:[#allocation2 + $0xe8] sm:$0xff] %v430_v30 }
 0x10a   : > { %463 = vst [vmem:[#allocation2 + $0xf0] sm:$0xff] %v431_v31  ;;  %464 = vst [vmem:[#allocation2 + $0xf8] sm:$0xff] %v432_v32 }
 0x10b PF: > { %v1481_v33 = vld [vmem:[%s4993_s16] sm:$0xff]  ;;  %v1482_v34 = vld [vmem:[%s4993_s16 + $0x8] sm:$0xff]  ;;  %v4612_v36 = vmov 0.0|0.0   ;;  %v1483_v39 = vld [vmem:[%s4993_s16 + $0x10] sm:$0xff]  ;;  %s6145_s27 = sld [smem:[#allocation21_spill]] }
 0x10c   : > { %v1513_v35 = vld [vmem:[%s4993_s16 + $0x100] sm:$0xff]  ;;  %3696 = vmatprep.subr.bf16.mxu1 %v4612_v36  ;;  %3744 = vmatprep.subr.bf16.mxu0 %v4612_v36  ;;  %v3697_v37 = vpack.c.bf16 %v1482_v34, %v1481_v33  ;;  %v1514_v38 = vld [vmem:[%s4993_s16 + $0x108] sm:$0xff]  ;;  %v1484_v40 = vld [vmem:[%s4993_s16 + $0x18] sm:$0xff] }
 0x10d   : > { %v5051_v41 = vpack.c.bf16 %v1514_v38, %v1513_v35  ;;  %v1515_v42 = vld [vmem:[%s4993_s16 + $0x110] sm:$0xff]  ;;  %v1516_v43 = vld [vmem:[%s4993_s16 + $0x118] sm:$0xff]  ;;  %v3700_v44 = vpack.c.bf16 %v1484_v40, %v1483_v39  ;;  %v1485_v46 = vld [vmem:[%s4993_s16 + $0x20] sm:$0xff] }
 0x10e   : > { %3698 = vmatpush1.bf16.msra.mxu1 %v3697_v37  ;;  %v5057_v45 = vpack.c.bf16 %v1516_v43, %v1515_v42  ;;  %v1486_v47 = vld [vmem:[%s4993_s16 + $0x28] sm:$0xff]  ;;  %v1517_v48 = vld [vmem:[%s4993_s16 + $0x120] sm:$0xff]  ;;  %v1487_v52 = vld [vmem:[%s4993_s16 + $0x30] sm:$0xff] }
 0x10f   : > { %3746 = vmatpush1.bf16.msra.mxu0 %v5051_v41  ;;  %3699 = vmatprep.subr.bf16.mxu1 %v4612_v36  ;;  %v1518_v49 = vld [vmem:[%s4993_s16 + $0x128] sm:$0xff]  ;;  %v3703_v50 = vpack.c.bf16 %v1486_v47, %v1485_v46  ;;  %v1488_v53 = vld [vmem:[%s4993_s16 + $0x38] sm:$0xff]  ;;  %v1519_v54 = vld [vmem:[%s4993_s16 + $0x130] sm:$0xff] }
 0x110   : > { %3747 = vmatprep.subr.bf16.mxu0 %v4612_v36  ;;  %v5066_v51 = vpack.c.bf16 %v1518_v49, %v1517_v48  ;;  %v1520_v55 = vld [vmem:[%s4993_s16 + $0x138] sm:$0xff]  ;;  %v3706_v56 = vpack.c.bf16 %v1488_v53, %v1487_v52  ;;  %v1489_v58 = vld [vmem:[%s4993_s16 + $0x40] sm:$0xff]  ;;  %v1490_v59 = vld [vmem:[%s4993_s16 + $0x48] sm:$0xff] }
 0x111   : > { %v5075_v57 = vpack.c.bf16 %v1520_v55, %v1519_v54  ;;  %v1521_v60 = vld [vmem:[%s4993_s16 + $0x140] sm:$0xff]  ;;  %v1522_v61 = vld [vmem:[%s4993_s16 + $0x148] sm:$0xff]  ;;  %v3709_v62 = vpack.c.bf16 %v1490_v59, %v1489_v58  ;;  %v1491_v0 = vld [vmem:[%s4993_s16 + $0x50] sm:$0xff]  ;;  %p3431_p0 = scmp.ne.s32.totalorder %s6145_s27, 1 }
 0x112   : > { %3701 = vmatpush1.bf16.msra.mxu1 %v3700_v44  ;;  %v5084_v63 = vpack.c.bf16 %v1522_v61, %v1521_v60  ;;  %v1492_v1 = vld [vmem:[%s4993_s16 + $0x58] sm:$0xff]  ;;  %v1523_v2 = vld [vmem:[%s4993_s16 + $0x150] sm:$0xff]  ;;  %v1493_v6 = vld [vmem:[%s4993_s16 + $0x60] sm:$0xff] }
 0x113   : > { %3749 = vmatpush1.bf16.msra.mxu0 %v5057_v45  ;;  %3702 = vmatprep.subr.bf16.mxu1 %v4612_v36  ;;  %v1524_v3 = vld [vmem:[%s4993_s16 + $0x158] sm:$0xff]  ;;  %v3712_v4 = vpack.c.bf16 %v1492_v1, %v1491_v0  ;;  %v1494_v7 = vld [vmem:[%s4993_s16 + $0x68] sm:$0xff]  ;;  %v1525_v8 = vld [vmem:[%s4993_s16 + $0x160] sm:$0xff] }
 0x114   : > { %3750 = vmatprep.subr.bf16.mxu0 %v4612_v36  ;;  %v5093_v5 = vpack.c.bf16 %v1524_v3, %v1523_v2  ;;  %v1526_v9 = vld [vmem:[%s4993_s16 + $0x168] sm:$0xff]  ;;  %v680_v10 = vld [vmem:[#allocation3 + $0x1] sm:$0xff]  ;;  %v3715_v13 = vpack.c.bf16 %v1494_v7, %v1493_v6  ;;  %v521_v21 = vld [vmem:[#allocation2 + $0x10] sm:$0xff] }
 0x115   : > { %v519_v11 = vld [vmem:[#allocation2] sm:$0xff]  ;;  %1696 = vmatprep.mubr.f32.mxu1 %v680_v10  ;;  %v520_v14 = vld [vmem:[#allocation2 + $0x8] sm:$0xff]  ;;  %v5104_v15 = vpack.c.bf16 %v1526_v9, %v1525_v8  ;;  %v5115_v22 = vmax.f32 %v521_v21, 0.0  ;;  %v522_v23 = vld [vmem:[#allocation2 + $0x18] sm:$0xff] }
 0x116   : > { %3704 = vmatpush1.bf16.msra.mxu1 %v3703_v50  ;;  %v5100_v12 = vmax.f32 %v519_v11, 0.0  ;;  %v1495_v16 = vld [vmem:[%s4993_s16 + $0x70] sm:$0xff]  ;;  %v1496_v17 = vld [vmem:[%s4993_s16 + $0x78] sm:$0xff]  ;;  %v5109_v18 = vmax.f32 %v520_v14, 0.0  ;;  %v5117_v25 = vmax.f32 %v522_v23, 0.0  ;;  %v1497_v28 = vld [vmem:[%s4993_s16 + $0x80] sm:$0xff] }
 0x117   : > { %3752 = vmatpush1.bf16.msra.mxu0 %v5066_v51  ;;  %3705 = vmatprep.subr.bf16.mxu1 %v4612_v36  ;;  %v1527_v19 = vld [vmem:[%s4993_s16 + $0x170] sm:$0xff]  ;;  %v1528_v20 = vld [vmem:[%s4993_s16 + $0x178] sm:$0xff]  ;;  %v3718_v24 = vpack.c.bf16 %v1496_v17, %v1495_v16  ;;  %v1498_v29 = vld [vmem:[%s4993_s16 + $0x88] sm:$0xff]  ;;  %586 = vst [vmem:[#allocation3 + $0x31] sm:$0xff] %v5115_v22 }
 0x118   : > { %3753 = vmatprep.subr.bf16.mxu0 %v4612_v36  ;;  %584 = vst [vmem:[#allocation3 + $0x19] sm:$0xff] %v5100_v12  ;;  %585 = vst [vmem:[#allocation3 + $0x21] sm:$0xff] %v5109_v18  ;;  %v523_v26 = vld [vmem:[#allocation2 + $0x20] sm:$0xff]  ;;  %v5121_v27 = vpack.c.bf16 %v1528_v20, %v1527_v19  ;;  %v524_v31 = vld [vmem:[#allocation2 + $0x28] sm:$0xff]  ;;  %v3721_v39 = vpack.c.bf16 %v1498_v29, %v1497_v28 }
 0x119   : > { %v5126_v30 = vmax.f32 %v523_v26, 0.0  ;;  %v1529_v32 = vld [vmem:[%s4993_s16 + $0x180] sm:$0xff]  ;;  %v1530_v33 = vld [vmem:[%s4993_s16 + $0x188] sm:$0xff]  ;;  %587 = vst [vmem:[#allocation3 + $0x39] sm:$0xff] %v5117_v25  ;;  %v5132_v34 = vmax.f32 %v524_v31, 0.0  ;;  %v527_v43 = vld [vmem:[#allocation2 + $0x40] sm:$0xff] }
 0x11a   : > { %3707 = vmatpush1.bf16.msra.mxu1 %v3706_v56  ;;  %v525_v35 = vld [vmem:[#allocation2 + $0x30] sm:$0xff]  ;;  %v526_v38 = vld [vmem:[#allocation2 + $0x38] sm:$0xff]  ;;  %v5144_v44 = vpack.c.bf16 %v1530_v33, %v1529_v32  ;;  %v1499_v46 = vld [vmem:[%s4993_s16 + $0x90] sm:$0xff]  ;;  %v5149_v48 = vmax.f32 %v527_v43, 0.0 }
 0x11b   : > { %3755 = vmatpush1.bf16.msra.mxu0 %v5075_v57  ;;  %3708 = vmatprep.subr.bf16.mxu1 %v4612_v36  ;;  %588 = vst [vmem:[#allocation3 + $0x49] sm:$0xff] %v5126_v30  ;;  %v5135_v37 = vmax.f32 %v525_v35, 0.0  ;;  %589 = vst [vmem:[#allocation3 + $0x51] sm:$0xff] %v5132_v34  ;;  %v5140_v42 = vmax.f32 %v526_v38, 0.0  ;;  %v1500_v47 = vld [vmem:[%s4993_s16 + $0x98] sm:$0xff]  ;;  %v1531_v50 = vld [vmem:[%s4993_s16 + $0x190] sm:$0xff] }
 0x11c   : > { %3756 = vmatprep.subr.bf16.mxu0 %v4612_v36  ;;  %v528_v49 = vld [vmem:[#allocation2 + $0x48] sm:$0xff]  ;;  %592 = vst [vmem:[#allocation3 + $0x79] sm:$0xff] %v5149_v48  ;;  %v529_v54 = vld [vmem:[#allocation2 + $0x50] sm:$0xff]  ;;  %v3724_v55 = vpack.c.bf16 %v1500_v47, %v1499_v46  ;;  %v1502_v60 = vld [vmem:[%s4993_s16 + $0xa8] sm:$0xff] }
 0x11d   : > { %590 = vst [vmem:[#allocation3 + $0x61] sm:$0xff] %v5135_v37  ;;  %v1532_v52 = vld [vmem:[%s4993_s16 + $0x198] sm:$0xff]  ;;  %591 = vst [vmem:[#allocation3 + $0x69] sm:$0xff] %v5140_v42  ;;  %v5156_v53 = vmax.f32 %v528_v49, 0.0  ;;  %v5160_v56 = vmax.f32 %v529_v54, 0.0  ;;  %v1501_v59 = vld [vmem:[%s4993_s16 + $0xa0] sm:$0xff] }
 0x11e   : > { %3710 = vmatpush1.bf16.msra.mxu1 %v3709_v62  ;;  %v5164_v58 = vpack.c.bf16 %v1532_v52, %v1531_v50  ;;  %v1533_v61 = vld [vmem:[%s4993_s16 + $0x1a0] sm:$0xff]  ;;  %v1534_v62 = vld [vmem:[%s4993_s16 + $0x1a8] sm:$0xff]  ;;  %v3727_v2 = vpack.c.bf16 %v1502_v60, %v1501_v59  ;;  %v531_v3 = vld [vmem:[#allocation2 + $0x60] sm:$0xff] }
 0x11f   : > { %3758 = vmatpush1.bf16.msra.mxu0 %v5084_v63  ;;  %3711 = vmatprep.subr.bf16.mxu1 %v4612_v36  ;;  %v5137_v40 = vld [vmem:[#allocation3 + $0x18] sm:$0xff]  ;;  %593 = vst [vmem:[#allocation3 + $0x81] sm:$0xff] %v5156_v53  ;;  %594 = vst [vmem:[#allocation3 + $0x91] sm:$0xff] %v5160_v56  ;;  %v1503_v6 = vld [vmem:[%s4993_s16 + $0xb0] sm:$0xff]  ;;  %v5181_v8 = vmax.f32 %v531_v3, 0.0 }
 0x120   : > { %3759 = vmatprep.subr.bf16.mxu0 %v4612_v36  ;;  %1921 = vmatprep.mubr.f32.mxu0 %v5137_v40  ;;  %v530_v0 = vld [vmem:[#allocation2 + $0x58] sm:$0xff]  ;;  %v1504_v7 = vld [vmem:[%s4993_s16 + $0xb8] sm:$0xff]  ;;  %v1535_v9 = vld [vmem:[%s4993_s16 + $0x1b0] sm:$0xff] }
 0x121   : > { %v5172_v1 = vmax.f32 %v530_v0, 0.0  ;;  %v1536_v10 = vld [vmem:[%s4993_s16 + $0x1b8] sm:$0xff]  ;;  %596 = vst [vmem:[#allocation3 + $0xa9] sm:$0xff] %v5181_v8  ;;  %v3730_v11 = vpack.c.bf16 %v1504_v7, %v1503_v6  ;;  %v1505_v16 = vld [vmem:[%s4993_s16 + $0xc0] sm:$0xff]  ;;  %v1506_v17 = vld [vmem:[%s4993_s16 + $0xc8] sm:$0xff] }
 0x122   : > { %3713 = vmatpush1.bf16.msra.mxu1 %v3712_v4  ;;  %v5176_v4 = vpack.c.bf16 %v1534_v62, %v1533_v61  ;;  %v5189_v14 = vpack.c.bf16 %v1536_v10, %v1535_v9  ;;  %v533_v20 = vld [vmem:[#allocation2 + $0x70] sm:$0xff]  ;;  %v1538_v23 = vld [vmem:[%s4993_s16 + $0x1c8] sm:$0xff]  ;;  %v3733_v29 = vpack.c.bf16 %v1506_v17, %v1505_v16  ;;  %v1507_v31 = vld [vmem:[%s4993_s16 + $0xd0] sm:$0xff] }
 0x123   : > { %3761 = vmatpush1.bf16.msra.mxu0 %v5093_v5  ;;  %3714 = vmatprep.subr.bf16.mxu1 %v4612_v36  ;;  %595 = vst [vmem:[#allocation3 + $0x99] sm:$0xff] %v5172_v1  ;;  %v1537_v21 = vld [vmem:[%s4993_s16 + $0x1c0] sm:$0xff]  ;;  %v534_v26 = vld [vmem:[#allocation2 + $0x78] sm:$0xff]  ;;  %v1508_v33 = vld [vmem:[%s4993_s16 + $0xd8] sm:$0xff] }
 0x124   : > { %3762 = vmatprep.subr.bf16.mxu0 %v4612_v36  ;;  %v5201_v28 = vmax.f32 %v534_v26, 0.0  ;;  %v5207_v32 = vpack.c.bf16 %v1538_v23, %v1537_v21  ;;  %v1539_v35 = vld [vmem:[%s4993_s16 + $0x1d0] sm:$0xff]  ;;  %v536_v46 = vld [vmem:[#allocation2 + $0x88] sm:$0xff]  ;;  %v537_v47 = vld [vmem:[#allocation2 + $0x90] sm:$0xff]  ;;  %v3736_v54 = vpack.c.bf16 %v1508_v33, %v1507_v31 }
 0x125   : > { %v535_v38 = vld [vmem:[#allocation2 + $0x80] sm:$0xff]  ;;  %v5216_v49 = vmax.f32 %v536_v46, 0.0  ;;  %v5218_v50 = vmax.f32 %v537_v47, 0.0  ;;  %v538_v52 = vld [vmem:[#allocation2 + $0x98] sm:$0xff]  ;;  %v541_v3 = vld [vmem:[#allocation2 + $0xb0] sm:$0xff] }
 0x126   : > { %3716 = vmatpush1.bf16.msra.mxu1 %v3715_v13  ;;  %v532_v13 = vld [vmem:[#allocation2 + $0x68] sm:$0xff]  ;;  %599 = vst [vmem:[#allocation3 + $0xc9] sm:$0xff] %v5201_v28  ;;  %v5214_v43 = vmax.f32 %v535_v38, 0.0  ;;  %v5222_v59 = vmax.f32 %v538_v52, 0.0  ;;  %v539_v60 = vld [vmem:[#allocation2 + $0xa0] sm:$0xff]  ;;  %v1510_v62 = vld [vmem:[%s4993_s16 + $0xe8] sm:$0xff] }
 0x127   : > { %3764 = vmatpush1.bf16.msra.mxu0 %v5104_v15  ;;  %3717 = vmatprep.subr.bf16.mxu1 %v4612_v36  ;;  %v5193_v19 = vmax.f32 %v532_v13, 0.0  ;;  %601 = vst [vmem:[#allocation3 + $0xe1] sm:$0xff] %v5216_v49  ;;  %602 = vst [vmem:[#allocation3 + $0xf1] sm:$0xff] %v5218_v50  ;;  %v5231_v0 = vmax.f32 %v539_v60, 0.0  ;;  %v1541_v6 = vld [vmem:[%s4993_s16 + $0x1e0] sm:$0xff]  ;;  %v1542_v7 = vld [vmem:[%s4993_s16 + $0x1e8] sm:$0xff] }
 0x128   : > { %3765 = vmatprep.subr.bf16.mxu0 %v4612_v36  ;;  %600 = vst [vmem:[#allocation3 + $0xd9] sm:$0xff] %v5214_v43  ;;  %603 = vst [vmem:[#allocation3 + $0xf9] sm:$0xff] %v5222_v59  ;;  %v5239_v10 = vmax.f32 %v541_v3, 0.0  ;;  %v1511_v16 = vld [vmem:[%s4993_s16 + $0xf0] sm:$0xff]  ;;  %v5249_v21 = vpack.c.bf16 %v1542_v7, %v1541_v6  ;;  %v1512_v23 = vld [vmem:[%s4993_s16 + $0xf8] sm:$0xff] }
 0x129   : > { %597 = vst [vmem:[#allocation3 + $0xb1] sm:$0xff] %v5193_v19  ;;  %604 = vst [vmem:[#allocation3 + $0x109] sm:$0xff] %v5231_v0  ;;  %v545_v31 = vld [vmem:[#allocation2 + $0xd0] sm:$0xff]  ;;  %v1543_v33 = vld [vmem:[%s4993_s16 + $0x1f0] sm:$0xff] }
 0x12a   : > { %3719 = vmatpush1.bf16.msra.mxu1 %v3718_v24  ;;  %v5198_v24 = vmax.f32 %v533_v20, 0.0  ;;  %606 = vst [vmem:[#allocation3 + $0x121] sm:$0xff] %v5239_v10  ;;  %v543_v20 = vld [vmem:[#allocation2 + $0xc0] sm:$0xff]  ;;  %v546_v46 = vld [vmem:[#allocation2 + $0xd8] sm:$0xff] }
 0x12b   : > { %3767 = vmatpush1.bf16.msra.mxu0 %v5121_v27  ;;  %3720 = vmatprep.subr.bf16.mxu1 %v4612_v36  ;;  %v5252_v26 = vmax.f32 %v543_v20, 0.0  ;;  %v5263_v47 = vmax.f32 %v546_v46, 0.0  ;;  %v547_v52 = vld [vmem:[#allocation2 + $0xe0] sm:$0xff]  ;;  %v1546_v3 = vld [vmem:[%s4993_s16 + $0x208] sm:$0xff]  ;;  %v810_v46 = vld [vmem:[#allocation3 + $0x30] sm:$0xff] }
 0x12c   : > { %3768 = vmatprep.subr.bf16.mxu0 %v4612_v36  ;;  %598 = vst [vmem:[#allocation3 + $0xc1] sm:$0xff] %v5198_v24  ;;  %v616_v7 = vld [vmem:[#allocation3] sm:$0xff] }
 0x12d   : > { %608 = vst [vmem:[#allocation3 + $0x139] sm:$0xff] %v5252_v26  ;;  %611 = vst [vmem:[#allocation3 + $0x159] sm:$0xff] %v5263_v47  ;;  %v809_v20 = vld [vmem:[#allocation3 + $0x20] sm:$0xff] }
 0x12e   : > { %3722 = vmatpush1.bf16.msra.mxu1 %v3721_v39  ;;  %v1540_v39 = vld [vmem:[%s4993_s16 + $0x1d8] sm:$0xff] }
 0x12f   : > { %3770 = vmatpush1.bf16.msra.mxu0 %v5144_v44  ;;  %3723 = vmatprep.subr.bf16.mxu1 %v4612_v36  ;;  %v5226_v61 = vpack.c.bf16 %v1540_v39, %v1539_v35  ;;  %v1544_v35 = vld [vmem:[%s4993_s16 + $0x1f8] sm:$0xff]  ;;  %v5260_v39 = vmax.f32 %v545_v31, 0.0 }
 0x130   : > { %3771 = vmatprep.subr.bf16.mxu0 %v4612_v36  ;;  %v5271_v60 = vpack.c.bf16 %v1544_v35, %v1543_v33  ;;  %v617_v31 = vld [vmem:[#allocation3 + $0x8] sm:$0xff] }
 0x131   : > { %610 = vst [vmem:[#allocation3 + $0x151] sm:$0xff] %v5260_v39  ;;  %v745_v33 = vld [vmem:[#allocation3 + $0xa] sm:$0xff] }
 0x132   : > { %3725 = vmatpush1.bf16.msra.mxu1 %v3724_v55  ;;  %v1509_v55 = vld [vmem:[%s4993_s16 + $0xe0] sm:$0xff] }
 0x133   : > { %3773 = vmatpush1.bf16.msra.mxu0 %v5164_v58  ;;  %3726 = vmatprep.subr.bf16.mxu1 %v4612_v36  ;;  %v3739_v13 = vpack.c.bf16 %v1510_v62, %v1509_v55  ;;  %v5267_v55 = vmax.f32 %v547_v52, 0.0  ;;  %v548_v62 = vld [vmem:[#allocation2 + $0xe8] sm:$0xff]  ;;  %v1549_v52 = vld [vmem:[%s4993_s16 + $0x220] sm:$0xff] }
 0x134   : > { %3774 = vmatprep.subr.bf16.mxu0 %v4612_v36  ;;  %v5278_v6 = vmax.f32 %v548_v62, 0.0  ;;  %v5292_v62 = vld [vmem:[#allocation3 + $0x1a] sm:$0xff] }
 0x135   : > { %612 = vst [vmem:[#allocation3 + $0x169] sm:$0xff] %v5267_v55 }
 0x136   : > { %3728 = vmatpush1.bf16.msra.mxu1 %v3727_v2  ;;  %v540_v2 = vld [vmem:[#allocation2 + $0xa8] sm:$0xff]  ;;  %613 = vst [vmem:[#allocation3 + $0x171] sm:$0xff] %v5278_v6 }
 0x137   : > { %3776 = vmatpush1.bf16.msra.mxu0 %v5176_v4  ;;  %3729 = vmatprep.subr.bf16.mxu1 %v4612_v36  ;;  %v5237_v9 = vmax.f32 %v540_v2, 0.0  ;;  %v1545_v2 = vld [vmem:[%s4993_s16 + $0x200] sm:$0xff] }
 0x138   : > { %3777 = vmatprep.subr.bf16.mxu0 %v4612_v36 }
 0x139   : > { %605 = vst [vmem:[#allocation3 + $0x111] sm:$0xff] %v5237_v9 }
 0x13a   : > { %3731 = vmatpush1.bf16.msra.mxu1 %v3730_v11  ;;  %v542_v11 = vld [vmem:[#allocation2 + $0xb8] sm:$0xff] }
 0x13b   : > { %3779 = vmatpush1.bf16.msra.mxu0 %v5189_v14  ;;  %3732 = vmatprep.subr.bf16.mxu1 %v4612_v36  ;;  %v5245_v17 = vmax.f32 %v542_v11, 0.0  ;;  %v744_v11 = vld [vmem:[#allocation3 + $0x2] sm:$0xff] }
 0x13c   : > { %3780 = vmatprep.subr.bf16.mxu0 %v4612_v36 }
 0x13d   : > { %607 = vst [vmem:[#allocation3 + $0x129] sm:$0xff] %v5245_v17 }
 0x13e   : > { %3734 = vmatpush1.bf16.msra.mxu1 %v3733_v29  ;;  %v544_v29 = vld [vmem:[#allocation2 + $0xc8] sm:$0xff] }
 0x13f   : > { %3782 = vmatpush1.bf16.msra.mxu0 %v5207_v32  ;;  %3735 = vmatprep.subr.bf16.mxu1 %v4612_v36  ;;  %v5258_v38 = vmax.f32 %v544_v29, 0.0  ;;  %v1548_v29 = vld [vmem:[%s4993_s16 + $0x218] sm:$0xff] }
 0x140   : > { %3783 = vmatprep.subr.bf16.mxu0 %v4612_v36 }
 0x141   : > { %609 = vst [vmem:[#allocation3 + $0x141] sm:$0xff] %v5258_v38 }
 0x142   : > { %3737 = vmatpush1.bf16.msra.mxu1 %v3736_v54  ;;  %v3742_v54 = vpack.c.bf16 %v1512_v23, %v1511_v16  ;;  %v681_v16 = vld [vmem:[#allocation3 + $0x9] sm:$0xff]  ;;  %v1547_v23 = vld [vmem:[%s4993_s16 + $0x210] sm:$0xff] }
 0x143   : > { %3785 = vmatpush1.bf16.msra.mxu0 %v5226_v61  ;;  %3738 = vmatprep.subr.bf16.mxu1 %v4612_v36  ;;  %v3796_v35 = vpack.c.bf16 %v1548_v29, %v1547_v23  ;;  %v1553_v23 = vld [vmem:[%s4993_s16 + $0x240] sm:$0xff] }
 0x144   : > { %3786 = vmatprep.subr.bf16.mxu0 %v4612_v36 }
 0x146   : > { %3740 = vmatpush1.bf16.msra.mxu1 %v3739_v13  ;;  %v3793_v13 = vpack.c.bf16 %v1546_v3, %v1545_v2  ;;  %v811_v3 = vld [vmem:[#allocation3 + $0x38] sm:$0xff] }
 0x147   : > { %3788 = vmatpush1.bf16.msra.mxu0 %v5249_v21  ;;  %3741 = vmatprep.subr.bf16.mxu1 %v4612_v36 }
 0x148   : > { %3789 = vmatprep.subr.bf16.mxu0 %v4612_v36 }
 0x14a   : > { %3743 = vmatpush1.bf16.msra.mxu1 %v3742_v54  ;;  %v1550_v54 = vld [vmem:[%s4993_s16 + $0x228] sm:$0xff] }
 0x14b   : > { %3791 = vmatpush1.bf16.msra.mxu0 %v5271_v60  ;;  %3952 = vmatprep.subr.bf16.mxu1 %v4612_v36  ;;  %v3799_v2 = vpack.c.bf16 %v1550_v54, %v1549_v52  ;;  %v814_v52 = vld [vmem:[#allocation3 + $0x60] sm:$0xff]  ;;  %v1557_v54 = vld [vmem:[%s4993_s16 + $0x260] sm:$0xff] }
 0x14c   : > { %3792 = vmatprep.subr.bf16.mxu0 %v4612_v36 }
 0x14d   : > { %1697 = vmatmul.mubr.f32.vlgmr.msra.gmra.mrb[0].mxu1 %v616_v7  ;;  %v1551_v7 = vld [vmem:[%s4993_s16 + $0x230] sm:$0xff] }
 0x14e   : > { %1922 = vmatmul.mubr.f32.vlgmr.msra.gmra.mrb[0].mxu0 %v744_v11  ;;  %1701 = vmatprep.mubr.f32.mxu1 %v681_v16  ;;  %v1552_v11 = vld [vmem:[%s4993_s16 + $0x238] sm:$0xff] }
 0x14f   : > { %3794 = vmatpush1.bf16.msra.mxu0 %v3793_v13  ;;  %1926 = vmatprep.mubr.f32.mxu0 %v809_v20  ;;  %v3802_v13 = vpack.c.bf16 %v1552_v11, %v1551_v7  ;;  %v812_v16 = vld [vmem:[#allocation3 + $0x48] sm:$0xff]  ;;  %v1559_v11 = vld [vmem:[%s4993_s16 + $0x270] sm:$0xff] }
 0x150   : > { %3795 = vmatprep.subr.bf16.mxu0 %v4612_v36  ;;  %3968 = vmatpush1.bf16.msra.mxu1 %v5051_v41  ;;  %v5302_v41 = vld [vmem:[#allocation3 + $0x22] sm:$0xff] }
 0x151   : > { %1702 = vmatmul.mubr.f32.gmra.mrb[2].mxu1 %v617_v31  ;;  %3953 = vmatprep.subr.bf16.mxu1 %v4612_v36  ;;  %v813_v31 = vld [vmem:[#allocation3 + $0x50] sm:$0xff]  ;;  %v815_v7 = vld [vmem:[#allocation3 + $0x68] sm:$0xff] }
 0x152   : > { %1927 = vmatmul.mubr.f32.gmra.mrb[2].mxu0 %v745_v33  ;;  %1706 = vmatprep.mubr.f32.mxu1 %v5100_v12  ;;  %v1555_v33 = vld [vmem:[%s4993_s16 + $0x250] sm:$0xff] }
 0x153   : > { %3797 = vmatpush1.bf16.msra.mxu0 %v3796_v35  ;;  %1931 = vmatprep.mubr.f32.mxu0 %v810_v46  ;;  %v1556_v35 = vld [vmem:[%s4993_s16 + $0x258] sm:$0xff] }
 0x154   : > { %3798 = vmatprep.subr.bf16.mxu0 %v4612_v36  ;;  %3969 = vmatpush1.bf16.msra.mxu1 %v5057_v45  ;;  %v1554_v45 = vld [vmem:[%s4993_s16 + $0x248] sm:$0xff] }
 0x155   : > { %1707 = vmatmul.mubr.f32.gmra.mrb[4].mxu1 %v5137_v40  ;;  %3954 = vmatprep.subr.bf16.mxu1 %v4612_v36  ;;  %v5311_v40 = vld [vmem:[#allocation3 + $0x32] sm:$0xff]  ;;  %v3805_v29 = vpack.c.bf16 %v1554_v45, %v1553_v23 }
 0x156   : > { %1932 = vmatmul.mubr.f32.gmra.mrb[4].mxu0 %v5292_v62  ;;  %1711 = vmatprep.mubr.f32.mxu1 %v5109_v18  ;;  %v816_v23 = vld [vmem:[#allocation3 + $0x78] sm:$0xff]  ;;  %v1561_v45 = vld [vmem:[%s4993_s16 + $0x280] sm:$0xff] }
 0x157   : > { %3800 = vmatpush1.bf16.msra.mxu0 %v3799_v2  ;;  %1936 = vmatprep.mubr.f32.mxu0 %v811_v3  ;;  %v1558_v2 = vld [vmem:[%s4993_s16 + $0x268] sm:$0xff] }
 0x158   : > { %3801 = vmatprep.subr.bf16.mxu0 %v4612_v36  ;;  %3970 = vmatpush1.bf16.msra.mxu1 %v5066_v51  ;;  %v5320_v51 = vld [vmem:[#allocation3 + $0x3a] sm:$0xff] }
 0x159   : > { %1712 = vmatmul.mubr.f32.gmra.mrb[6].mxu1 %v809_v20  ;;  %3955 = vmatprep.subr.bf16.mxu1 %v4612_v36  ;;  %v3808_v20 = vpack.c.bf16 %v1556_v35, %v1555_v33  ;;  %v817_v33 = vld [vmem:[#allocation3 + $0x80] sm:$0xff] }
 0x15a   : > { %1937 = vmatmul.mubr.f32.gmra.mrb[6].mxu0 %v5302_v41  ;;  %1716 = vmatprep.mubr.f32.mxu1 %v5115_v22  ;;  %v1563_v35 = vld [vmem:[%s4993_s16 + $0x290] sm:$0xff] }
 0x15b   : > { %3803 = vmatpush1.bf16.msra.mxu0 %v3802_v13  ;;  %1941 = vmatprep.mubr.f32.mxu0 %v812_v16  ;;  %v1560_v13 = vld [vmem:[%s4993_s16 + $0x278] sm:$0xff] }
 0x15c   : > { %3804 = vmatprep.subr.bf16.mxu0 %v4612_v36  ;;  %3971 = vmatpush1.bf16.msra.mxu1 %v5075_v57  ;;  %v5329_v57 = vld [vmem:[#allocation3 + $0x4a] sm:$0xff] }
 0x15d   : > { %1717 = vmatmul.mubr.f32.gmra.mrb[8].mxu1 %v810_v46  ;;  %3956 = vmatprep.subr.bf16.mxu1 %v4612_v36  ;;  %v3811_v46 = vpack.c.bf16 %v1558_v2, %v1557_v54  ;;  %v818_v54 = vld [vmem:[#allocation3 + $0x90] sm:$0xff] }
 0x15e   : > { %1942 = vmatmul.mubr.f32.gmra.mrb[8].mxu0 %v5311_v40  ;;  %1721 = vmatprep.mubr.f32.mxu1 %v5117_v25  ;;  %v1565_v2 = vld [vmem:[%s4993_s16 + $0x2a0] sm:$0xff] }
 0x15f   : > { %3806 = vmatpush1.bf16.msra.mxu0 %v3805_v29  ;;  %1946 = vmatprep.mubr.f32.mxu0 %v813_v31  ;;  %v1562_v29 = vld [vmem:[%s4993_s16 + $0x288] sm:$0xff] }
 0x160   : > { %3807 = vmatprep.subr.bf16.mxu0 %v4612_v36  ;;  %3972 = vmatpush1.bf16.msra.mxu1 %v5084_v63  ;;  %v5338_v63 = vld [vmem:[#allocation3 + $0x52] sm:$0xff] }
 0x161   : > { %1722 = vmatmul.mubr.f32.gmra.mrb[10].mxu1 %v811_v3  ;;  %3957 = vmatprep.subr.bf16.mxu1 %v4612_v36  ;;  %v3814_v3 = vpack.c.bf16 %v1560_v13, %v1559_v11  ;;  %v819_v11 = vld [vmem:[#allocation3 + $0x98] sm:$0xff]  ;;  %v1567_v13 = vld [vmem:[%s4993_s16 + $0x2b0] sm:$0xff] }
 0x162   : > { %1947 = vmatmul.mubr.f32.gmra.mrb[10].mxu0 %v5320_v51  ;;  %1726 = vmatprep.mubr.f32.mxu1 %v5126_v30 }
 0x163   : > { %3809 = vmatpush1.bf16.msra.mxu0 %v3808_v20  ;;  %1951 = vmatprep.mubr.f32.mxu0 %v814_v52  ;;  %v1564_v20 = vld [vmem:[%s4993_s16 + $0x298] sm:$0xff] }
 0x164   : > { %3810 = vmatprep.subr.bf16.mxu0 %v4612_v36  ;;  %3973 = vmatpush1.bf16.msra.mxu1 %v5093_v5  ;;  %v5347_v5 = vld [vmem:[#allocation3 + $0x62] sm:$0xff] }
 0x165   : > { %1727 = vmatmul.mubr.f32.gmra.mrb[12].mxu1 %v812_v16  ;;  %3958 = vmatprep.subr.bf16.mxu1 %v4612_v36  ;;  %v3817_v16 = vpack.c.bf16 %v1562_v29, %v1561_v45  ;;  %v820_v45 = vld [vmem:[#allocation3 + $0xa8] sm:$0xff]  ;;  %v1569_v29 = vld [vmem:[%s4993_s16 + $0x2c0] sm:$0xff] }
 0x166   : > { %1952 = vmatmul.mubr.f32.gmra.mrb[12].mxu0 %v5329_v57  ;;  %1731 = vmatprep.mubr.f32.mxu1 %v5132_v34 }
 0x167   : > { %3812 = vmatpush1.bf16.msra.mxu0 %v3811_v46  ;;  %1956 = vmatprep.mubr.f32.mxu0 %v815_v7  ;;  %v1566_v46 = vld [vmem:[%s4993_s16 + $0x2a8] sm:$0xff] }
 0x168   : > { %3813 = vmatprep.subr.bf16.mxu0 %v4612_v36  ;;  %3974 = vmatpush1.bf16.msra.mxu1 %v5104_v15  ;;  %v5356_v15 = vld [vmem:[#allocation3 + $0x6a] sm:$0xff] }
 0x169   : > { %1732 = vmatmul.mubr.f32.gmra.mrb[14].mxu1 %v813_v31  ;;  %3959 = vmatprep.subr.bf16.mxu1 %v4612_v36  ;;  %v3820_v31 = vpack.c.bf16 %v1564_v20, %v1563_v35  ;;  %v5387_v35 = vld [vmem:[#allocation3 + $0x92] sm:$0xff] }
 0x16a   : > { %1957 = vmatmul.mubr.f32.gmra.mrb[14].mxu0 %v5338_v63  ;;  %1736 = vmatprep.mubr.f32.mxu1 %v5135_v37 }
 0x16b   : > { %3815 = vmatpush1.bf16.msra.mxu0 %v3814_v3  ;;  %1961 = vmatprep.mubr.f32.mxu0 %v816_v23  ;;  %v1568_v3 = vld [vmem:[%s4993_s16 + $0x2b8] sm:$0xff] }
 0x16c   : > { %3816 = vmatprep.subr.bf16.mxu0 %v4612_v36  ;;  %3975 = vmatpush1.bf16.msra.mxu1 %v5121_v27  ;;  %v5365_v27 = vld [vmem:[#allocation3 + $0x7a] sm:$0xff] }
 0x16d   : > { %1737 = vmatmul.mubr.f32.gmra.mrb[16].mxu1 %v814_v52  ;;  %3960 = vmatprep.subr.bf16.mxu1 %v4612_v36  ;;  %v3823_v52 = vpack.c.bf16 %v1566_v46, %v1565_v2  ;;  %v1571_v2 = vld [vmem:[%s4993_s16 + $0x2d0] sm:$0xff]  ;;  %v1572_v46 = vld [vmem:[%s4993_s16 + $0x2d8] sm:$0xff] }
 0x16e   : > { %1962 = vmatmul.mubr.f32.gmra.mrb[16].mxu0 %v5347_v5  ;;  %1741 = vmatprep.mubr.f32.mxu1 %v5140_v42 }
 0x16f   : > { %3818 = vmatpush1.bf16.msra.mxu0 %v3817_v16  ;;  %1966 = vmatprep.mubr.f32.mxu0 %v817_v33  ;;  %v1570_v16 = vld [vmem:[%s4993_s16 + $0x2c8] sm:$0xff] }
 0x170   : > { %3819 = vmatprep.subr.bf16.mxu0 %v4612_v36  ;;  %3976 = vmatpush1.bf16.msra.mxu1 %v5144_v44  ;;  %v5374_v44 = vld [vmem:[#allocation3 + $0x82] sm:$0xff]  ;;  %v3829_v20 = vpack.c.bf16 %v1570_v16, %v1569_v29 }
 0x171   : > { %1742 = vmatmul.mubr.f32.gmra.mrb[18].mxu1 %v815_v7  ;;  %3961 = vmatprep.subr.bf16.mxu1 %v4612_v36  ;;  %v3826_v7 = vpack.c.bf16 %v1568_v3, %v1567_v13  ;;  %v3832_v13 = vpack.c.bf16 %v1572_v46, %v1571_v2  ;;  %v1574_v3 = vld [vmem:[%s4993_s16 + $0x2e8] sm:$0xff]  ;;  %v823_v16 = vld [vmem:[#allocation3 + $0xc8] sm:$0xff] }
 0x172   : > { %1967 = vmatmul.mubr.f32.gmra.mrb[18].mxu0 %v5356_v15  ;;  %1746 = vmatprep.mubr.f32.mxu1 %v5149_v48  ;;  %v1610_v2 = vld [vmem:[%s4993_s16 + $0x408] sm:$0xff] }
 0x173   : > { %3821 = vmatpush1.bf16.msra.mxu0 %v3820_v31  ;;  %1971 = vmatprep.mubr.f32.mxu0 %v818_v54  ;;  %v5422_v46 = vld [vmem:[#allocation3 + $0xb2] sm:$0xff] }
 0x174   : > { %3822 = vmatprep.subr.bf16.mxu0 %v4612_v36  ;;  %3977 = vmatpush1.bf16.msra.mxu1 %v5164_v58  ;;  %v5383_v58 = vld [vmem:[#allocation2 + $0xf0] sm:$0xff] }
 0x175   : > { %1747 = vmatmul.mubr.f32.gmra.mrb[20].mxu1 %v816_v23  ;;  %3962 = vmatprep.subr.bf16.mxu1 %v4612_v36  ;;  %v5385_v23 = vld [vmem:[#allocation2 + $0xf8] sm:$0xff]  ;;  %v581_v31 = vmax.f32 %v5383_v58, 0.0 }
 0x176   : > { %1972 = vmatmul.mubr.f32.gmra.mrb[20].mxu0 %v5365_v27  ;;  %1751 = vmatprep.mubr.f32.mxu1 %v5156_v53  ;;  %v1132_v58 = vld [vmem:[#allocation3 + $0x52] sm:$0xff] }
 0x177   : > { %3824 = vmatpush1.bf16.msra.mxu0 %v3823_v52  ;;  %1976 = vmatprep.mubr.f32.mxu0 %v819_v11  ;;  %614 = vst [vmem:[#allocation3 + $0x181] sm:$0xff] %v581_v31  ;;  %v5402_v52 = vld [vmem:[#allocation3 + $0x9a] sm:$0xff] }
 0x178   : > { %3825 = vmatprep.subr.bf16.mxu0 %v4612_v36  ;;  %3978 = vmatpush1.bf16.msra.mxu1 %v5176_v4  ;;  %v582_v4 = vmax.f32 %v5385_v23, 0.0  ;;  %v1003_v23 = vld [vmem:[#allocation3 + $0x48] sm:$0xff] }
 0x179   : > { %1752 = vmatmul.mubr.f32.gmra.mrb[22].mxu1 %v817_v33  ;;  %3963 = vmatprep.subr.bf16.mxu1 %v4612_v36  ;;  %v821_v33 = vld [vmem:[#allocation3 + $0xb0] sm:$0xff] }
 0x17a   : > { %1977 = vmatmul.mubr.f32.gmra.mrb[22].mxu0 %v5374_v44  ;;  %1756 = vmatprep.mubr.f32.mxu1 %v5160_v56  ;;  %615 = vst [vmem:[#allocation3 + $0x189] sm:$0xff] %v582_v4 }
 0x17b   : > { %3827 = vmatpush1.bf16.msra.mxu0 %v3826_v7  ;;  %1981 = vmatprep.mubr.f32.mxu0 %v820_v45  ;;  %v5411_v7 = vld [vmem:[#allocation3 + $0xaa] sm:$0xff] }
 0x17c   : > { %3828 = vmatprep.subr.bf16.mxu0 %v4612_v36  ;;  %3979 = vmatpush1.bf16.msra.mxu1 %v5189_v14  ;;  %v822_v14 = vld [vmem:[#allocation3 + $0xc0] sm:$0xff] }
 0x17d   : > { %1757 = vmatmul.mubr.f32.gmra.mrb[24].mxu1 %v818_v54  ;;  %3964 = vmatprep.subr.bf16.mxu1 %v4612_v36  ;;  %v1573_v54 = vld [vmem:[%s4993_s16 + $0x2e0] sm:$0xff] }
 0x17e   : > { %1982 = vmatmul.mubr.f32.gmra.mrb[24].mxu0 %v5387_v35  ;;  %1761 = vmatprep.mubr.f32.mxu1 %v5172_v1  ;;  %v3835_v29 = vpack.c.bf16 %v1574_v3, %v1573_v54  ;;  %v1577_v54 = vld [vmem:[%s4993_s16 + $0x300] sm:$0xff] }
 0x17f   : > { %3830 = vmatpush1.bf16.msra.mxu0 %v3829_v20  ;;  %1986 = vmatprep.mubr.f32.mxu0 %v821_v33  ;;  %v1609_v20 = vld [vmem:[%s4993_s16 + $0x400] sm:$0xff] }
 0x180   : > { %3831 = vmatprep.subr.bf16.mxu0 %v4612_v36  ;;  %3980 = vmatpush1.bf16.msra.mxu1 %v5207_v32  ;;  %v1575_v32 = vld [vmem:[%s4993_s16 + $0x2f0] sm:$0xff] }
 0x181   : > { %1762 = vmatmul.mubr.f32.gmra.mrb[26].mxu1 %v819_v11  ;;  %3965 = vmatprep.subr.bf16.mxu1 %v4612_v36  ;;  %v1576_v11 = vld [vmem:[%s4993_s16 + $0x2f8] sm:$0xff] }
 0x182   : > { %1987 = vmatmul.mubr.f32.gmra.mrb[26].mxu0 %v5402_v52  ;;  %1766 = vmatprep.mubr.f32.mxu1 %v5181_v8 }
 0x183   : > { %3833 = vmatpush1.bf16.msra.mxu0 %v3832_v13  ;;  %1991 = vmatprep.mubr.f32.mxu0 %v822_v14  ;;  %v3838_v13 = vpack.c.bf16 %v1576_v11, %v1575_v32  ;;  %v1580_v32 = vld [vmem:[%s4993_s16 + $0x318] sm:$0xff]  ;;  %v1586_v11 = vld [vmem:[%s4993_s16 + $0x348] sm:$0xff] }
 0x184   : > { %3834 = vmatprep.subr.bf16.mxu0 %v4612_v36  ;;  %3981 = vmatpush1.bf16.msra.mxu1 %v5226_v61  ;;  %v1578_v61 = vld [vmem:[%s4993_s16 + $0x308] sm:$0xff] }
 0x185   : > { %1767 = vmatmul.mubr.f32.gmra.mrb[28].mxu1 %v820_v45  ;;  %3966 = vmatprep.subr.bf16.mxu1 %v4612_v36  ;;  %v5429_v45 = vpack.c.bf16 %v1610_v2, %v1609_v20  ;;  %v3841_v3 = vpack.c.bf16 %v1578_v61, %v1577_v54  ;;  %v1587_v20 = vld [vmem:[%s4993_s16 + $0x350] sm:$0xff]  ;;  %v1588_v2 = vld [vmem:[%s4993_s16 + $0x358] sm:$0xff]  ;;  %v1590_v54 = vld [vmem:[%s4993_s16 + $0x368] sm:$0xff] }
 0x186   : > { %1992 = vmatmul.mubr.f32.gmra.mrb[28].mxu0 %v5411_v7  ;;  %1771 = vmatprep.mubr.f32.mxu1 %v5193_v19  ;;  %v1591_v61 = vld [vmem:[%s4993_s16 + $0x370] sm:$0xff] }
 0x187   : > { %3836 = vmatpush1.bf16.msra.mxu0 %v3835_v29  ;;  %1996 = vmatprep.mubr.f32.mxu0 %v823_v16  ;;  %v1579_v29 = vld [vmem:[%s4993_s16 + $0x310] sm:$0xff] }
 0x188   : > { %3837 = vmatprep.subr.bf16.mxu0 %v4612_v36  ;;  %3982 = vmatpush1.bf16.msra.mxu1 %v5249_v21  ;;  %v3844_v21 = vpack.c.bf16 %v1580_v32, %v1579_v29  ;;  %v1593_v29 = vld [vmem:[%s4993_s16 + $0x380] sm:$0xff]  ;;  %v1594_v32 = vld [vmem:[%s4993_s16 + $0x388] sm:$0xff] }
 0x189   : > { %1772 = vmatmul.mubr.f32.gmra.mrb[30].mxu1 %v821_v33  ;;  %3967 = vmatprep.subr.bf16.mxu1 %v4612_v36  ;;  %v1582_v33 = vld [vmem:[%s4993_s16 + $0x328] sm:$0xff] }
 0x18a   : > { %1997 = vmatmul.mubr.f32.gmra.mrb[30].mxu0 %v5422_v46  ;;  %1776 = vmatprep.mubr.f32.mxu1 %v5198_v24 }
 0x18b   : > { %3839 = vmatpush1.bf16.msra.mxu0 %v3838_v13  ;;  %2146 = vmatprep.mubr.f32.mxu0 %v5292_v62  ;;  %v1581_v62 = vld [vmem:[%s4993_s16 + $0x320] sm:$0xff] }
 0x18c   : > { %3840 = vmatprep.subr.bf16.mxu0 %v4612_v36  ;;  %3983 = vmatpush1.bf16.msra.mxu1 %v5271_v60  ;;  %v5447_v60 = vld [vmem:[#allocation3 + $0xd8] sm:$0xff]  ;;  %v1589_v13 = vld [vmem:[%s4993_s16 + $0x360] sm:$0xff] }
 0x18d   : > { %1777 = vmatmul.mubr.f32.gmra.mrb[32].mxu1 %v822_v14  ;;  %3889 = vmatprep.subr.bf16.mxu1 %v5429_v45  ;;  %v1584_v14 = vld [vmem:[%s4993_s16 + $0x338] sm:$0xff] }
 0x18e   : > { %2147 = vmatmul.mubr.f32.vlgmr.msra.gmra.mrb[0].mxu0 %v5100_v12  ;;  %1781 = vmatprep.mubr.f32.mxu1 %v5201_v28  ;;  %v3847_v12 = vpack.c.bf16 %v1582_v33, %v1581_v62  ;;  %v1596_v62 = vld [vmem:[%s4993_s16 + $0x398] sm:$0xff]  ;;  %v1597_v33 = vld [vmem:[%s4993_s16 + $0x3a0] sm:$0xff] }
 0x18f   : > { %3842 = vmatpush1.bf16.msra.mxu0 %v3841_v3  ;;  %2151 = vmatprep.mubr.f32.mxu0 %v5302_v41  ;;  %v1583_v41 = vld [vmem:[%s4993_s16 + $0x330] sm:$0xff]  ;;  %v1592_v3 = vld [vmem:[%s4993_s16 + $0x378] sm:$0xff] }
 0x190   : > { %3843 = vmatprep.subr.bf16.mxu0 %v4612_v36 }
 0x191   : > { %1782 = vmatmul.mubr.f32.gmra.mrb[34].mxu1 %v823_v16  ;;  %v1585_v16 = vld [vmem:[%s4993_s16 + $0x340] sm:$0xff] }
 0x192   : > { %2152 = vmatmul.mubr.f32.gmra.mrb[2].mxu0 %v5109_v18  ;;  %1786 = vmatprep.mubr.f32.mxu1 %v5214_v43  ;;  %v5456_v18 = vld [vmem:[#allocation3 + $0xe0] sm:$0xff] }
 0x193   : > { %2156 = vmatprep.mubr.f32.mxu0 %v5311_v40  ;;  %3845 = vmatpush1.bf16.msra.mxu0 %v3844_v21  ;;  %v3850_v40 = vpack.c.bf16 %v1584_v14, %v1583_v41  ;;  %v1595_v21 = vld [vmem:[%s4993_s16 + $0x390] sm:$0xff]  ;;  %v1600_v14 = vld [vmem:[%s4993_s16 + $0x3b8] sm:$0xff] }
 0x194   : > { %3846 = vmatprep.subr.bf16.mxu0 %v4612_v36  ;;  %v1599_v41 = vld [vmem:[%s4993_s16 + $0x3b0] sm:$0xff] }
 0x195   : > { %1787 = vmatmul.mubr.f32.gmra.mrb[36].mxu1 %v5447_v60 }
 0x196   : > { %2157 = vmatmul.mubr.f32.gmra.mrb[4].mxu0 %v5115_v22  ;;  %1791 = vmatprep.mubr.f32.mxu1 %v5216_v49  ;;  %v5465_v22 = vld [vmem:[#allocation3 + $0xf0] sm:$0xff] }
 0x197   : > { %2161 = vmatprep.mubr.f32.mxu0 %v5320_v51  ;;  %3848 = vmatpush1.bf16.msra.mxu0 %v3847_v12  ;;  %v3853_v51 = vpack.c.bf16 %v1586_v11, %v1585_v16  ;;  %v1598_v12 = vld [vmem:[%s4993_s16 + $0x3a8] sm:$0xff]  ;;  %v1603_v11 = vld [vmem:[%s4993_s16 + $0x3d0] sm:$0xff] }
 0x198   : > { %3849 = vmatprep.subr.bf16.mxu0 %v4612_v36  ;;  %v1602_v16 = vld [vmem:[%s4993_s16 + $0x3c8] sm:$0xff] }
 0x199   : > { %1792 = vmatmul.mubr.f32.gmra.mrb[38].mxu1 %v5456_v18 }
 0x19a   : > { %2162 = vmatmul.mubr.f32.gmra.mrb[6].mxu0 %v5117_v25  ;;  %1796 = vmatprep.mubr.f32.mxu1 %v5218_v50  ;;  %v5474_v25 = vld [vmem:[#allocation3 + $0xf8] sm:$0xff] }
 0x19b   : > { %2166 = vmatprep.mubr.f32.mxu0 %v5329_v57  ;;  %3851 = vmatpush1.bf16.msra.mxu0 %v3850_v40  ;;  %v3856_v57 = vpack.c.bf16 %v1588_v2, %v1587_v20  ;;  %v1601_v40 = vld [vmem:[%s4993_s16 + $0x3c0] sm:$0xff]  ;;  %v5549_v20 = vld [vmem:[#allocation3 + $0xc2] sm:$0xff] }
 0x19c   : > { %3852 = vmatprep.subr.bf16.mxu0 %v4612_v36  ;;  %v1605_v2 = vld [vmem:[%s4993_s16 + $0x3e0] sm:$0xff] }
 0x19d   : > { %1797 = vmatmul.mubr.f32.gmra.mrb[40].mxu1 %v5465_v22 }
 0x19e   : > { %2167 = vmatmul.mubr.f32.gmra.mrb[8].mxu0 %v5126_v30  ;;  %1801 = vmatprep.mubr.f32.mxu1 %v5222_v59  ;;  %v5483_v30 = vld [vmem:[#allocation3 + $0x108] sm:$0xff] }
 0x19f   : > { %2171 = vmatprep.mubr.f32.mxu0 %v5338_v63  ;;  %3854 = vmatpush1.bf16.msra.mxu0 %v3853_v51  ;;  %v3859_v63 = vpack.c.bf16 %v1590_v54, %v1589_v13  ;;  %v1604_v51 = vld [vmem:[%s4993_s16 + $0x3d8] sm:$0xff]  ;;  %v1607_v54 = vld [vmem:[%s4993_s16 + $0x3f0] sm:$0xff] }
 0x1a0   : > { %3855 = vmatprep.subr.bf16.mxu0 %v4612_v36  ;;  %v5560_v13 = vld [vmem:[#allocation3 + $0xca] sm:$0xff] }
 0x1a1   : > { %1802 = vmatmul.mubr.f32.gmra.mrb[42].mxu1 %v5474_v25 }
 0x1a2   : > { %2172 = vmatmul.mubr.f32.gmra.mrb[10].mxu0 %v5132_v34  ;;  %1806 = vmatprep.mubr.f32.mxu1 %v5231_v0  ;;  %v5492_v34 = vld [vmem:[#allocation3 + $0x110] sm:$0xff] }
 0x1a3   : > { %2176 = vmatprep.mubr.f32.mxu0 %v5347_v5  ;;  %3857 = vmatpush1.bf16.msra.mxu0 %v3856_v57  ;;  %v3862_v5 = vpack.c.bf16 %v1592_v3, %v1591_v61  ;;  %v1606_v57 = vld [vmem:[%s4993_s16 + $0x3e8] sm:$0xff] }
 0x1a4   : > { %3858 = vmatprep.subr.bf16.mxu0 %v4612_v36  ;;  %v5571_v3 = vld [vmem:[#allocation3 + $0xda] sm:$0xff] }
 0x1a5   : > { %1807 = vmatmul.mubr.f32.gmra.mrb[44].mxu1 %v5483_v30 }
 0x1a6   : > { %2177 = vmatmul.mubr.f32.gmra.mrb[12].mxu0 %v5135_v37  ;;  %1811 = vmatprep.mubr.f32.mxu1 %v5237_v9  ;;  %v5501_v37 = vld [vmem:[#allocation3 + $0x120] sm:$0xff] }
 0x1a7   : > { %2181 = vmatprep.mubr.f32.mxu0 %v5356_v15  ;;  %3860 = vmatpush1.bf16.msra.mxu0 %v3859_v63  ;;  %v3865_v15 = vpack.c.bf16 %v1594_v32, %v1593_v29  ;;  %v1608_v63 = vld [vmem:[%s4993_s16 + $0x3f8] sm:$0xff] }
 0x1a8   : > { %3861 = vmatprep.subr.bf16.mxu0 %v4612_v36  ;;  %v3886_v61 = vpack.c.bf16 %v1608_v63, %v1607_v54  ;;  %v1612_v29 = vld [vmem:[%s4993_s16 + $0x418] sm:$0xff]  ;;  %v1065_v54 = vld [vmem:[#allocation3 + $0x31] sm:$0xff] }
 0x1a9   : > { %1812 = vmatmul.mubr.f32.gmra.mrb[46].mxu1 %v5492_v34  ;;  %v1001_v63 = vld [vmem:[#allocation3 + $0x30] sm:$0xff] }
 0x1aa   : > { %2182 = vmatmul.mubr.f32.gmra.mrb[14].mxu0 %v5140_v42  ;;  %1816 = vmatprep.mubr.f32.mxu1 %v5239_v10  ;;  %v5510_v42 = vld [vmem:[#allocation3 + $0x128] sm:$0xff] }
 0x1ab   : > { %2186 = vmatprep.mubr.f32.mxu0 %v5365_v27  ;;  %3863 = vmatpush1.bf16.msra.mxu0 %v3862_v5  ;;  %v3868_v27 = vpack.c.bf16 %v1596_v62, %v1595_v21  ;;  %v1611_v5 = vld [vmem:[%s4993_s16 + $0x410] sm:$0xff] }
 0x1ac   : > { %3864 = vmatprep.subr.bf16.mxu0 %v4612_v36  ;;  %v3892_v32 = vpack.c.bf16 %v1612_v29, %v1611_v5  ;;  %v1615_v62 = vld [vmem:[%s4993_s16 + $0x430] sm:$0xff] }
 0x1ad   : > { %1817 = vmatmul.mubr.f32.gmra.mrb[48].mxu1 %v5501_v37  ;;  %v1066_v5 = vld [vmem:[#allocation3 + $0x39] sm:$0xff]  ;;  %v1133_v29 = vld [vmem:[#allocation3 + $0x62] sm:$0xff] }
 0x1ae   : > { %2187 = vmatmul.mubr.f32.gmra.mrb[16].mxu0 %v5149_v48  ;;  %1821 = vmatprep.mubr.f32.mxu1 %v5245_v17  ;;  %v5519_v48 = vld [vmem:[#allocation3 + $0x138] sm:$0xff] }
 0x1af   : > { %2191 = vmatprep.mubr.f32.mxu0 %v5374_v44  ;;  %3866 = vmatpush1.bf16.msra.mxu0 %v3865_v15  ;;  %v3871_v44 = vpack.c.bf16 %v1598_v12, %v1597_v33  ;;  %v1613_v15 = vld [vmem:[%s4993_s16 + $0x420] sm:$0xff]  ;;  %v1618_v12 = vld [vmem:[%s4993_s16 + $0x448] sm:$0xff] }
 0x1b0   : > { %3867 = vmatprep.subr.bf16.mxu0 %v4612_v36  ;;  %v1617_v33 = vld [vmem:[%s4993_s16 + $0x440] sm:$0xff] }
 0x1b1   : > { %1822 = vmatmul.mubr.f32.gmra.mrb[50].mxu1 %v5510_v42 }
 0x1b2   : > { %2192 = vmatmul.mubr.f32.gmra.mrb[18].mxu0 %v5156_v53  ;;  %1826 = vmatprep.mubr.f32.mxu1 %v5252_v26  ;;  %v5528_v53 = vld [vmem:[#allocation3 + $0x140] sm:$0xff] }
 0x1b3   : > { %2196 = vmatprep.mubr.f32.mxu0 %v5387_v35  ;;  %3869 = vmatpush1.bf16.msra.mxu0 %v3868_v27  ;;  %v3874_v35 = vpack.c.bf16 %v1600_v14, %v1599_v41  ;;  %v1616_v27 = vld [vmem:[%s4993_s16 + $0x438] sm:$0xff]  ;;  %v1619_v41 = vld [vmem:[%s4993_s16 + $0x450] sm:$0xff] }
 0x1b4   : > { %3870 = vmatprep.subr.bf16.mxu0 %v4612_v36  ;;  %v1620_v14 = vld [vmem:[%s4993_s16 + $0x458] sm:$0xff] }
 0x1b5   : > { %1827 = vmatmul.mubr.f32.gmra.mrb[52].mxu1 %v5519_v48 }
 0x1b6   : > { %2197 = vmatmul.mubr.f32.gmra.mrb[20].mxu0 %v5160_v56  ;;  %1831 = vmatprep.mubr.f32.mxu1 %v5258_v38  ;;  %v5537_v56 = vld [vmem:[#allocation3 + $0x150] sm:$0xff] }
 0x1b7   : > { %2201 = vmatprep.mubr.f32.mxu0 %v5402_v52  ;;  %3872 = vmatpush1.bf16.msra.mxu0 %v3871_v44  ;;  %v3877_v52 = vpack.c.bf16 %v1602_v16, %v1601_v40  ;;  %v3904_v44 = vpack.c.bf16 %v1618_v12, %v1617_v33  ;;  %v1621_v40 = vld [vmem:[%s4993_s16 + $0x460] sm:$0xff]  ;;  %v1622_v16 = vld [vmem:[%s4993_s16 + $0x468] sm:$0xff]  ;;  %v1005_v12 = vld [vmem:[#allocation3 + $0x60] sm:$0xff] }
 0x1b8   : > { %3873 = vmatprep.subr.bf16.mxu0 %v4612_v36  ;;  %v1138_v33 = vld [vmem:[#allocation3 + $0x9a] sm:$0xff] }
 0x1b9   : > { %1832 = vmatmul.mubr.f32.gmra.mrb[54].mxu1 %v5528_v53 }
 0x1ba   : > { %2202 = vmatmul.mubr.f32.gmra.mrb[22].mxu0 %v5172_v1  ;;  %1836 = vmatprep.mubr.f32.mxu1 %v5260_v39  ;;  %v5546_v1 = vld [vmem:[#allocation3 + $0x158] sm:$0xff] }
 0x1bb   : > { %2206 = vmatprep.mubr.f32.mxu0 %v5411_v7  ;;  %3875 = vmatpush1.bf16.msra.mxu0 %v3874_v35  ;;  %v3880_v7 = vpack.c.bf16 %v1604_v51, %v1603_v11  ;;  %v3908_v35 = vpack.c.bf16 %v1620_v14, %v1619_v41  ;;  %v1623_v11 = vld [vmem:[%s4993_s16 + $0x470] sm:$0xff]  ;;  %v1624_v51 = vld [vmem:[%s4993_s16 + $0x478] sm:$0xff]  ;;  %v1140_v14 = vld [vmem:[#allocation3 + $0xb2] sm:$0xff] }
 0x1bc   : > { %3876 = vmatprep.subr.bf16.mxu0 %v4612_v36  ;;  %v1070_v41 = vld [vmem:[#allocation3 + $0x69] sm:$0xff] }
 0x1bd   : > { %1837 = vmatmul.mubr.f32.gmra.mrb[56].mxu1 %v5537_v56 }
 0x1be   : > { %2207 = vmatmul.mubr.f32.gmra.mrb[24].mxu0 %v5181_v8  ;;  %1841 = vmatprep.mubr.f32.mxu1 %v5263_v47  ;;  %v5557_v8 = vld [vmem:[#allocation3 + $0x168] sm:$0xff] }
 0x1bf   : > { %2211 = vmatprep.mubr.f32.mxu0 %v5422_v46  ;;  %3878 = vmatpush1.bf16.msra.mxu0 %v3877_v52  ;;  %v3883_v46 = vpack.c.bf16 %v1606_v57, %v1605_v2  ;;  %v3912_v52 = vpack.c.bf16 %v1622_v16, %v1621_v40  ;;  %v5635_v2 = vld [vmem:[#allocation3 + $0x13a] sm:$0xff]  ;;  %v5673_v57 = vld [vmem:[#allocation3 + $0x182] sm:$0xff] }
 0x1c0   : > { %3879 = vmatprep.subr.bf16.mxu0 %v4612_v36  ;;  %v1071_v40 = vld [vmem:[#allocation3 + $0x79] sm:$0xff] }
 0x1c1   : > { %1842 = vmatmul.mubr.f32.gmra.mrb[58].mxu1 %v5546_v1 }
 0x1c2   : > { %2212 = vmatmul.mubr.f32.gmra.mrb[26].mxu0 %v5193_v19  ;;  %1846 = vmatprep.mubr.f32.mxu1 %v5267_v55  ;;  %v5568_v19 = vld [vmem:[#allocation3 + $0x170] sm:$0xff] }
 0x1c3   : > { %2216 = vmatprep.mubr.f32.mxu0 %v5549_v20  ;;  %3881 = vmatpush1.bf16.msra.mxu0 %v3880_v7  ;;  %v3916_v7 = vpack.c.bf16 %v1624_v51, %v1623_v11  ;;  %v1007_v11 = vld [vmem:[#allocation3 + $0x78] sm:$0xff]  ;;  %v1072_v51 = vld [vmem:[#allocation3 + $0x81] sm:$0xff] }
 0x1c4   : > { %3882 = vmatprep.subr.bf16.mxu0 %v4612_v36 }
 0x1c5   : > { %1847 = vmatmul.mubr.f32.gmra.mrb[60].mxu1 %v5557_v8 }
 0x1c6   : > { %2217 = vmatmul.mubr.f32.gmra.mrb[28].mxu0 %v5198_v24  ;;  %1851 = vmatprep.mubr.f32.mxu1 %v5278_v6  ;;  %v5580_v24 = vld [vmem:[#allocation3 + $0xe2] sm:$0xff] }
 0x1c7   : > { %2221 = vmatprep.mubr.f32.mxu0 %v5560_v13  ;;  %3884 = vmatpush1.bf16.msra.mxu0 %v3883_v46  ;;  %v5681_v46 = vld [vmem:[#allocation3 + $0x18a] sm:$0xff] }
 0x1c8   : > { %3885 = vmatprep.subr.bf16.mxu0 %v4612_v36  ;;  %v1614_v36 = vld [vmem:[%s4993_s16 + $0x428] sm:$0xff] }
 0x1c9   : > { %1852 = vmatmul.mubr.f32.gmra.mrb[62].mxu1 %v5568_v19  ;;  %v3896_v21 = vpack.c.bf16 %v1614_v36, %v1613_v15  ;;  %v1134_v15 = vld [vmem:[#allocation3 + $0x6a] sm:$0xff] }
 0x1ca   : > { %2222 = vmatmul.mubr.f32.gmra.mrb[30].mxu0 %v5201_v28  ;;  %2001 = vmatprep.mubr.f32.mxu1 %v5447_v60  ;;  %v5589_v28 = vld [vmem:[#allocation3 + $0xf2] sm:$0xff] }
 0x1cb   : > { %2226 = vmatprep.mubr.f32.mxu0 %v5571_v3  ;;  %3887 = vmatpush1.bf16.msra.mxu0 %v3886_v61  ;;  %v1131_v61 = vld [vmem:[#allocation3 + $0x4a] sm:$0xff] }
 0x1cc   : > { %v1068_v36 = vld [vmem:[#allocation3 + $0x51] sm:$0xff] }
 0x1cd   : > { %2002 = vmatmul.mubr.f32.vlgmr.msra.gmra.mrb[32].mxu1 %v5549_v20 }
 0x1ce   : > { %2227 = vmatmul.mubr.f32.gmra.mrb[32].mxu0 %v5214_v43  ;;  %2006 = vmatprep.mubr.f32.mxu1 %v5456_v18  ;;  %v5597_v43 = vld [vmem:[#allocation3 + $0xfa] sm:$0xff] }
 0x1cf   : > { %2231 = vmatprep.mubr.f32.mxu0 %v5580_v24  ;;  %3891 = vmatpush3.bf16.msra.mxu1 %v5429_v45  ;;  %v3900_v45 = vpack.c.bf16 %v1616_v27, %v1615_v62  ;;  %v1004_v62 = vld [vmem:[#allocation3 + $0x50] sm:$0xff] }
 0x1d0   : > { %3893 = vmatprep.subr.bf16.mxu1 %v3892_v32  ;;  %v1137_v27 = vld [vmem:[#allocation3 + $0x92] sm:$0xff] }
 0x1d1   : > { %2007 = vmatmul.mubr.f32.gmra.mrb[34].mxu1 %v5560_v13 }
 0x1d2   : > { %2232 = vmatmul.mubr.f32.gmra.mrb[34].mxu0 %v5216_v49  ;;  %2011 = vmatprep.mubr.f32.mxu1 %v5465_v22  ;;  %v5605_v49 = vld [vmem:[#allocation3 + $0x10a] sm:$0xff] }
 0x1d3   : > { %2236 = vmatprep.mubr.f32.mxu0 %v5589_v28  ;;  %3895 = vmatpush3.bf16.msra.mxu1 %v3892_v32  ;;  %v1067_v32 = vld [vmem:[#allocation3 + $0x49] sm:$0xff] }
 0x1d4   : > { %3897 = vmatprep.subr.bf16.mxu1 %v3896_v21 }
 0x1d5   : > { %2012 = vmatmul.mubr.f32.gmra.mrb[36].mxu1 %v5571_v3 }
 0x1d6   : > { %2237 = vmatmul.mubr.f32.gmra.mrb[36].mxu0 %v5218_v50  ;;  %2016 = vmatprep.mubr.f32.mxu1 %v5474_v25  ;;  %v5613_v50 = vld [vmem:[#allocation3 + $0x112] sm:$0xff] }
 0x1d7   : > { %2241 = vmatprep.mubr.f32.mxu0 %v5597_v43  ;;  %3899 = vmatpush3.bf16.msra.mxu1 %v3896_v21  ;;  %v1136_v21 = vld [vmem:[#allocation3 + $0x82] sm:$0xff] }
 0x1d8   : > { %3901 = vmatprep.subr.bf16.mxu1 %v3900_v45 }
 0x1d9   : > { %2017 = vmatmul.mubr.f32.gmra.mrb[38].mxu1 %v5580_v24 }
 0x1da   : > { %2242 = vmatmul.mubr.f32.gmra.mrb[38].mxu0 %v5222_v59  ;;  %2021 = vmatprep.mubr.f32.mxu1 %v5483_v30  ;;  %v5621_v59 = vld [vmem:[#allocation3 + $0x122] sm:$0xff] }
 0x1db   : > { %2246 = vmatprep.mubr.f32.mxu0 %v5605_v49  ;;  %3903 = vmatpush3.bf16.msra.mxu1 %v3900_v45  ;;  %v1069_v45 = vld [vmem:[#allocation3 + $0x61] sm:$0xff] }
 0x1dc   : > { %3905 = vmatprep.subr.bf16.mxu1 %v3904_v44 }
 0x1dd   : > { %2022 = vmatmul.mubr.f32.gmra.mrb[40].mxu1 %v5589_v28 }
 0x1de   : > { %2247 = vmatmul.mubr.f32.gmra.mrb[40].mxu0 %v5231_v0  ;;  %2026 = vmatprep.mubr.f32.mxu1 %v5492_v34  ;;  %v5629_v0 = vld [vmem:[#allocation3 + $0x12a] sm:$0xff] }
 0x1df   : > { %2251 = vmatprep.mubr.f32.mxu0 %v5613_v50  ;;  %3907 = vmatpush3.bf16.msra.mxu1 %v3904_v44  ;;  %v1139_v44 = vld [vmem:[#allocation3 + $0xaa] sm:$0xff] }
 0x1e0   : > { %3909 = vmatprep.subr.bf16.mxu1 %v3908_v35 }
 0x1e1   : > { %2027 = vmatmul.mubr.f32.gmra.mrb[42].mxu1 %v5597_v43 }
 0x1e2   : > { %2252 = vmatmul.mubr.f32.gmra.mrb[42].mxu0 %v5237_v9  ;;  %2031 = vmatprep.mubr.f32.mxu1 %v5501_v37  ;;  %v5641_v9 = vld [vmem:[#allocation3 + $0x142] sm:$0xff] }
 0x1e3   : > { %2256 = vmatprep.mubr.f32.mxu0 %v5621_v59  ;;  %3911 = vmatpush3.bf16.msra.mxu1 %v3908_v35  ;;  %v1006_v35 = vld [vmem:[#allocation3 + $0x68] sm:$0xff] }
 0x1e4   : > { %3913 = vmatprep.subr.bf16.mxu1 %v3912_v52 }
 0x1e5   : > { %2032 = vmatmul.mubr.f32.gmra.mrb[44].mxu1 %v5605_v49 }
 0x1e6   : > { %2257 = vmatmul.mubr.f32.gmra.mrb[44].mxu0 %v5239_v10  ;;  %2036 = vmatprep.mubr.f32.mxu1 %v5510_v42  ;;  %v5647_v10 = vld [vmem:[#allocation3 + $0x152] sm:$0xff] }
 0x1e7   : > { %2261 = vmatprep.mubr.f32.mxu0 %v5629_v0  ;;  %3915 = vmatpush3.bf16.msra.mxu1 %v3912_v52 }
 0x1e8   : > { %3917 = vmatprep.subr.bf16.mxu1 %v3916_v7 }
 0x1e9   : > { %2037 = vmatmul.mubr.f32.gmra.mrb[46].mxu1 %v5613_v50 }
 0x1ea   : > { %2262 = vmatmul.mubr.f32.gmra.mrb[46].mxu0 %v5245_v17  ;;  %2041 = vmatprep.mubr.f32.mxu1 %v5519_v48  ;;  %v5653_v17 = vld [vmem:[#allocation3 + $0x15a] sm:$0xff] }
 0x1eb   : > { %2266 = vmatprep.mubr.f32.mxu0 %v5635_v2  ;;  %3919 = vmatpush3.bf16.msra.mxu1 %v3916_v7 }
 0x1ed   : > { %2042 = vmatmul.mubr.f32.gmra.mrb[48].mxu1 %v5621_v59 }
 0x1ee   : > { %2267 = vmatmul.mubr.f32.gmra.mrb[48].mxu0 %v5252_v26  ;;  %2046 = vmatprep.mubr.f32.mxu1 %v5528_v53  ;;  %v5659_v26 = vld [vmem:[#allocation3 + $0x16a] sm:$0xff] }
 0x1ef   : > { %2271 = vmatprep.mubr.f32.mxu0 %v5641_v9 }
 0x1f1   : > { %2047 = vmatmul.mubr.f32.gmra.mrb[50].mxu1 %v5629_v0 }
 0x1f2   : > { %2272 = vmatmul.mubr.f32.gmra.mrb[50].mxu0 %v5258_v38  ;;  %2051 = vmatprep.mubr.f32.mxu1 %v5537_v56  ;;  %v5665_v38 = vld [vmem:[#allocation3 + $0x172] sm:$0xff] }
 0x1f3   : > { %2276 = vmatprep.mubr.f32.mxu0 %v5647_v10 }
 0x1f5   : > { %2052 = vmatmul.mubr.f32.gmra.mrb[52].mxu1 %v5635_v2 }
 0x1f6   : > { %2277 = vmatmul.mubr.f32.gmra.mrb[52].mxu0 %v5260_v39  ;;  %2056 = vmatprep.mubr.f32.mxu1 %v5546_v1  ;;  %v5671_v39 = vld [vmem:[#allocation3 + $0x180] sm:$0xff] }
 0x1f7   : > { %2281 = vmatprep.mubr.f32.mxu0 %v5653_v17 }
 0x1f9   : > { %2057 = vmatmul.mubr.f32.gmra.mrb[54].mxu1 %v5641_v9 }
 0x1fa   : > { %2282 = vmatmul.mubr.f32.gmra.mrb[54].mxu0 %v5263_v47  ;;  %2061 = vmatprep.mubr.f32.mxu1 %v5557_v8  ;;  %v5679_v47 = vld [vmem:[#allocation3 + $0x188] sm:$0xff] }
 0x1fb   : > { %2286 = vmatprep.mubr.f32.mxu0 %v5659_v26 }
 0x1fd   : > { %2062 = vmatmul.mubr.f32.gmra.mrb[56].mxu1 %v5647_v10 }
 0x1fe   : > { %2287 = vmatmul.mubr.f32.gmra.mrb[56].mxu0 %v5267_v55  ;;  %2066 = vmatprep.mubr.f32.mxu1 %v5568_v19  ;;  %v1129_v55 = vld [vmem:[#allocation3 + $0x32] sm:$0xff] }
 0x1ff   : > { %2291 = vmatprep.mubr.f32.mxu0 %v5665_v38 }
 0x201   : > { %2067 = vmatmul.mubr.f32.gmra.mrb[58].mxu1 %v5653_v17 }
 0x202   : > { %2292 = vmatmul.mubr.f32.gmra.mrb[58].mxu0 %v5278_v6  ;;  %2071 = vmatprep.mubr.f32.mxu1 %v5671_v39  ;;  %v1130_v6 = vld [vmem:[#allocation3 + $0x3a] sm:$0xff] }
 0x203   : > { %2296 = vmatprep.mubr.f32.mxu0 %v5673_v57 }
 0x205   : > { %2072 = vmatmul.mubr.f32.gmra.mrb[60].mxu1 %v5659_v26 }
 0x206   : > { %2297 = vmatmul.mubr.f32.gmra.mrb[60].mxu0 %v581_v31  ;;  %2076 = vmatprep.mubr.f32.mxu1 %v5679_v47  ;;  %v1002_v31 = vld [vmem:[#allocation3 + $0x38] sm:$0xff] }
 0x207   : > { %2301 = vmatprep.mubr.f32.mxu0 %v5681_v46 }
 0x209   : > { %2077 = vmatmul.mubr.f32.gmra.mrb[62].mxu1 %v5665_v38 }
 0x20a   : > { %2302 = vmatmul.mubr.f32.gmra.mrb[62].mxu0 %v582_v4  ;;  %3568 = vmatprep.mubr.f32.mxu1 %v1129_v55  ;;  %v1135_v4 = vld [vmem:[#allocation3 + $0x7a] sm:$0xff] }
 0x20b   : > { %2371 = vmatprep.mubr.f32.mxu0 %v1065_v54  ;;  %v1008_v54 = vld [vmem:[#allocation3 + $0x80] sm:$0xff] }
 0x20d   : > { %3569 = vmatmul.mubr.f32.vlgmr.msra.gmra.mrb[64].mxu1 %v1130_v6  ;;  %v1073_v6 = vld [vmem:[#allocation3 + $0x91] sm:$0xff] }
 0x20e   : > { %2372 = vmatmul.mubr.f32.vlgmr.msra.gmra.mrb[0].mxu0 %v1001_v63  ;;  %3571 = vmatprep.mubr.f32.mxu1 %v1131_v61 }
 0x20f   : > { %2376 = vmatprep.mubr.f32.mxu0 %v1066_v5  ;;  %v1074_v5 = vld [vmem:[#allocation3 + $0x99] sm:$0xff] }
 0x211   : > { %3572 = vmatmul.mubr.f32.gmra.mrb[66].mxu1 %v1132_v58 }
 0x212   : > { %2377 = vmatmul.mubr.f32.gmra.mrb[2].mxu0 %v1002_v31  ;;  %3574 = vmatprep.mubr.f32.mxu1 %v1133_v29  ;;  %v1075_v31 = vld [vmem:[#allocation3 + $0xa9] sm:$0xff] }
 0x213   : > { %2381 = vmatprep.mubr.f32.mxu0 %v1067_v32  ;;  %v1076_v32 = vld [vmem:[#allocation3 + $0xb1] sm:$0xff] }
 0x215   : > { %3575 = vmatmul.mubr.f32.gmra.mrb[68].mxu1 %v1134_v15 }
 0x216   : > { %2382 = vmatmul.mubr.f32.gmra.mrb[4].mxu0 %v1003_v23  ;;  %3577 = vmatprep.mubr.f32.mxu1 %v1135_v4  ;;  %v1077_v23 = vld [vmem:[#allocation3 + $0xc1] sm:$0xff] }
 0x217   : > { %2386 = vmatprep.mubr.f32.mxu0 %v1068_v36  ;;  %v1078_v36 = vld [vmem:[#allocation3 + $0xc9] sm:$0xff] }
 0x219   : > { %3578 = vmatmul.mubr.f32.gmra.mrb[70].mxu1 %v1136_v21 }
 0x21a   : > { %2387 = vmatmul.mubr.f32.gmra.mrb[6].mxu0 %v1004_v62  ;;  %3580 = vmatprep.mubr.f32.mxu1 %v1137_v27  ;;  %v1079_v62 = vld [vmem:[#allocation3 + $0xd9] sm:$0xff] }
 0x21b   : > { %2391 = vmatprep.mubr.f32.mxu0 %v1069_v45  ;;  %v1160_v45 = vld [vmem:[#allocation3 + $0x1a2] sm:$0xff] }
 0x21d   : > { %3581 = vmatmul.mubr.f32.gmra.mrb[72].mxu1 %v1138_v33  ;;  %v4307_v33 = vld [vmem:[#allocation3 + $0xe1] sm:$0xff] }
 0x21e   : > { %2392 = vmatmul.mubr.f32.gmra.mrb[8].mxu0 %v1005_v12  ;;  %3583 = vmatprep.mubr.f32.mxu1 %v1139_v44  ;;  %v2790_v44 = vld [vmem:[%s5001_s23 + $0x8] sm:$0xff] }
 0x21f   : > { %2396 = vmatprep.mubr.f32.mxu0 %v1070_v41 }
 0x220   : > { %v5691_v16 = vpop.f32.mrb[0].mxu1 }
 0x221   : > { %3584 = vmatmul.mubr.f32.gmra.mrb[74].mxu1 %v1140_v14  ;;  %v1700_v52 = vpop.f32.mrb[1].mxu1  ;;  %v4308_v14 = vld [vmem:[#allocation3 + $0xf1] sm:$0xff] }
 0x222   : > { %2397 = vmatmul.mubr.f32.gmra.mrb[10].mxu0 %v1006_v35  ;;  %3586 = vmatprep.mubr.f32.mxu1 %v5549_v20  ;;  %v1009_v20 = vld [vmem:[#allocation3 + $0x90] sm:$0xff]  ;;  %v2791_v35 = vld [vmem:[%s5001_s23 + $0x10] sm:$0xff] }
 0x223   : > { %2401 = vmatprep.mubr.f32.mxu0 %v1071_v40  ;;  %v2792_v40 = vld [vmem:[%s5001_s23 + $0x18] sm:$0xff] }
 0x224   : > { %v5694_v7 = vpop.f32.mrb[2].mxu1  ;;  %v3924_v52 = vpack.c.bf16 %v2792_v40, %v2791_v35 }
 0x225   : > { %3587 = vmatmul.mubr.f32.gmra.mrb[76].mxu1 %v5560_v13  ;;  %v1705_v55 = vpop.f32.mrb[3].mxu1 }
 0x226   : > { %2402 = vmatmul.mubr.f32.gmra.mrb[12].mxu0 %v1007_v11  ;;  %3589 = vmatprep.mubr.f32.mxu1 %v5571_v3  ;;  %v1010_v3 = vld [vmem:[#allocation3 + $0x98] sm:$0xff] }
 0x227   : > { %2406 = vmatprep.mubr.f32.mxu0 %v1072_v51  ;;  %v4309_v11 = vld [vmem:[#allocation3 + $0xf9] sm:$0xff] }
 0x228   : > { %v5698_v63 = vpop.f32.mrb[4].mxu1  ;;  %v2793_v55 = vld [vmem:[%s5001_s23 + $0x20] sm:$0xff] }
 0x229   : > { %3590 = vmatmul.mubr.f32.gmra.mrb[78].mxu1 %v5580_v24  ;;  %v1710_v61 = vpop.f32.mrb[5].mxu1 }
 0x22a   : > { %2407 = vmatmul.mubr.f32.gmra.mrb[14].mxu0 %v1008_v54  ;;  %3592 = vmatprep.mubr.f32.mxu1 %v5589_v28  ;;  %v1011_v28 = vld [vmem:[#allocation3 + $0xa8] sm:$0xff]  ;;  %v2794_v54 = vld [vmem:[%s5001_s23 + $0x28] sm:$0xff] }
 0x22b   : > { %2411 = vmatprep.mubr.f32.mxu0 %v1073_v6  ;;  %v3928_v6 = vpack.c.bf16 %v2794_v54, %v2793_v55  ;;  %v4310_v61 = vld [vmem:[#allocation3 + $0x109] sm:$0xff] }
 0x22c   : > { %v5702_v58 = vpop.f32.mrb[6].mxu1 }
 0x22d   : > { %3593 = vmatmul.mubr.f32.gmra.mrb[80].mxu1 %v5597_v43  ;;  %v1715_v13 = vpop.f32.mrb[7].mxu1 }
 0x22e   : > { %2412 = vmatmul.mubr.f32.gmra.mrb[16].mxu0 %v1009_v20  ;;  %3595 = vmatprep.mubr.f32.mxu1 %v5605_v49  ;;  %v1012_v49 = vld [vmem:[#allocation3 + $0xb0] sm:$0xff] }
 0x22f   : > { %2416 = vmatprep.mubr.f32.mxu0 %v1074_v5  ;;  %v2795_v5 = vld [vmem:[%s5001_s23 + $0x30] sm:$0xff]  ;;  %v2796_v13 = vld [vmem:[%s5001_s23 + $0x38] sm:$0xff] }
 0x230   : > { %v5706_v29 = vpop.f32.mrb[8].mxu1 }
 0x231   : > { %3596 = vmatmul.mubr.f32.gmra.mrb[82].mxu1 %v5613_v50  ;;  %v1720_v24 = vpop.f32.mrb[9].mxu1 }
 0x232   : > { %2417 = vmatmul.mubr.f32.gmra.mrb[18].mxu0 %v1010_v3  ;;  %3598 = vmatprep.mubr.f32.mxu1 %v5621_v59  ;;  %v1013_v59 = vld [vmem:[#allocation3 + $0xc0] sm:$0xff]  ;;  %v3932_v3 = vpack.c.bf16 %v2796_v13, %v2795_v5 }
 0x233   : > { %2421 = vmatprep.mubr.f32.mxu0 %v1075_v31  ;;  %v4311_v31 = vld [vmem:[#allocation3 + $0x111] sm:$0xff] }
 0x234   : > { %v5710_v15 = vpop.f32.mrb[10].mxu1 }
 0x235   : > { %3599 = vmatmul.mubr.f32.gmra.mrb[84].mxu1 %v5629_v0  ;;  %v1725_v43 = vpop.f32.mrb[11].mxu1 }
 0x236   : > { %2422 = vmatmul.mubr.f32.gmra.mrb[20].mxu0 %v1011_v28  ;;  %3601 = vmatprep.mubr.f32.mxu1 %v5635_v2  ;;  %v1014_v2 = vld [vmem:[#allocation3 + $0xc8] sm:$0xff]  ;;  %v2797_v28 = vld [vmem:[%s5001_s23 + $0x40] sm:$0xff] }
 0x237   : > { %2426 = vmatprep.mubr.f32.mxu0 %v1076_v32  ;;  %v2798_v32 = vld [vmem:[%s5001_s23 + $0x48] sm:$0xff] }
 0x238   : > { %v5714_v4 = vpop.f32.mrb[12].mxu1  ;;  %v3936_v43 = vpack.c.bf16 %v2798_v32, %v2797_v28 }
 0x239   : > { %3602 = vmatmul.mubr.f32.gmra.mrb[86].mxu1 %v5641_v9  ;;  %v1730_v50 = vpop.f32.mrb[13].mxu1 }
 0x23a   : > { %2427 = vmatmul.mubr.f32.gmra.mrb[22].mxu0 %v1012_v49  ;;  %3604 = vmatprep.mubr.f32.mxu1 %v5647_v10  ;;  %v1159_v10 = vld [vmem:[#allocation3 + $0x19a] sm:$0xff]  ;;  %v2799_v50 = vld [vmem:[%s5001_s23 + $0x50] sm:$0xff] }
 0x23b   : > { %2431 = vmatprep.mubr.f32.mxu0 %v1077_v23  ;;  %v4312_v49 = vld [vmem:[#allocation3 + $0x121] sm:$0xff] }
 0x23c   : > { %v5718_v21 = vpop.f32.mrb[14].mxu1 }
 0x23d   : > { %3605 = vmatmul.mubr.f32.gmra.mrb[88].mxu1 %v5653_v17  ;;  %v1735_v0 = vpop.f32.mrb[15].mxu1 }
 0x23e   : > { %2432 = vmatmul.mubr.f32.gmra.mrb[24].mxu0 %v1013_v59  ;;  %3607 = vmatprep.mubr.f32.mxu1 %v5659_v26  ;;  %v2800_v59 = vld [vmem:[%s5001_s23 + $0x58] sm:$0xff] }
 0x23f   : > { %2436 = vmatprep.mubr.f32.mxu0 %v1078_v36  ;;  %v3940_v36 = vpack.c.bf16 %v2800_v59, %v2799_v50  ;;  %v4313_v0 = vld [vmem:[#allocation3 + $0x129] sm:$0xff] }
 0x240   : > { %v5722_v27 = vpop.f32.mrb[16].mxu1 }
 0x241   : > { %3608 = vmatmul.mubr.f32.gmra.mrb[90].mxu1 %v5665_v38  ;;  %v1740_v9 = vpop.f32.mrb[17].mxu1 }
 0x242   : > { %2437 = vmatmul.mubr.f32.gmra.mrb[26].mxu0 %v1014_v2  ;;  %3610 = vmatprep.mubr.f32.mxu1 %v5673_v57  ;;  %v2789_v57 = vld [vmem:[%s5001_s23] sm:$0xff]  ;;  %v2802_v2 = vld [vmem:[%s5001_s23 + $0x68] sm:$0xff] }
 0x243   : > { %2441 = vmatprep.mubr.f32.mxu0 %v1079_v62  ;;  %v3920_v41 = vpack.c.bf16 %v2790_v44, %v2789_v57  ;;  %v4314_v9 = vld [vmem:[#allocation3 + $0x139] sm:$0xff]  ;;  %v4320_v57 = vld [vmem:[#allocation3 + $0x181] sm:$0xff] }
 0x244   : > { %v5726_v17 = vpop.f32.mrb[18].mxu1  ;;  %v1095_v44 = vld [vmem:[#allocation3 + $0x199] sm:$0xff] }
 0x245   : > { %3611 = vmatmul.mubr.f32.gmra.mrb[92].mxu1 %v5681_v46  ;;  %v1745_v26 = vpop.f32.mrb[19].mxu1  ;;  %3921 = vmatprep.subr.bf16.mxu1 %v3920_v41 }
 0x246   : > { %2442 = vmatmul.mubr.f32.gmra.mrb[28].mxu0 %v5447_v60  ;;  %3613 = vmatprep.mubr.f32.mxu1 %v1159_v10  ;;  %v2803_v10 = vld [vmem:[%s5001_s23 + $0x70] sm:$0xff]  ;;  %v2804_v26 = vld [vmem:[%s5001_s23 + $0x78] sm:$0xff] }
 0x247   : > { %2446 = vmatprep.mubr.f32.mxu0 %v4307_v33  ;;  %3923 = vmatpush3.bf16.msra.mxu1 %v3920_v41  ;;  %v4316_v33 = vld [vmem:[#allocation3 + $0x151] sm:$0xff]  ;;  %v1032_v41 = vld [vmem:[#allocation3 + $0x1a0] sm:$0xff] }
 0x248   : > { %v5730_v38 = vpop.f32.mrb[20].mxu1  ;;  %3925 = vmatprep.subr.bf16.mxu1 %v3924_v52 }
 0x249   : > { %3614 = vmatmul.mubr.f32.gmra.mrb[94].mxu1 %v1160_v45  ;;  %v1750_v12 = vpop.f32.mrb[21].mxu1  ;;  %v3948_v45 = vpack.c.bf16 %v2804_v26, %v2803_v10 }
 0x24a   : > { %2447 = vmatmul.mubr.f32.gmra.mrb[30].mxu0 %v5456_v18  ;;  %v4318_v12 = vld [vmem:[#allocation3 + $0x169] sm:$0xff] }
 0x24b   : > { %2451 = vmatprep.mubr.f32.mxu0 %v4308_v14  ;;  %3927 = vmatpush3.bf16.msra.mxu1 %v3924_v52 }
 0x24c   : > { %v5735_v60 = vpop.f32.mrb[22].mxu1  ;;  %3929 = vmatprep.subr.bf16.mxu1 %v3928_v6 }
 0x24d   : > { %v1755_v46 = vpop.f32.mrb[23].mxu1 }
 0x24e   : > { %2452 = vmatmul.mubr.f32.gmra.mrb[32].mxu0 %v5465_v22 }
 0x24f   : > { %2456 = vmatprep.mubr.f32.mxu0 %v4309_v11  ;;  %3931 = vmatpush3.bf16.msra.mxu1 %v3928_v6 }
 0x250   : > { %v5740_v18 = vpop.f32.mrb[24].mxu1  ;;  %3933 = vmatprep.subr.bf16.mxu1 %v3932_v3 }
 0x251   : > { %v1760_v51 = vpop.f32.mrb[25].mxu1 }
 0x252   : > { %2457 = vmatmul.mubr.f32.gmra.mrb[34].mxu0 %v5474_v25 }
 0x253   : > { %2461 = vmatprep.mubr.f32.mxu0 %v4310_v61  ;;  %3935 = vmatpush3.bf16.msra.mxu1 %v3932_v3 }
 0x254   : > { %v5745_v22 = vpop.f32.mrb[26].mxu1  ;;  %3937 = vmatprep.subr.bf16.mxu1 %v3936_v43 }
 0x255   : > { %v1765_v20 = vpop.f32.mrb[27].mxu1 }
 0x256   : > { %2462 = vmatmul.mubr.f32.gmra.mrb[36].mxu0 %v5483_v30 }
 0x257   : > { %2466 = vmatprep.mubr.f32.mxu0 %v4311_v31  ;;  %3939 = vmatpush3.bf16.msra.mxu1 %v3936_v43 }
 0x258   : > { %v5750_v25 = vpop.f32.mrb[28].mxu1  ;;  %3941 = vmatprep.subr.bf16.mxu1 %v3940_v36 }
 0x259   : > { %v1770_v24 = vpop.f32.mrb[29].mxu1 }
 0x25a   : > { %2467 = vmatmul.mubr.f32.gmra.mrb[38].mxu0 %v5492_v34  ;;  %v2801_v34 = vld [vmem:[%s5001_s23 + $0x60] sm:$0xff] }
 0x25b   : > { %2471 = vmatprep.mubr.f32.mxu0 %v4312_v49  ;;  %3943 = vmatpush3.bf16.msra.mxu1 %v3940_v36  ;;  %v3944_v62 = vpack.c.bf16 %v2802_v2, %v2801_v34  ;;  %v5807_v2 = vld [vmem:[%s335_s19] ss:$0 sm:$0xff] }
 0x25c   : > { %v5755_v30 = vpop.f32.mrb[30].mxu1 }
 0x25d   : > { %v1775_v23 = vpop.f32.mrb[31].mxu1  ;;  %3945 = vmatprep.subr.bf16.mxu1 %v3944_v62 }
 0x25e   : > { %2472 = vmatmul.mubr.f32.gmra.mrb[40].mxu0 %v5501_v37  ;;  %v4315_v37 = vld [vmem:[#allocation3 + $0x141] sm:$0xff] }
 0x25f   : > { %2476 = vmatprep.mubr.f32.mxu0 %v4313_v0  ;;  %3947 = vmatpush3.bf16.msra.mxu1 %v3944_v62 }
 0x260   : > { %3949 = vmatprep.subr.bf16.mxu1 %v3948_v45 }
 0x262   : > { %2477 = vmatmul.mubr.f32.gmra.mrb[42].mxu0 %v5510_v42  ;;  %v4317_v42 = vld [vmem:[#allocation3 + $0x159] sm:$0xff] }
 0x263   : > { %2481 = vmatprep.mubr.f32.mxu0 %v4314_v9  ;;  %3951 = vmatpush3.bf16.msra.mxu1 %v3948_v45  ;;  %v1699_v9 = vadd.f32 %v5807_v2, %v5691_v16 }
 0x266   : > { %2482 = vmatmul.mubr.f32.gmra.mrb[44].mxu0 %v5519_v48  ;;  %v4319_v48 = vld [vmem:[#allocation3 + $0x171] sm:$0xff] }
 0x267   : > { %2486 = vmatprep.mubr.f32.mxu0 %v4315_v37 }
 0x26a   : > { %2487 = vmatmul.mubr.f32.gmra.mrb[46].mxu0 %v5528_v53  ;;  %v4321_v53 = vld [vmem:[#allocation3 + $0x189] sm:$0xff] }
 0x26b   : > { %2491 = vmatprep.mubr.f32.mxu0 %v4316_v33 }
 0x26e   : > { %2492 = vmatmul.mubr.f32.gmra.mrb[48].mxu0 %v5537_v56  ;;  %v1031_v56 = vld [vmem:[#allocation3 + $0x198] sm:$0xff] }
 0x26f   : > { %2496 = vmatprep.mubr.f32.mxu0 %v4317_v42  ;;  %v1704_v42 = vadd.f32 %v5807_v2, %v5694_v7  ;;  %v1714_v7 = vadd.f32 %v5807_v2, %v5702_v58  ;;  %v1724_v58 = vadd.f32 %v5807_v2, %v5710_v15 }
 0x272   : > { %2497 = vmatmul.mubr.f32.gmra.mrb[50].mxu0 %v5546_v1  ;;  %v1096_v1 = vld [vmem:[#allocation3 + $0x1a1] sm:$0xff] }
 0x273   : > { %2501 = vmatprep.mubr.f32.mxu0 %v4318_v12 }
 0x276   : > { %2502 = vmatmul.mubr.f32.gmra.mrb[52].mxu0 %v5557_v8 }
 0x277   : > { %2506 = vmatprep.mubr.f32.mxu0 %v4319_v48 }
 0x27a   : > { %2507 = vmatmul.mubr.f32.gmra.mrb[54].mxu0 %v5568_v19 }
 0x27b   : > { %2511 = vmatprep.mubr.f32.mxu0 %v4320_v57 }
 0x27e   : > { %2512 = vmatmul.mubr.f32.gmra.mrb[56].mxu0 %v5671_v39 }
 0x27f   : > { %2516 = vmatprep.mubr.f32.mxu0 %v4321_v53 }
 0x282   : > { %2517 = vmatmul.mubr.f32.gmra.mrb[58].mxu0 %v5679_v47 }
 0x283   : > { %2521 = vmatprep.mubr.f32.mxu0 %v1095_v44 }
 0x286   : > { %2522 = vmatmul.mubr.f32.gmra.mrb[60].mxu0 %v1031_v56 }
 0x287   : > { %2526 = vmatprep.mubr.f32.mxu0 %v1096_v1 }
 0x28a   : > { %2527 = vmatmul.mubr.f32.gmra.mrb[62].mxu0 %v1032_v41  ;;  %v1709_v41 = vadd.f32 %v5807_v2, %v5698_v63  ;;  %v1719_v63 = vadd.f32 %v5807_v2, %v5706_v29  ;;  %v1729_v29 = vadd.f32 %v5807_v2, %v5714_v4 }
 0x2a0   : > { %v5773_v8 = vpop.f32.mrb[32].mxu1 }
 0x2a1   : > { %v2005_v14 = vpop.f32.mrb[33].mxu1 }
 0x2a4   : > { %v5775_v19 = vpop.f32.mrb[34].mxu1 }
 0x2a5   : > { %v2010_v46 = vpop.f32.mrb[35].mxu1 }
 0x2a8   : > { %v5777_v35 = vpop.f32.mrb[36].mxu1 }
 0x2a9   : > { %v2015_v39 = vpop.f32.mrb[37].mxu1 }
 0x2ac   : > { %v5779_v40 = vpop.f32.mrb[38].mxu1 }
 0x2ad   : > { %v2020_v52 = vpop.f32.mrb[39].mxu1 }
 0x2b0   : > { %v5781_v47 = vpop.f32.mrb[40].mxu1 }
 0x2b1   : > { %v2025_v11 = vpop.f32.mrb[41].mxu1 }
 0x2b4   : > { %v5783_v51 = vpop.f32.mrb[42].mxu1 }
 0x2b5   : > { %v2030_v55 = vpop.f32.mrb[43].mxu1 }
 0x2b8   : > { %v5785_v54 = vpop.f32.mrb[44].mxu1 }
 0x2b9   : > { %v2035_v6 = vpop.f32.mrb[45].mxu1 }
 0x2bc   : > { %v5787_v61 = vpop.f32.mrb[46].mxu1 }
 0x2bd   : > { %v2040_v20 = vpop.f32.mrb[47].mxu1 }
 0x2c0   : > { %v5789_v5 = vpop.f32.mrb[48].mxu1 }
 0x2c1   : > { %v2045_v13 = vpop.f32.mrb[49].mxu1 }
 0x2c4   : > { %v5791_v3 = vpop.f32.mrb[50].mxu1 }
 0x2c5   : > { %v2050_v31 = vpop.f32.mrb[51].mxu1 }
 0x2c8   : > { %v5793_v24 = vpop.f32.mrb[52].mxu1 }
 0x2c9   : > { %v2055_v28 = vpop.f32.mrb[53].mxu1 }
 0x2cc   : > { %v5795_v32 = vpop.f32.mrb[54].mxu1 }
 0x2cd   : > { %v2060_v43 = vpop.f32.mrb[55].mxu1 }
 0x2d0   : > { %v5797_v49 = vpop.f32.mrb[56].mxu1 }
 0x2d1   : > { %v2065_v23 = vpop.f32.mrb[57].mxu1 }
 0x2d4   : > { %v5799_v50 = vpop.f32.mrb[58].mxu1 }
 0x2d5   : > { %v2070_v59 = vpop.f32.mrb[59].mxu1 }
 0x2d8   : > { %v5801_v36 = vpop.f32.mrb[60].mxu1 }
 0x2d9   : > { %v2075_v0 = vpop.f32.mrb[61].mxu1 }
 0x2dc   : > { %v5803_v34 = vpop.f32.mrb[62].mxu1 }
 0x2dd   : > { %v2080_v62 = vpop.f32.mrb[63].mxu1 }
 0x2e0   : > { %v3570_v10 = vpop.f32.mrb[64].mxu1 }
 0x2e1   : > { %v2373_v26 = vpop.f32.mrb[0].mxu0  ;;  %v2598_v45 = vpop.f32.mrb[65].mxu1 }
 0x2e2   : > { %v3985_v37 = vadd.f32 %v2373_v26, %v1699_v9  ;;  %v2375_v33 = vpop.f32.mrb[1].mxu0 }
 0x2e4   : > { %v2599_v12 = vadd.f32 %v3985_v37, %v2598_v45  ;;  %v3573_v48 = vpop.f32.mrb[66].mxu1 }
 0x2e5   : > { %v2378_v57 = vpop.f32.mrb[2].mxu0  ;;  %v2608_v53 = vpop.f32.mrb[67].mxu1 }
 0x2e6   : > { %v2757_v44 = vmax.f32 %v2599_v12, 0.0  ;;  %v3987_v56 = vadd.f32 %v2378_v57, %v1704_v42  ;;  %v2380_v1 = vpop.f32.mrb[3].mxu0 }
 0x2e8   : > { %v2604_v14 = vadd.f32 %v3987_v56, %v3570_v10  ;;  %3648 = vmatprep.mubr.f32.mxu1 %v2757_v44  ;;  %v3576_v16 = vpop.f32.mrb[68].mxu1 }
 0x2e9   : > { %v2383_v46 = vpop.f32.mrb[4].mxu0  ;;  %v2618_v39 = vpop.f32.mrb[69].mxu1 }
 0x2ea   : > { %v2758_v52 = vmax.f32 %v2604_v14, 0.0  ;;  %v3989_v11 = vadd.f32 %v2383_v46, %v1709_v41  ;;  %v2385_v55 = vpop.f32.mrb[5].mxu0 }
 0x2ec   : > { %v2609_v6 = vadd.f32 %v3989_v11, %v2608_v53  ;;  %3649 = vmatmul.mubr.f32.vlgmr.msra.gmra.mrb[96].mxu1 %v2758_v52  ;;  %v3579_v20 = vpop.f32.mrb[70].mxu1 }
 0x2ed   : > { %v2388_v13 = vpop.f32.mrb[6].mxu0  ;;  %v2628_v31 = vpop.f32.mrb[71].mxu1 }
 0x2ee   : > { %v2759_v28 = vmax.f32 %v2609_v6, 0.0  ;;  %v3991_v43 = vadd.f32 %v2388_v13, %v1714_v7  ;;  %v2390_v23 = vpop.f32.mrb[7].mxu0  ;;  %v1739_v13 = vadd.f32 %v5807_v2, %v5722_v27 }
 0x2f0   : > { %v2614_v59 = vadd.f32 %v3991_v43, %v3573_v48  ;;  %3651 = vmatprep.mubr.f32.mxu1 %v2759_v28  ;;  %v3582_v0 = vpop.f32.mrb[72].mxu1 }
 0x2f1   : > { %v2393_v62 = vpop.f32.mrb[8].mxu0  ;;  %v2638_v9 = vpop.f32.mrb[73].mxu1 }
 0x2f2   : > { %v2760_v10 = vmax.f32 %v2614_v59, 0.0  ;;  %v3993_v26 = vadd.f32 %v2393_v62, %v1719_v63  ;;  %v2395_v45 = vpop.f32.mrb[9].mxu0  ;;  %v1744_v62 = vadd.f32 %v5807_v2, %v5726_v17 }
 0x2f4   : > { %v2619_v37 = vadd.f32 %v3993_v26, %v2618_v39  ;;  %3652 = vmatmul.mubr.f32.gmra.mrb[98].mxu1 %v2760_v10  ;;  %v3585_v33 = vpop.f32.mrb[74].mxu1  ;;  %v1734_v39 = vadd.f32 %v5807_v2, %v5718_v21 }
 0x2f5   : > { %v2398_v42 = vpop.f32.mrb[10].mxu0  ;;  %v2648_v12 = vpop.f32.mrb[75].mxu1 }
 0x2f6   : > { %v2761_v57 = vmax.f32 %v2619_v37, 0.0  ;;  %v3995_v53 = vadd.f32 %v2398_v42, %v1724_v58  ;;  %v2400_v44 = vpop.f32.mrb[11].mxu0  ;;  %v1749_v42 = vadd.f32 %v5807_v2, %v5730_v38 }
 0x2f8   : > { %v2624_v48 = vadd.f32 %v3995_v53, %v3576_v16  ;;  %3654 = vmatprep.mubr.f32.mxu1 %v2761_v57  ;;  %v5823_v56 = vpop.f32.mrb[76].mxu1 }
 0x2f9   : > { %v2403_v1 = vpop.f32.mrb[12].mxu0  ;;  %v2658_v41 = vpop.f32.mrb[77].mxu1 }
 0x2fa   : > { %v2762_v14 = vmax.f32 %v2624_v48, 0.0  ;;  %v3997_v46 = vadd.f32 %v2403_v1, %v1729_v29  ;;  %v2405_v15 = vpop.f32.mrb[13].mxu0  ;;  %v1754_v1 = vadd.f32 %v5807_v2, %v5735_v60 }
 0x2fc   : > { %v2629_v52 = vadd.f32 %v3997_v46, %v2628_v31  ;;  %3655 = vmatmul.mubr.f32.gmra.mrb[100].mxu1 %v2762_v14  ;;  %v5827_v11 = vpop.f32.mrb[78].mxu1 }
 0x2fd   : > { %v2408_v55 = vpop.f32.mrb[14].mxu0  ;;  %v5829_v7 = vpop.f32.mrb[79].mxu1 }
 0x2fe   : > { %v2763_v4 = vmax.f32 %v2629_v52, 0.0  ;;  %v3999_v16 = vadd.f32 %v2408_v55, %v1734_v39  ;;  %v2410_v6 = vpop.f32.mrb[15].mxu0  ;;  %v1759_v55 = vadd.f32 %v5807_v2, %v5740_v18 }
 0x300   : > { %v2634_v28 = vadd.f32 %v3999_v16, %v3579_v20  ;;  %3657 = vmatprep.mubr.f32.mxu1 %v2763_v4  ;;  %v5833_v43 = vpop.f32.mrb[80].mxu1 }
 0x301   : > { %v2413_v23 = vpop.f32.mrb[16].mxu0  ;;  %v5835_v63 = vpop.f32.mrb[81].mxu1 }
 0x302   : > { %v2764_v21 = vmax.f32 %v2634_v28, 0.0  ;;  %v4001_v31 = vadd.f32 %v2413_v23, %v1739_v13  ;;  %v2415_v59 = vpop.f32.mrb[17].mxu0  ;;  %v1764_v23 = vadd.f32 %v5807_v2, %v5745_v22 }
 0x304   : > { %v2639_v10 = vadd.f32 %v4001_v31, %v2638_v9  ;;  %3658 = vmatmul.mubr.f32.gmra.mrb[102].mxu1 %v2764_v21  ;;  %v5839_v26 = vpop.f32.mrb[82].mxu1 }
 0x305   : > { %v2418_v45 = vpop.f32.mrb[18].mxu0  ;;  %v5841_v58 = vpop.f32.mrb[83].mxu1 }
 0x306   : > { %v2765_v27 = vmax.f32 %v2639_v10, 0.0  ;;  %v4003_v20 = vadd.f32 %v2418_v45, %v1744_v62  ;;  %v2420_v37 = vpop.f32.mrb[19].mxu0  ;;  %v1769_v45 = vadd.f32 %v5807_v2, %v5750_v25 }
 0x308   : > { %v2644_v57 = vadd.f32 %v4003_v20, %v3582_v0  ;;  %3660 = vmatprep.mubr.f32.mxu1 %v2765_v27  ;;  %v5845_v53 = vpop.f32.mrb[84].mxu1 }
 0x309   : > { %v2423_v44 = vpop.f32.mrb[20].mxu0  ;;  %v5847_v29 = vpop.f32.mrb[85].mxu1 }
 0x30a   : > { %v2766_v17 = vmax.f32 %v2644_v57, 0.0  ;;  %v4005_v9 = vadd.f32 %v2423_v44, %v1749_v42  ;;  %v2425_v48 = vpop.f32.mrb[21].mxu0  ;;  %v1774_v44 = vadd.f32 %v5807_v2, %v5755_v30 }
 0x30c   : > { %v2649_v14 = vadd.f32 %v4005_v9, %v2648_v12  ;;  %3661 = vmatmul.mubr.f32.gmra.mrb[104].mxu1 %v2766_v17  ;;  %v5851_v46 = vpop.f32.mrb[86].mxu1 }
 0x30d   : > { %v2428_v15 = vpop.f32.mrb[22].mxu0  ;;  %v5853_v39 = vpop.f32.mrb[87].mxu1 }
 0x30e   : > { %v2767_v38 = vmax.f32 %v2649_v14, 0.0  ;;  %v4007_v0 = vadd.f32 %v2428_v15, %v1754_v1  ;;  %v2430_v52 = vpop.f32.mrb[23].mxu0  ;;  %v4016_v15 = vadd.f32 %v5807_v2, %v5773_v8  ;;  %v4020_v8 = vadd.f32 %v5807_v2, %v5777_v35 }
 0x30f   : > { %v4024_v35 = vadd.f32 %v5807_v2, %v5781_v47  ;;  %v4028_v47 = vadd.f32 %v5807_v2, %v5785_v54  ;;  %v4032_v54 = vadd.f32 %v5807_v2, %v5789_v5  ;;  %v4036_v5 = vadd.f32 %v5807_v2, %v5793_v24 }
 0x310   : > { %v2654_v4 = vadd.f32 %v4007_v0, %v3585_v33  ;;  %3663 = vmatprep.mubr.f32.mxu1 %v2767_v38  ;;  %v5857_v16 = vpop.f32.mrb[88].mxu1  ;;  %v4040_v24 = vadd.f32 %v5807_v2, %v5797_v49  ;;  %v4044_v49 = vadd.f32 %v5807_v2, %v5801_v36 }
 0x311   : > { %v2433_v6 = vpop.f32.mrb[24].mxu0  ;;  %v5859_v13 = vpop.f32.mrb[89].mxu1 }
 0x312   : > { %v2768_v60 = vmax.f32 %v2654_v4, 0.0  ;;  %v4009_v12 = vadd.f32 %v2433_v6, %v1759_v55  ;;  %v2435_v28 = vpop.f32.mrb[25].mxu0 }
 0x314   : > { %v2659_v21 = vadd.f32 %v4009_v12, %v2658_v41  ;;  %3664 = vmatmul.mubr.f32.gmra.mrb[106].mxu1 %v2768_v60  ;;  %v5863_v31 = vpop.f32.mrb[90].mxu1 }
 0x315   : > { %v2438_v59 = vpop.f32.mrb[26].mxu0  ;;  %v5865_v62 = vpop.f32.mrb[91].mxu1 }
 0x316   : > { %v2769_v18 = vmax.f32 %v2659_v21, 0.0  ;;  %v4011_v33 = vadd.f32 %v2438_v59, %v1764_v23  ;;  %v2440_v10 = vpop.f32.mrb[27].mxu0 }
 0x318   : > { %v2664_v27 = vadd.f32 %v4011_v33, %v5823_v56  ;;  %3666 = vmatprep.mubr.f32.mxu1 %v2769_v18  ;;  %v5870_v20 = vpop.f32.mrb[92].mxu1 }
 0x319   : > { %v2443_v37 = vpop.f32.mrb[28].mxu0  ;;  %v5872_v22 = vpop.f32.mrb[93].mxu1 }
 0x31a   : > { %v2770_v41 = vmax.f32 %v2664_v27, 0.0  ;;  %v4013_v42 = vadd.f32 %v2443_v37, %v1769_v45  ;;  %v2445_v57 = vpop.f32.mrb[29].mxu0 }
 0x31c   : > { %v2669_v17 = vadd.f32 %v4013_v42, %v5829_v7  ;;  %3667 = vmatmul.mubr.f32.gmra.mrb[108].mxu1 %v2770_v41  ;;  %v5877_v9 = vpop.f32.mrb[94].mxu1  ;;  %v4018_v7 = vadd.f32 %v5807_v2, %v5775_v19  ;;  %v4022_v19 = vadd.f32 %v5807_v2, %v5779_v40  ;;  %v4026_v40 = vadd.f32 %v5807_v2, %v5783_v51 }
 0x31d   : > { %v2448_v25 = vpop.f32.mrb[30].mxu0  ;;  %v5879_v48 = vpop.f32.mrb[95].mxu1  ;;  %v4030_v51 = vadd.f32 %v5807_v2, %v5787_v61  ;;  %v4034_v61 = vadd.f32 %v5807_v2, %v5791_v3  ;;  %v4038_v3 = vadd.f32 %v5807_v2, %v5795_v32  ;;  %v4042_v32 = vadd.f32 %v5807_v2, %v5799_v50 }
 0x31e   : > { %v2771_v56 = vmax.f32 %v2669_v17, 0.0  ;;  %v4015_v1 = vadd.f32 %v2448_v25, %v1774_v44  ;;  %v2450_v14 = vpop.f32.mrb[31].mxu0  ;;  %v4046_v50 = vadd.f32 %v5807_v2, %v5803_v34  ;;  %v3037_v2 = vld [vmem:[#allocation2] sm:$0xff] }
 0x320   : > { %v2674_v38 = vadd.f32 %v4015_v1, %v5827_v11  ;;  %3669 = vmatprep.mubr.f32.mxu1 %v2771_v56 }
 0x321   : > { %v2453_v0 = vpop.f32.mrb[32].mxu0 }
 0x322   : > { %v2772_v52 = vmax.f32 %v2674_v38, 0.0  ;;  %v4017_v30 = vadd.f32 %v4016_v15, %v2453_v0  ;;  %v2455_v55 = vpop.f32.mrb[33].mxu0 }
 0x324   : > { %v2679_v4 = vadd.f32 %v4017_v30, %v5835_v63  ;;  %3670 = vmatmul.mubr.f32.gmra.mrb[110].mxu1 %v2772_v52 }
 0x325   : > { %v2458_v6 = vpop.f32.mrb[34].mxu0 }
 0x326   : > { %v2773_v60 = vmax.f32 %v2679_v4, 0.0  ;;  %v4019_v12 = vadd.f32 %v4018_v7, %v2458_v6  ;;  %v2460_v28 = vpop.f32.mrb[35].mxu0 }
 0x328   : > { %v2684_v11 = vadd.f32 %v4019_v12, %v5833_v43  ;;  %3672 = vmatprep.mubr.f32.mxu1 %v2773_v60 }
 0x329   : > { %v2463_v23 = vpop.f32.mrb[36].mxu0 }
 0x32a   : > { %v2774_v21 = vmax.f32 %v2684_v11, 0.0  ;;  %v4021_v59 = vadd.f32 %v4020_v8, %v2463_v23  ;;  %v2465_v18 = vpop.f32.mrb[37].mxu0 }
 0x32c   : > { %v2689_v63 = vadd.f32 %v4021_v59, %v5841_v58  ;;  %3673 = vmatmul.mubr.f32.gmra.mrb[112].mxu1 %v2774_v21 }
 0x32d   : > { %v2468_v33 = vpop.f32.mrb[38].mxu0 }
 0x32e   : > { %v2775_v10 = vmax.f32 %v2689_v63, 0.0  ;;  %v4023_v45 = vadd.f32 %v4022_v19, %v2468_v33  ;;  %v2470_v27 = vpop.f32.mrb[39].mxu0 }
 0x330   : > { %v2694_v43 = vadd.f32 %v4023_v45, %v5839_v26  ;;  %3675 = vmatprep.mubr.f32.mxu1 %v2775_v10 }
 0x331   : > { %v2473_v37 = vpop.f32.mrb[40].mxu0 }
 0x332   : > { %v2776_v41 = vmax.f32 %v2694_v43, 0.0  ;;  %v4025_v42 = vadd.f32 %v4024_v35, %v2473_v37  ;;  %v2475_v57 = vpop.f32.mrb[41].mxu0 }
 0x334   : > { %v2699_v58 = vadd.f32 %v4025_v42, %v5847_v29  ;;  %3676 = vmatmul.mubr.f32.gmra.mrb[114].mxu1 %v2776_v41 }
 0x335   : > { %v2478_v44 = vpop.f32.mrb[42].mxu0 }
 0x336   : > { %v2777_v17 = vmax.f32 %v2699_v58, 0.0  ;;  %v4027_v25 = vadd.f32 %v4026_v40, %v2478_v44  ;;  %v2480_v56 = vpop.f32.mrb[43].mxu0 }
 0x338   : > { %v2704_v26 = vadd.f32 %v4027_v25, %v5845_v53  ;;  %3678 = vmatprep.mubr.f32.mxu1 %v2777_v17 }
 0x339   : > { %v2483_v1 = vpop.f32.mrb[44].mxu0 }
 0x33a   : > { %v2778_v14 = vmax.f32 %v2704_v26, 0.0  ;;  %v4029_v15 = vadd.f32 %v4028_v47, %v2483_v1  ;;  %v2485_v38 = vpop.f32.mrb[45].mxu0  ;;  %v5932_v1 = vld [vmem:[%s352_s11] ss:$0 sm:$0xff] }
 0x33c   : > { %v2709_v29 = vadd.f32 %v4029_v15, %v5853_v39  ;;  %3679 = vmatmul.mubr.f32.gmra.mrb[116].mxu1 %v2778_v14  ;;  %v3038_v15 = vld [vmem:[#allocation2 + $0x8] sm:$0xff] }
 0x33d   : > { %v2488_v0 = vpop.f32.mrb[46].mxu0 }
 0x33e   : > { %v2779_v52 = vmax.f32 %v2709_v29, 0.0  ;;  %v4031_v30 = vadd.f32 %v4030_v51, %v2488_v0  ;;  %v2490_v55 = vpop.f32.mrb[47].mxu0 }
 0x33f   : > { %v3039_v55 = vld [vmem:[#allocation2 + $0x10] sm:$0xff] }
 0x340   : > { %v2714_v53 = vadd.f32 %v4031_v30, %v5851_v46  ;;  %3681 = vmatprep.mubr.f32.mxu1 %v2779_v52 }
 0x341   : > { %v2493_v7 = vpop.f32.mrb[48].mxu0 }
 0x342   : > { %v2780_v4 = vmax.f32 %v2714_v53, 0.0  ;;  %v4033_v6 = vadd.f32 %v4032_v54, %v2493_v7  ;;  %v2495_v60 = vpop.f32.mrb[49].mxu0 }
 0x344   : > { %v2719_v39 = vadd.f32 %v4033_v6, %v5859_v13  ;;  %3682 = vmatmul.mubr.f32.gmra.mrb[118].mxu1 %v2780_v4  ;;  %v3042_v6 = vld [vmem:[#allocation2 + $0x28] sm:$0xff] }
 0x345   : > { %v2498_v12 = vpop.f32.mrb[50].mxu0 }
 0x346   : > { %v2781_v28 = vmax.f32 %v2719_v39, 0.0  ;;  %v4035_v8 = vadd.f32 %v4034_v61, %v2498_v12  ;;  %v2500_v11 = vpop.f32.mrb[51].mxu0  ;;  %v3041_v39 = vld [vmem:[#allocation2 + $0x20] sm:$0xff] }
 0x348   : > { %v2724_v46 = vadd.f32 %v4035_v8, %v5857_v16  ;;  %3684 = vmatprep.mubr.f32.mxu1 %v2781_v28 }
 0x349   : > { %v2503_v23 = vpop.f32.mrb[52].mxu0 }
 0x34a   : > { %v2782_v21 = vmax.f32 %v2724_v46, 0.0  ;;  %v4037_v59 = vadd.f32 %v4036_v5, %v2503_v23  ;;  %v2505_v18 = vpop.f32.mrb[53].mxu0  ;;  %v3044_v5 = vld [vmem:[#allocation2 + $0x38] sm:$0xff] }
 0x34c   : > { %v2729_v13 = vadd.f32 %v4037_v59, %v5865_v62  ;;  %3685 = vmatmul.mubr.f32.gmra.mrb[120].mxu1 %v2782_v21  ;;  %v3043_v21 = vld [vmem:[#allocation2 + $0x30] sm:$0xff] }
 0x34d   : > { %v2508_v19 = vpop.f32.mrb[54].mxu0 }
 0x34e   : > { %v2783_v63 = vmax.f32 %v2729_v13, 0.0  ;;  %v4039_v33 = vadd.f32 %v4038_v3, %v2508_v19  ;;  %v2510_v10 = vpop.f32.mrb[55].mxu0  ;;  %v3046_v19 = vld [vmem:[#allocation2 + $0x48] sm:$0xff] }
 0x34f   : > { %v3045_v10 = vld [vmem:[#allocation2 + $0x40] sm:$0xff] }
 0x350   : > { %v2734_v16 = vadd.f32 %v4039_v33, %v5863_v31  ;;  %3687 = vmatprep.mubr.f32.mxu1 %v2783_v63 }
 0x351   : > { %v2513_v45 = vpop.f32.mrb[56].mxu0 }
 0x352   : > { %v2784_v27 = vmax.f32 %v2734_v16, 0.0  ;;  %v4041_v35 = vadd.f32 %v4040_v24, %v2513_v45  ;;  %v2515_v43 = vpop.f32.mrb[57].mxu0 }
 0x354   : > { %v2739_v62 = vadd.f32 %v4041_v35, %v5872_v22  ;;  %3688 = vmatmul.mubr.f32.gmra.mrb[122].mxu1 %v2784_v27  ;;  %v3048_v35 = vld [vmem:[#allocation2 + $0x58] sm:$0xff] }
 0x355   : > { %v2518_v37 = vpop.f32.mrb[58].mxu0 }
 0x356   : > { %v2785_v41 = vmax.f32 %v2739_v62, 0.0  ;;  %v4043_v42 = vadd.f32 %v4042_v32, %v2518_v37  ;;  %v2520_v57 = vpop.f32.mrb[59].mxu0  ;;  %v3047_v62 = vld [vmem:[#allocation2 + $0x50] sm:$0xff] }
 0x358   : > { %v2744_v31 = vadd.f32 %v4043_v42, %v5870_v20  ;;  %3690 = vmatprep.mubr.f32.mxu1 %v2785_v41 }
 0x359   : > { %v2523_v40 = vpop.f32.mrb[60].mxu0 }
 0x35a   : > { %v2786_v58 = vmax.f32 %v2744_v31, 0.0  ;;  %v4045_v44 = vadd.f32 %v4044_v49, %v2523_v40  ;;  %v2525_v17 = vpop.f32.mrb[61].mxu0  ;;  %v3050_v49 = vld [vmem:[#allocation2 + $0x68] sm:$0xff] }
 0x35c   : > { %v2749_v22 = vadd.f32 %v4045_v44, %v5879_v48  ;;  %3691 = vmatmul.mubr.f32.gmra.mrb[124].mxu1 %v2786_v58  ;;  %v3049_v58 = vld [vmem:[#allocation2 + $0x60] sm:$0xff] }
 0x35d   : > { %v2528_v25 = vpop.f32.mrb[62].mxu0 }
 0x35e   : > { %v2787_v56 = vmax.f32 %v2749_v22, 0.0  ;;  %v4047_v47 = vadd.f32 %v4046_v50, %v2528_v25  ;;  %v2530_v26 = vpop.f32.mrb[63].mxu0  ;;  %v3052_v25 = vld [vmem:[#allocation2 + $0x78] sm:$0xff] }
 0x35f   : > { %v3051_v26 = vld [vmem:[#allocation2 + $0x70] sm:$0xff] }
 0x360   : > { %v2754_v36 = vadd.f32 %v4047_v47, %v5877_v9  ;;  %3693 = vmatprep.mubr.f32.mxu1 %v2787_v56  ;;  %v3040_v9 = vld [vmem:[#allocation2 + $0x18] sm:$0xff] }
 0x362   : > { %v2788_v20 = vmax.f32 %v2754_v36, 0.0 }
 0x364   : > { %3694 = vmatmul.mubr.f32.gmra.mrb[126].mxu1 %v2788_v20 }
 0x3bf   : > { %v3650_v14 = vpop.f32.mrb[96].mxu1 }
 0x3c0   : > { %v2884_v38 = vadd.f32 %v3650_v14, %v5932_v1  ;;  %v2878_v34 = vpop.f32.mrb[97].mxu1 }
 0x3c1   : > { %v2879_v48 = vadd.f32 %v5932_v1, %v2878_v34 }
 0x3c2   : > { %v3070_v51 = vadd.f32 %v3038_v15, %v2884_v38  ;;  %v3054_v38 = vld [vmem:[#allocation2 + $0x88] sm:$0xff] }
 0x3c3   : > { %v3069_v29 = vadd.f32 %v3037_v2, %v2879_v48  ;;  %v3053_v48 = vld [vmem:[#allocation2 + $0x80] sm:$0xff] }
 0x3c4   : > { %3102 = vst [vmem:[#allocation2 + $0x8] sm:$0xff] %v3070_v51 }
 0x3c5   : > { %3101 = vst [vmem:[#allocation2] sm:$0xff] %v3069_v29 }
 0x3c7   : > { %v3653_v0 = vpop.f32.mrb[98].mxu1 }
 0x3c8   : > { %v2894_v52 = vadd.f32 %v3653_v0, %v5932_v1  ;;  %v2888_v30 = vpop.f32.mrb[99].mxu1 }
 0x3c9   : > { %v2889_v54 = vadd.f32 %v5932_v1, %v2888_v30 }
 0x3ca   : > { %v3072_v53 = vadd.f32 %v3040_v9, %v2894_v52  ;;  %v3056_v52 = vld [vmem:[#allocation2 + $0x98] sm:$0xff] }
 0x3cb   : > { %v3071_v7 = vadd.f32 %v3039_v55, %v2889_v54  ;;  %v3055_v54 = vld [vmem:[#allocation2 + $0x90] sm:$0xff] }
 0x3cc   : > { %3104 = vst [vmem:[#allocation2 + $0x18] sm:$0xff] %v3072_v53 }
 0x3cd   : > { %3103 = vst [vmem:[#allocation2 + $0x10] sm:$0xff] %v3071_v7 }
 0x3cf   : > { %v3656_v4 = vpop.f32.mrb[100].mxu1 }
 0x3d0   : > { %v2904_v60 = vadd.f32 %v3656_v4, %v5932_v1  ;;  %v2898_v61 = vpop.f32.mrb[101].mxu1 }
 0x3d1   : > { %v2899_v12 = vadd.f32 %v5932_v1, %v2898_v61 }
 0x3d2   : > { %v3074_v28 = vadd.f32 %v3042_v6, %v2904_v60  ;;  %v3058_v60 = vld [vmem:[#allocation2 + $0xa8] sm:$0xff] }
 0x3d3   : > { %v3073_v8 = vadd.f32 %v3041_v39, %v2899_v12  ;;  %v3057_v12 = vld [vmem:[#allocation2 + $0xa0] sm:$0xff] }
 0x3d4   : > { %3106 = vst [vmem:[#allocation2 + $0x28] sm:$0xff] %v3074_v28 }
 0x3d5   : > { %3105 = vst [vmem:[#allocation2 + $0x20] sm:$0xff] %v3073_v8 }
 0x3d7   : > { %v3659_v11 = vpop.f32.mrb[102].mxu1 }
 0x3d8   : > { %v2914_v46 = vadd.f32 %v3659_v11, %v5932_v1  ;;  %v2908_v23 = vpop.f32.mrb[103].mxu1 }
 0x3d9   : > { %v2909_v59 = vadd.f32 %v5932_v1, %v2908_v23 }
 0x3da   : > { %v3076_v18 = vadd.f32 %v3044_v5, %v2914_v46  ;;  %v3060_v46 = vld [vmem:[#allocation2 + $0xb8] sm:$0xff] }
 0x3db   : > { %v3075_v3 = vadd.f32 %v3043_v21, %v2909_v59  ;;  %v3059_v59 = vld [vmem:[#allocation2 + $0xb0] sm:$0xff] }
 0x3dc   : > { %3108 = vst [vmem:[#allocation2 + $0x38] sm:$0xff] %v3076_v18 }
 0x3dd   : > { %3107 = vst [vmem:[#allocation2 + $0x30] sm:$0xff] %v3075_v3 }
 0x3df   : > { %v3662_v13 = vpop.f32.mrb[104].mxu1 }
 0x3e0   : > { %v2924_v63 = vadd.f32 %v3662_v13, %v5932_v1  ;;  %v2918_v33 = vpop.f32.mrb[105].mxu1 }
 0x3e1   : > { %v2919_v24 = vadd.f32 %v5932_v1, %v2918_v33 }
 0x3e2   : > { %v3078_v16 = vadd.f32 %v3046_v19, %v2924_v63  ;;  %v3062_v63 = vld [vmem:[#allocation2 + $0xc8] sm:$0xff] }
 0x3e3   : > { %v3077_v45 = vadd.f32 %v3045_v10, %v2919_v24  ;;  %v3061_v24 = vld [vmem:[#allocation2 + $0xc0] sm:$0xff] }
 0x3e4   : > { %3110 = vst [vmem:[#allocation2 + $0x48] sm:$0xff] %v3078_v16 }
 0x3e5   : > { %3109 = vst [vmem:[#allocation2 + $0x40] sm:$0xff] %v3077_v45 }
 0x3e7   : > { %v3665_v27 = vpop.f32.mrb[106].mxu1 }
 0x3e8   : > { %v2934_v43 = vadd.f32 %v3665_v27, %v5932_v1  ;;  %v2928_v32 = vpop.f32.mrb[107].mxu1 }
 0x3e9   : > { %v2929_v37 = vadd.f32 %v5932_v1, %v2928_v32 }
 0x3ea   : > { %v3080_v41 = vadd.f32 %v3048_v35, %v2934_v43  ;;  %v3064_v43 = vld [vmem:[#allocation2 + $0xd8] sm:$0xff] }
 0x3eb   : > { %v3079_v42 = vadd.f32 %v3047_v62, %v2929_v37  ;;  %v3063_v37 = vld [vmem:[#allocation2 + $0xd0] sm:$0xff] }
 0x3ec   : > { %3112 = vst [vmem:[#allocation2 + $0x58] sm:$0xff] %v3080_v41 }
 0x3ed   : > { %3111 = vst [vmem:[#allocation2 + $0x50] sm:$0xff] %v3079_v42 }
 0x3ef   : > { %v3668_v57 = vpop.f32.mrb[108].mxu1 }
 0x3f0   : > { %v2944_v31 = vadd.f32 %v3668_v57, %v5932_v1  ;;  %v2938_v40 = vpop.f32.mrb[109].mxu1 }
 0x3f1   : > { %v2939_v44 = vadd.f32 %v5932_v1, %v2938_v40 }
 0x3f2   : > { %v3082_v17 = vadd.f32 %v3050_v49, %v2944_v31  ;;  %v3066_v31 = vld [vmem:[#allocation2 + $0xe8] sm:$0xff] }
 0x3f3   : > { %v3081_v50 = vadd.f32 %v3049_v58, %v2939_v44  ;;  %v3065_v44 = vld [vmem:[#allocation2 + $0xe0] sm:$0xff] }
 0x3f4   : > { %3114 = vst [vmem:[#allocation2 + $0x68] sm:$0xff] %v3082_v17 }
 0x3f5   : > { %3113 = vst [vmem:[#allocation2 + $0x60] sm:$0xff] %v3081_v50 }
 0x3f7   : > { %v3671_v22 = vpop.f32.mrb[110].mxu1 }
 0x3f8   : > { %v2954_v56 = vadd.f32 %v3671_v22, %v5932_v1  ;;  %v2948_v47 = vpop.f32.mrb[111].mxu1 }
 0x3f9   : > { %v2949_v36 = vadd.f32 %v5932_v1, %v2948_v47 }
 0x3fa   : > { %v3084_v20 = vadd.f32 %v3052_v25, %v2954_v56  ;;  %v3068_v56 = vld [vmem:[#allocation2 + $0xf8] sm:$0xff] }
 0x3fb   : > { %v3083_v14 = vadd.f32 %v3051_v26, %v2949_v36  ;;  %v3067_v36 = vld [vmem:[#allocation2 + $0xf0] sm:$0xff] }
 0x3fc   : > { %3116 = vst [vmem:[#allocation2 + $0x78] sm:$0xff] %v3084_v20 }
 0x3fd   : > { %3115 = vst [vmem:[#allocation2 + $0x70] sm:$0xff] %v3083_v14 }
 0x3ff   : > { %v3674_v15 = vpop.f32.mrb[112].mxu1 }
 0x400   : > { %v2964_v34 = vadd.f32 %v3674_v15, %v5932_v1  ;;  %v2958_v2 = vpop.f32.mrb[113].mxu1 }
 0x401   : > { %v2959_v51 = vadd.f32 %v5932_v1, %v2958_v2  ;;  %v3139_v2 = vld [vmem:[#allocation2 + $0x10] sm:$0xff] (!%p3431_p0) }
 0x402   : > { %v3086_v29 = vadd.f32 %v3054_v38, %v2964_v34  ;;  %v3137_v38 = vld [vmem:[#allocation2] sm:$0xff] (!%p3431_p0)  ;;  %v3138_v34 = vld [vmem:[#allocation2 + $0x8] sm:$0xff] (!%p3431_p0) }
 0x403   : > { %v3085_v0 = vadd.f32 %v3053_v48, %v2959_v51  ;;  %v3169_v48 = vmax.f32 (!%p3431_p0), %v3137_v38, 0.0  ;;  %v3170_v51 = vmax.f32 (!%p3431_p0), %v3138_v34, 0.0 }
 0x404   : > { %3118 = vst [vmem:[#allocation2 + $0x88] sm:$0xff] %v3086_v29  ;;  %v3171_v29 = vmax.f32 (!%p3431_p0), %v3139_v2, 0.0 }
 0x405   : > { %3117 = vst [vmem:[#allocation2 + $0x80] sm:$0xff] %v3085_v0  ;;  %v3140_v0 = vld [vmem:[#allocation2 + $0x18] sm:$0xff] (!%p3431_p0)  ;;  %3201 = vst [vmem:[%s5008_s7] sm:$0xff] (!%p3431_p0), %v3169_v48 }
 0x406   : > { %3202 = vst [vmem:[%s5008_s7 + $0x8] sm:$0xff] (!%p3431_p0), %v3170_v51  ;;  %3203 = vst [vmem:[%s5008_s7 + $0x10] sm:$0xff] (!%p3431_p0), %v3171_v29 }
 0x407   : > { %v3677_v9 = vpop.f32.mrb[114].mxu1 }
 0x408   : > { %v2974_v30 = vadd.f32 %v3677_v9, %v5932_v1  ;;  %v2968_v55 = vpop.f32.mrb[115].mxu1  ;;  %v3141_v9 = vld [vmem:[#allocation2 + $0x20] sm:$0xff] (!%p3431_p0) }
 0x409   : > { %v2969_v53 = vadd.f32 %v5932_v1, %v2968_v55 }
 0x40a   : > { %v3088_v7 = vadd.f32 %v3056_v52, %v2974_v30  ;;  %v3142_v52 = vld [vmem:[#allocation2 + $0x28] sm:$0xff] (!%p3431_p0)  ;;  %v3173_v30 = vmax.f32 (!%p3431_p0), %v3141_v9, 0.0 }
 0x40b   : > { %v3087_v4 = vadd.f32 %v3055_v54, %v2969_v53  ;;  %v3174_v55 = vmax.f32 (!%p3431_p0), %v3142_v52, 0.0  ;;  %v3143_v54 = vld [vmem:[#allocation2 + $0x30] sm:$0xff] (!%p3431_p0)  ;;  %v3144_v53 = vld [vmem:[#allocation2 + $0x38] sm:$0xff] (!%p3431_p0) }
 0x40c   : > { %3120 = vst [vmem:[#allocation2 + $0x98] sm:$0xff] %v3088_v7  ;;  %v3145_v7 = vld [vmem:[#allocation2 + $0x40] sm:$0xff] (!%p3431_p0)  ;;  %3205 = vst [vmem:[%s5008_s7 + $0x20] sm:$0xff] (!%p3431_p0), %v3173_v30 }
 0x40d   : > { %3119 = vst [vmem:[#allocation2 + $0x90] sm:$0xff] %v3087_v4  ;;  %v3175_v4 = vmax.f32 (!%p3431_p0), %v3143_v54, 0.0  ;;  %3206 = vst [vmem:[%s5008_s7 + $0x28] sm:$0xff] (!%p3431_p0), %v3174_v55 }
 0x40f   : > { %v3680_v6 = vpop.f32.mrb[116].mxu1  ;;  %3207 = vst [vmem:[%s5008_s7 + $0x30] sm:$0xff] (!%p3431_p0), %v3175_v4 }
 0x410   : > { %v2984_v61 = vadd.f32 %v3680_v6, %v5932_v1  ;;  %v2978_v39 = vpop.f32.mrb[117].mxu1  ;;  %v3176_v6 = vmax.f32 (!%p3431_p0), %v3144_v53, 0.0 }
 0x411   : > { %v2979_v28 = vadd.f32 %v5932_v1, %v2978_v39  ;;  %v3147_v39 = vld [vmem:[#allocation2 + $0x50] sm:$0xff] (!%p3431_p0) }
 0x412   : > { %v3090_v8 = vadd.f32 %v3058_v60, %v2984_v61  ;;  %v3177_v60 = vmax.f32 (!%p3431_p0), %v3145_v7, 0.0  ;;  %v3146_v61 = vld [vmem:[#allocation2 + $0x48] sm:$0xff] (!%p3431_p0)  ;;  %3208 = vst [vmem:[%s5008_s7 + $0x38] sm:$0xff] (!%p3431_p0), %v3176_v6 }
 0x413   : > { %v3089_v11 = vadd.f32 %v3057_v12, %v2979_v28  ;;  %v3148_v12 = vld [vmem:[#allocation2 + $0x58] sm:$0xff] (!%p3431_p0)  ;;  %v3178_v28 = vmax.f32 (!%p3431_p0), %v3146_v61, 0.0 }
 0x414   : > { %3122 = vst [vmem:[#allocation2 + $0xa8] sm:$0xff] %v3090_v8  ;;  %v3179_v8 = vmax.f32 (!%p3431_p0), %v3147_v39, 0.0  ;;  %3209 = vst [vmem:[%s5008_s7 + $0x40] sm:$0xff] (!%p3431_p0), %v3177_v60 }
 0x415   : > { %3121 = vst [vmem:[#allocation2 + $0xa0] sm:$0xff] %v3089_v11  ;;  %v3180_v11 = vmax.f32 (!%p3431_p0), %v3148_v12, 0.0  ;;  %3210 = vst [vmem:[%s5008_s7 + $0x48] sm:$0xff] (!%p3431_p0), %v3178_v28 }
 0x416   : > { %3211 = vst [vmem:[%s5008_s7 + $0x50] sm:$0xff] (!%p3431_p0), %v3179_v8 }
 0x417   : > { %v3683_v5 = vpop.f32.mrb[118].mxu1  ;;  %3212 = vst [vmem:[%s5008_s7 + $0x58] sm:$0xff] (!%p3431_p0), %v3180_v11 }
 0x418   : > { %v2994_v23 = vadd.f32 %v3683_v5, %v5932_v1  ;;  %v2988_v21 = vpop.f32.mrb[119].mxu1  ;;  %v3149_v5 = vld [vmem:[#allocation2 + $0x60] sm:$0xff] (!%p3431_p0) }
 0x419   : > { %v2989_v18 = vadd.f32 %v5932_v1, %v2988_v21  ;;  %v3181_v21 = vmax.f32 (!%p3431_p0), %v3149_v5, 0.0 }
 0x41a   : > { %v3092_v3 = vadd.f32 %v3060_v46, %v2994_v23  ;;  %v3150_v46 = vld [vmem:[#allocation2 + $0x68] sm:$0xff] (!%p3431_p0)  ;;  %v3151_v23 = vld [vmem:[#allocation2 + $0x70] sm:$0xff] (!%p3431_p0) }
 0x41b   : > { %v3091_v13 = vadd.f32 %v3059_v59, %v2989_v18  ;;  %v3182_v59 = vmax.f32 (!%p3431_p0), %v3150_v46, 0.0  ;;  %v3183_v18 = vmax.f32 (!%p3431_p0), %v3151_v23, 0.0  ;;  %3213 = vst [vmem:[%s5008_s7 + $0x60] sm:$0xff] (!%p3431_p0), %v3181_v21 }
 0x41c   : > { %3124 = vst [vmem:[#allocation2 + $0xb8] sm:$0xff] %v3092_v3  ;;  %v3152_v3 = vld [vmem:[#allocation2 + $0x78] sm:$0xff] (!%p3431_p0) }
 0x41d   : > { %3123 = vst [vmem:[#allocation2 + $0xb0] sm:$0xff] %v3091_v13  ;;  %v3153_v13 = vld [vmem:[#allocation2 + $0x80] sm:$0xff] (!%p3431_p0)  ;;  %3214 = vst [vmem:[%s5008_s7 + $0x68] sm:$0xff] (!%p3431_p0), %v3182_v59 }
 0x41e   : > { %3215 = vst [vmem:[%s5008_s7 + $0x70] sm:$0xff] (!%p3431_p0), %v3183_v18 }
 0x41f   : > { %v3686_v19 = vpop.f32.mrb[120].mxu1 }
 0x420   : > { %v3004_v33 = vadd.f32 %v3686_v19, %v5932_v1  ;;  %v2998_v10 = vpop.f32.mrb[121].mxu1  ;;  %v3154_v19 = vld [vmem:[#allocation2 + $0x88] sm:$0xff] (!%p3431_p0) }
 0x421   : > { %v2999_v16 = vadd.f32 %v5932_v1, %v2998_v10  ;;  %v3186_v10 = vmax.f32 (!%p3431_p0), %v3154_v19, 0.0 }
 0x422   : > { %v3094_v45 = vadd.f32 %v3062_v63, %v3004_v33  ;;  %v3184_v63 = vmax.f32 (!%p3431_p0), %v3152_v3, 0.0  ;;  %v3185_v33 = vmax.f32 (!%p3431_p0), %v3153_v13, 0.0 }
 0x423   : > { %v3093_v27 = vadd.f32 %v3061_v24, %v2999_v16  ;;  %v3155_v24 = vld [vmem:[#allocation2 + $0x90] sm:$0xff] (!%p3431_p0)  ;;  %v3156_v16 = vld [vmem:[#allocation2 + $0x98] sm:$0xff] (!%p3431_p0)  ;;  %3218 = vst [vmem:[%s5008_s7 + $0x88] sm:$0xff] (!%p3431_p0), %v3186_v10 }
 0x424   : > { %3126 = vst [vmem:[#allocation2 + $0xc8] sm:$0xff] %v3094_v45  ;;  %v3157_v45 = vld [vmem:[#allocation2 + $0xa0] sm:$0xff] (!%p3431_p0)  ;;  %3216 = vst [vmem:[%s5008_s7 + $0x78] sm:$0xff] (!%p3431_p0), %v3184_v63 }
 0x425   : > { %3125 = vst [vmem:[#allocation2 + $0xc0] sm:$0xff] %v3093_v27  ;;  %v3187_v27 = vmax.f32 (!%p3431_p0), %v3155_v24, 0.0  ;;  %3217 = vst [vmem:[%s5008_s7 + $0x80] sm:$0xff] (!%p3431_p0), %v3185_v33 }
 0x427   : > { %v3689_v35 = vpop.f32.mrb[122].mxu1  ;;  %3219 = vst [vmem:[%s5008_s7 + $0x90] sm:$0xff] (!%p3431_p0), %v3187_v27 }
 0x428   : > { %v3014_v32 = vadd.f32 %v3689_v35, %v5932_v1  ;;  %v3008_v62 = vpop.f32.mrb[123].mxu1  ;;  %v3188_v35 = vmax.f32 (!%p3431_p0), %v3156_v16, 0.0 }
 0x429   : > { %v3009_v41 = vadd.f32 %v5932_v1, %v3008_v62  ;;  %v3159_v62 = vld [vmem:[#allocation2 + $0xb0] sm:$0xff] (!%p3431_p0) }
 0x42a   : > { %v3096_v42 = vadd.f32 %v3064_v43, %v3014_v32  ;;  %v3189_v43 = vmax.f32 (!%p3431_p0), %v3157_v45, 0.0  ;;  %v3158_v32 = vld [vmem:[#allocation2 + $0xa8] sm:$0xff] (!%p3431_p0)  ;;  %3220 = vst [vmem:[%s5008_s7 + $0x98] sm:$0xff] (!%p3431_p0), %v3188_v35 }
 0x42b   : > { %v3095_v57 = vadd.f32 %v3063_v37, %v3009_v41  ;;  %v3160_v37 = vld [vmem:[#allocation2 + $0xb8] sm:$0xff] (!%p3431_p0)  ;;  %v3190_v41 = vmax.f32 (!%p3431_p0), %v3158_v32, 0.0 }
 0x42c   : > { %3128 = vst [vmem:[#allocation2 + $0xd8] sm:$0xff] %v3096_v42  ;;  %v3191_v42 = vmax.f32 (!%p3431_p0), %v3159_v62, 0.0  ;;  %3221 = vst [vmem:[%s5008_s7 + $0xa0] sm:$0xff] (!%p3431_p0), %v3189_v43 }
 0x42d   : > { %3127 = vst [vmem:[#allocation2 + $0xd0] sm:$0xff] %v3095_v57  ;;  %v3192_v57 = vmax.f32 (!%p3431_p0), %v3160_v37, 0.0  ;;  %3222 = vst [vmem:[%s5008_s7 + $0xa8] sm:$0xff] (!%p3431_p0), %v3190_v41 }
 0x42e   : > { %3223 = vst [vmem:[%s5008_s7 + $0xb0] sm:$0xff] (!%p3431_p0), %v3191_v42 }
 0x42f   : > { %v3692_v49 = vpop.f32.mrb[124].mxu1  ;;  %3224 = vst [vmem:[%s5008_s7 + $0xb8] sm:$0xff] (!%p3431_p0), %v3192_v57 }
 0x430   : > { %v3024_v40 = vadd.f32 %v3692_v49, %v5932_v1  ;;  %v3018_v58 = vpop.f32.mrb[125].mxu1  ;;  %v3161_v49 = vld [vmem:[#allocation2 + $0xc0] sm:$0xff] (!%p3431_p0) }
 0x431   : > { %v3019_v17 = vadd.f32 %v5932_v1, %v3018_v58  ;;  %v3193_v58 = vmax.f32 (!%p3431_p0), %v3161_v49, 0.0 }
 0x432   : > { %v3098_v50 = vadd.f32 %v3066_v31, %v3024_v40  ;;  %v3162_v31 = vld [vmem:[#allocation2 + $0xc8] sm:$0xff] (!%p3431_p0) }
 0x433   : > { %v3097_v22 = vadd.f32 %v3065_v44, %v3019_v17  ;;  %v3194_v44 = vmax.f32 (!%p3431_p0), %v3162_v31, 0.0  ;;  %3225 = vst [vmem:[%s5008_s7 + $0xc0] sm:$0xff] (!%p3431_p0), %v3193_v58 }
 0x434   : > { %3130 = vst [vmem:[#allocation2 + $0xe8] sm:$0xff] %v3098_v50  ;;  %v3163_v40 = vld [vmem:[#allocation2 + $0xd0] sm:$0xff] (!%p3431_p0)  ;;  %v3164_v50 = vld [vmem:[#allocation2 + $0xd8] sm:$0xff] (!%p3431_p0) }
 0x435   : > { %3129 = vst [vmem:[#allocation2 + $0xe0] sm:$0xff] %v3097_v22  ;;  %v3195_v17 = vmax.f32 (!%p3431_p0), %v3163_v40, 0.0  ;;  %3226 = vst [vmem:[%s5008_s7 + $0xc8] sm:$0xff] (!%p3431_p0), %v3194_v44 }
 0x437   : > { %v3695_v25 = vpop.f32.mrb[126].mxu1  ;;  %3136 = sbr.rel (%p3431_p0) target bundleno = 1096 (0x448), region = 68  ;;  %3227 = vst [vmem:[%s5008_s7 + $0xd0] sm:$0xff] (!%p3431_p0), %v3195_v17 }
 0x438   : > { %v3034_v47 = vadd.f32 %v3695_v25, %v5932_v1  ;;  %v3028_v26 = vpop.f32.mrb[127].mxu1 }
 0x439   : > { %v3029_v20 = vadd.f32 %v5932_v1, %v3028_v26  ;;  %v3172_v1 = vmax.f32 (!%p3431_p0), %v3140_v0, 0.0 }
 0x43a   : > { %v3100_v14 = vadd.f32 %v3068_v56, %v3034_v47  ;;  %v3196_v56 = vmax.f32 (!%p3431_p0), %v3164_v50, 0.0 }
 0x43b   : > { %v3099_v15 = vadd.f32 %v3067_v36, %v3029_v20  ;;  %3204 = vst [vmem:[%s5008_s7 + $0x18] sm:$0xff] (!%p3431_p0), %v3172_v1  ;;  %v3166_v25 = vld [vmem:[#allocation2 + $0xe8] sm:$0xff] (!%p3431_p0) }
 0x43c   : > { %3132 = vst [vmem:[#allocation2 + $0xf8] sm:$0xff] %v3100_v14  ;;  %v3165_v22 = vld [vmem:[#allocation2 + $0xe0] sm:$0xff] (!%p3431_p0)  ;;  %v3198_v26 = vmax.f32 (!%p3431_p0), %v3166_v25, 0.0  ;;  %3228 = vst [vmem:[%s5008_s7 + $0xd8] sm:$0xff] (!%p3431_p0), %v3196_v56 }
 0x43d   : > { %3131 = vst [vmem:[#allocation2 + $0xf0] sm:$0xff] %v3099_v15  ;;  %v3197_v47 = vmax.f32 (!%p3431_p0), %v3165_v22, 0.0 }
 0x43e   : > { %3230 = vst [vmem:[%s5008_s7 + $0xe8] sm:$0xff] %v3198_v26 }
 0x43f   : > { %3229 = vst [vmem:[%s5008_s7 + $0xe0] sm:$0xff] %v3197_v47 }
 0x443   : > { %v3168_v20 = vld [vmem:[#allocation2 + $0xf8] sm:$0xff] }
 0x444   : > { %v3167_v36 = vld [vmem:[#allocation2 + $0xf0] sm:$0xff]  ;;  %v3200_v15 = vmax.f32 %v3168_v20, 0.0 }
 0x445   : > { %v3199_v14 = vmax.f32 %v3167_v36, 0.0 }
 0x446   : > { %3232 = vst [vmem:[%s5008_s7 + $0xf8] sm:$0xff] %v3200_v15 }
 0x447   : > { %3231 = vst [vmem:[%s5008_s7 + $0xf0] sm:$0xff] %v3199_v14 }
 0x448 PF: > { %s6146_s9 = sld [smem:[#allocation22_spill]]  ;;  %s6147_s0 = sld [smem:[#allocation34_spill]] }
 0x449   : > { %s3247_s10 = sshll.u32 %s5008_s7, 4  ;;  %s3234_s1 = scalar_lea.sflag [#allocation7], %s4978_s30  ;;  %s6006_s10 = int_to_ptr.vmem [resolvable:$true] %s3247_s10 }
 0x44a   : > { %s4472_s5 = scalar_lea.vmem %s6006_s10, 4096  ;;  %p6148_p11 = scmp.ne.s32.totalorder %s6130_s15, 0 }
 0x44b   : > { %p4473_p12 = scmp.ne.s32.totalorder %s6006_s10, %s4472_s5  ;;  %s4613_s14 = smov [#allocation14]  }
 0x44c   : > { %s4476_s12 = sshll.u32 %s4613_s14, 4  ;;  %s4477_s12 = int_to_ptr.vmem [resolvable:$false] %s4476_s12 }
 0x44d   : > { %p4474_p5 = pnand %p4473_p12, %p6148_p11  ;;  %s4478_s8 = scalar_lea.vmem %s4477_s12, 8192 }
 0x44e   : > { %s3439_s17 = sshll.u32 %s6146_s9, 12  ;;  %p4479_p9 = scmp.lt.s32.totalorder %s6006_s10, %s4477_s12 }
 0x44f   : > { %s6003_s3 = scalar_lea.hbm %s6147_s0, %s3439_s17  ;;  %p4475_p2 = pneg %p4474_p5 }
 0x450   : > { %p4480_p1 = scmp.lt.s32.totalorder %s4478_s8, %s4472_s5 }
 0x452   : > { %p4481_p10 = por %p4480_p1, %p4479_p9 }
 0x454   : > { %p4482_p6 = pnand %p4481_p10, %p4475_p2 }
 0x456   : > { %4485 = shalt.err (!%p4482_p6)
}
 0x457   : > { %s4486_s16 = scalar_lea.hbm %s6003_s3, 4096  ;;  %s4490_s6 = scalar_lea.hbm %s6147_s0, 8192 }
 0x458   : > { %p4487_p7 = scmp.ne.s32.totalorder %s6003_s3, %s4486_s16  ;;  %p4491_p13 = scmp.lt.u32.totalorder %s6003_s3, %s6147_s0 }
 0x459   : > { %p4492_p3 = scmp.lt.u32.totalorder %s4490_s6, %s4486_s16  ;;  %p4494_p12 = scmp.lt.u32.totalorder %s4486_s16, %s6003_s3 }
 0x45a   : > { %p4488_p4 = pnand %p4487_p7, %p6148_p11 }
 0x45b   : > { %p4493_p0 = por %p4492_p3, %p4491_p13 }
 0x45c   : > { %p4489_p8 = pneg %p4488_p4 }
 0x45d   : > { %p4495_p5 = por %p4494_p12, %p4493_p0 }
 0x45f   : > { %p4496_p2 = pnand %p4495_p5, %p4489_p8 }
 0x461   : > { %4499 = shalt.err (!%p4496_p2)
}
 0x462   : > { %s4614_s7 = smov 128   ;;  %s4615_s24 = smov 8  }
 0x463   : > { %4189 = dma.vmem_to_hbm [thread:$0]  (%p6148_p11), %s6006_s10, 4096, %s6003_s3, %s3234_s1, %s4614_s7, %s4614_s7, %s4615_s24  }
 0x464 PF: > { %p4212_p9 = scmp.ge.s32.totalorder %s4602_s28, 2  ;;  %s3262_s27 = sand.u32 1, %s4574_s21  }
 0x465   : > { %p6149_p1 = scmp.ne.s32.totalorder %s6131_s18, 0  ;;  %s3263_s9 = scalar_lea.sflag [#allocation7], %s3262_s27 }
 0x467   : > { %p4208_p10 = pnand %p4212_p9, %p6149_p1 }
 0x469   : > { %4557 = dma.done.wait (!%p4208_p10), %s3263_s9, 4096  }
 0x46a   : > { %4559 = vsyncadd (!%p4208_p10), %s3263_s9, 4294963200  ;;  %s27_s28 = sadd.s32 1, %s4602_s28   ;;  %s6150_s18 = sld [smem:[#allocation19_spill]] }
 0x46b   : > { %p24_p6 = scmp.ge.s32.totalorder %s27_s28, 6   ;;  %s6151_s17 = sld [smem:[#allocation29_spill]] }
 0x46c   : > { %s6152_s15 = sld [smem:[#allocation20_spill]]  ;;  %s6153_s23 = sld [smem:[#allocation30_spill]] }
 0x46d   : > { %s6154_s25 = sld [smem:[#allocation23_spill]]  ;;  %s6155_s30 = sld [smem:[#allocation26_spill]] }
 0x46e   : > { %s6156_s27 = sld [smem:[#allocation27_spill]]  ;;  %s6157_s19 = smov %s4570_s20 }
 0x46f   : > { %s6159_s21 = smov %s4578_s22  ;;  %s6161_s24 = smov %s4594_s26 }
 0x470   :  { %26 = sbr.rel (!%p24_p6) target bundleno = 18 (0x12), region = 143 }
 0x471   : > { %s6158_s20 = smov %s6151_s17 }
 0x472   : > { %s6160_s22 = smov %s6152_s15 }
 0x473   : > { %s6162_s26 = smov %s6155_s30 }
 0x477   :  { %3268 = vsyncpa [#allocation6], 1 }
 0x478   :  { %3270 = vsyncpa [#allocation6 + $0x1], 1 }
 0x479   :  { %3271 = vsyncpa [#allocation9], 1 }
 0x47a   :  { %3273 = vsyncpa [#allocation9 + $0x1], 1 }
 0x47b   :  { %3274 = vsyncpa [#allocation12], 1 }
 0x47c   :  { %3276 = vsyncpa [#allocation12 + $0x1], 1 }
 0x47d   :  { %3277 = vsyncpa [#allocation7], 1 }
 0x47e   :  { %3279 = vsyncpa [#allocation7 + $0x1], 1 }

</bundles_post_ra>
